<compile_context>
chip_gen: v7x
topology: tpu7x:2x2x1
jax: 0.10.0
libtpu: 0.0.40
codegen_flags: <defaults>
</compile_context>

<pallas_src>
import functools

import jax
import jax.numpy as jnp
from jax.experimental import pallas as pl
from jax.experimental.pallas import tpu as pltpu

_NEG = -1e30  # finite "-inf" pad for ceil_mode maxpool (never multiplied by anything big)


def _pool_out_size(n, k, s):
    """Output size of nn.MaxPool2d(k, s, padding=0, ceil_mode=True)."""
    out = -((n - k) // -s) + 1          # ceil((n - k) / s) + 1
    if (out - 1) * s >= n:              # last window must start inside the input
        out -= 1
    return out


def _dft_mats(n):
    idx = jnp.arange(n, dtype=jnp.float32)
    ang = 2.0 * jnp.pi * jnp.outer(idx, idx) / n
    return jnp.cos(ang), jnp.sin(ang)   # symmetric


# ----------------------------- fused SkipConBlock kernel -----------------------------
def _skip_block_kernel(x_ref, selh_ref, selw_ref, w_ref, attn_ref,
                       ch_ref, sh_ref, cw_ref, sw_ref, o_ref,
                       ppad_ref, pat_ref, chw_ref,
                       *, k, s, h, w, c_in, c_out, inv_hw):
    f32 = jnp.float32
    bmm = lambda a, b: jnp.einsum('cij,cjk->cik', a, b, preferred_element_type=f32)

    # ---- MaxPool2d(k, s, ceil_mode=True), all C_in channels per step (VPU) ----
    hm = s * (h - 1) + 1
    wm = s * (w - 1) + 1
    xp = x_ref[0]                                           # (C_in, Hp, Wp)
    m = None
    for dh in range(k):
        for dw in range(k):
            v = xp[:, dh:dh + hm, dw:dw + wm]
            m = v if m is None else jnp.maximum(m, v)
    # stride-s subsampling of window maxima via one-hot selection matmuls (MXU),
    # batched over channels.
    selw = jnp.broadcast_to(selw_ref[...], (c_in, wm, w))
    selh = jnp.broadcast_to(selh_ref[...], (c_in, h, hm))
    t = bmm(m, selw)                                        # (C_in, Hm, W)
    pooled = bmm(selh, t)                                   # (C_in, H, W)

    # ---- zero-padded pooled map, relaid out H-major for the conv GEMM ----
    ppad_ref[...] = jnp.zeros_like(ppad_ref)                # (H+2, C_in, W+2)
    for c in range(c_in):
        ppad_ref[1:h + 1, c, 1:w + 1] = pooled[c]

    # ---- im2col patches (H, 9*C_in + 1, W); last feature row = ones (folded bias) ----
    tap = 0
    for dy in range(3):
        for dx in range(3):
            pat_ref[:, tap * c_in:(tap + 1) * c_in, :] = ppad_ref[dy:dy + h, :, dx:dx + w]
            tap += 1
    pat_ref[:, 9 * c_in, :] = jnp.ones((h, w), f32)

    # ---- conv3x3 + folded BatchNorm as one batched GEMM (bf16 x bf16 -> f32) + ReLU ----
    patches = pat_ref[...].astype(jnp.bfloat16)                       # (H, K, W)
    wb = jnp.broadcast_to(w_ref[...], (h, c_out, 9 * c_in + 1))       # bf16
    z = jnp.einsum('hok,hkw->how', wb, patches, preferred_element_type=f32)
    act_how = jnp.maximum(z, 0.0)                                     # (H, C_out, W)

    # ---- relayout to channel-major (C_out, H, W) for the separable DFTs ----
    for hh in range(h):
        chw_ref[:, hh, :] = act_how[hh]
    act = chw_ref[...]                                                # (C_out, H, W)

    # ---- ff_parser.Conditioning: real(ifft2(fft2(act) * attn_map)) ----
    # separable real/imag DFTs, batched over channels (no (HW,HW) Kronecker operands)
    # TODO(synk): real-input rfft symmetry (half the W-frequency columns) not exploited.
    ch = jnp.broadcast_to(ch_ref[...], (c_out, h, h))
    sh = jnp.broadcast_to(sh_ref[...], (c_out, h, h))
    cw = jnp.broadcast_to(cw_ref[...], (c_out, w, w))
    sw = jnp.broadcast_to(sw_ref[...], (c_out, w, w))
    fr = bmm(ch, act)                                   # forward DFT along H
    fi = -bmm(sh, act)
    gr = bmm(fr, cw) + bmm(fi, sw)                      # forward DFT along W
    gi = bmm(fi, cw) - bmm(fr, sw)
    amap = attn_ref[...]
    yr = amap * gr                                      # frequency-domain modulation
    yi = amap * gi
    ur = bmm(ch, yr) - bmm(sh, yi)                      # inverse DFT along H
    ui = bmm(ch, yi) + bmm(sh, yr)
    o_ref[0] = (bmm(ur, cw) - bmm(ui, sw)) * inv_hw     # inverse along W, real part


def skip_con_block_forward(x, params, maxpool_k, maxpool_s):
    """SkipConBlock.forward.  x: (N, C_in, H_in, W_in) float32, NCHW."""
    n, c_in, h_in, w_in = x.shape
    k, s = maxpool_k, maxpool_s
    w_conv = params["conv_w"]            # (C_out, C_in, 3, 3)
    b_conv = params["conv_b"]            # (C_out,)
    gamma, beta = params["bn_gamma"], params["bn_beta"]
    rmean, rvar, eps = params["bn_mean"], params["bn_var"], params["bn_eps"]
    attn = params["ff_attn_map"]         # (C_out, fmap, fmap)
    c_out = w_conv.shape[0]

    h = _pool_out_size(h_in, k, s)
    w = _pool_out_size(w_in, k, s)
    assert attn.shape == (c_out, h, w), "fmap_size_for_ff_parser must equal pooled spatial size"
    hm = s * (h - 1) + 1
    wm = s * (w - 1) + 1
    hp = s * (h - 1) + k
    wp = s * (w - 1) + k

    # ceil_mode maxpool padding (finite -inf, never selected over real data)
    xpad = jnp.pad(x, ((0, 0), (0, 0), (0, hp - h_in), (0, wp - w_in)),
                   constant_values=_NEG)

    # one-hot stride-s selection matrices for the pooling subsample
    selh = (jnp.arange(h)[:, None] * s == jnp.arange(hm)[None, :]).astype(jnp.float32)
    selw = (jnp.arange(wm)[:, None] == jnp.arange(w)[None, :] * s).astype(jnp.float32)

    # fold conv bias + inference BatchNorm into the GEMM weight (+ bias column)
    # TODO(synk): training-mode BatchNorm (batch statistics) is not computed in-kernel.
    inv_std = jax.lax.rsqrt(rvar + eps)
    scale = gamma * inv_std
    bias_col = scale * (b_conv - rmean) + beta
    w_mat = jnp.transpose(w_conv, (0, 2, 3, 1)).reshape(c_out, 9 * c_in)
    w_aug = jnp.concatenate([w_mat * scale[:, None], bias_col[:, None]],
                            axis=1).astype(jnp.bfloat16)              # (C_out, 9*C_in+1)

    # separable per-axis real/imag DFT matrices (only H^2 + W^2 elements)
    ch_, sh_ = _dft_mats(h)
    cw_, sw_ = _dft_mats(w)

    kern = functools.partial(_skip_block_kernel, k=k, s=s, h=h, w=w,
                             c_in=c_in, c_out=c_out, inv_hw=1.0 / float(h * w))
    return pl.pallas_call(
        kern,
        grid=(n,),
        in_specs=[
            pl.BlockSpec((1, c_in, hp, wp), lambda i: (i, 0, 0, 0)),
            pl.BlockSpec((h, hm), lambda i: (0, 0)),
            pl.BlockSpec((wm, w), lambda i: (0, 0)),
            pl.BlockSpec((c_out, 9 * c_in + 1), lambda i: (0, 0)),
            pl.BlockSpec((c_out, h, w), lambda i: (0, 0, 0)),
            pl.BlockSpec((h, h), lambda i: (0, 0)),
            pl.BlockSpec((h, h), lambda i: (0, 0)),
            pl.BlockSpec((w, w), lambda i: (0, 0)),
            pl.BlockSpec((w, w), lambda i: (0, 0)),
        ],
        out_specs=pl.BlockSpec((1, c_out, h, w), lambda i: (i, 0, 0, 0)),
        out_shape=jax.ShapeDtypeStruct((n, c_out, h, w), jnp.float32),
        scratch_shapes=[
            pltpu.VMEM((h + 2, c_in, w + 2), jnp.float32),   # zero-padded pooled, H-major
            pltpu.VMEM((h, 9 * c_in + 1, w), jnp.float32),   # im2col patches (+ ones row)
            pltpu.VMEM((c_out, h, w), jnp.float32),          # activation, channel-major
        ],
        compiler_params=pltpu.CompilerParams(
            dimension_semantics=("parallel",)),
    )(xpad, selh, selw, w_aug, attn, ch_, sh_, cw_, sw_)


# ------------------------------- deterministic params -------------------------------
def init_params(key, ch_in, ch_out, fmap):
    ks = jax.random.split(key, 6)
    conv_w = jax.random.normal(ks[0], (ch_out, ch_in, 3, 3), jnp.float32) / jnp.sqrt(9.0 * ch_in)
    conv_b = 0.1 * jax.random.normal(ks[1], (ch_out,), jnp.float32)
    bn_gamma = 1.0 + 0.1 * jax.random.normal(ks[2], (ch_out,), jnp.float32)
    bn_beta = 0.1 * jax.random.normal(ks[3], (ch_out,), jnp.float32)
    bn_mean = 0.1 * jax.random.normal(ks[4], (ch_out,), jnp.float32)
    bn_var = 1.0 + 0.5 * jax.random.uniform(ks[5], (ch_out,), jnp.float32)
    # module inits the ff-parser attn map to ones; perturb deterministically so the path is exercised
    attn = 1.0 + 0.2 * jax.random.normal(jax.random.fold_in(key, 7),
                                         (ch_out, fmap, fmap), jnp.float32)
    return dict(conv_w=conv_w, conv_b=conv_b, bn_gamma=bn_gamma, bn_beta=bn_beta,
                bn_mean=bn_mean, bn_var=bn_var, bn_eps=1e-5, ff_attn_map=attn)


# ---------------------------------- pure-JAX reference ----------------------------------
def reference_forward(x, params, k, s):
    w_conv, b_conv = params["conv_w"], params["conv_b"]
    gamma, beta = params["bn_gamma"], params["bn_beta"]
    rmean, rvar, eps = params["bn_mean"], params["bn_var"], params["bn_eps"]
    attn = params["ff_attn_map"]
    _, _, h_in, w_in = x.shape
    h_out = _pool_out_size(h_in, k, s)
    w_out = _pool_out_size(w_in, k, s)
    hp = s * (h_out - 1) + k
    wp = s * (w_out - 1) + k
    xp = jnp.pad(x, ((0, 0), (0, 0), (0, hp - h_in), (0, wp - w_in)), constant_values=_NEG)
    pooled = jax.lax.reduce_window(xp, -jnp.inf, jax.lax.max,
                                   (1, 1, k, k), (1, 1, s, s), "VALID")
    conv = jax.lax.conv_general_dilated(
        pooled, w_conv, window_strides=(1, 1), padding=((1, 1), (1, 1)),
        dimension_numbers=("NCHW", "OIHW", "NCHW"),
        precision=jax.lax.Precision.HIGHEST) + b_conv[None, :, None, None]
    z = (gamma[None, :, None, None] * (conv - rmean[None, :, None, None])
         * jax.lax.rsqrt(rvar + eps)[None, :, None, None] + beta[None, :, None, None])
    a = jnp.maximum(z, 0.0)
    f = jnp.fft.fft2(a) * attn[None].astype(jnp.complex64)
    return jnp.real(jnp.fft.ifft2(f)).astype(jnp.float32)


if __name__ == "__main__":
    key = jax.random.PRNGKey(0)
    n, ch_in, ch_out, hin = 2, 4, 8, 16
    pool_k = pool_s = 2
    fmap = _pool_out_size(hin, pool_k, pool_s)          # 8

    kx, kp = jax.random.split(key)
    x = jax.random.normal(kx, (n, ch_in, hin, hin), jnp.float32)
    params = init_params(kp, ch_in, ch_out, fmap)

    fwd = jax.jit(functools.partial(skip_con_block_forward,
                                    maxpool_k=pool_k, maxpool_s=pool_s))
    out = jax.block_until_ready(fwd(x, params))

    ref = reference_forward(x, params, pool_k, pool_s)
    assert out.shape == ref.shape == (n, ch_out, fmap, fmap)
    err = float(jnp.max(jnp.abs(out - ref)))
    assert err < 5e-2 * (1.0 + float(jnp.max(jnp.abs(ref)))), f"max abs err {err}"
    print("KERNEL_OK")
</pallas_src>

<mosaic_0001>
module attributes {stable_mosaic.version = 11 : i64} {
  func.func @_skip_block_kernel(%arg0: i32, %arg1: memref<1x4x16x16xf32, #tpu.memory_space<vmem>>, %arg2: memref<8x15xf32, #tpu.memory_space<vmem>>, %arg3: memref<15x8xf32, #tpu.memory_space<vmem>>, %arg4: memref<8x37xbf16, #tpu.memory_space<vmem>>, %arg5: memref<8x8x8xf32, #tpu.memory_space<vmem>>, %arg6: memref<8x8xf32, #tpu.memory_space<vmem>>, %arg7: memref<8x8xf32, #tpu.memory_space<vmem>>, %arg8: memref<8x8xf32, #tpu.memory_space<vmem>>, %arg9: memref<8x8xf32, #tpu.memory_space<vmem>>, %arg10: memref<1x8x8x8xf32, #tpu.memory_space<vmem>>, %arg11: memref<10x4x10xf32, #tpu.memory_space<vmem>>, %arg12: memref<8x37x8xf32, #tpu.memory_space<vmem>>, %arg13: memref<8x8x8xf32, #tpu.memory_space<vmem>>) attributes {dimension_semantics = [#tpu.dimension_semantics<parallel>], iteration_bounds = array<i64: 2>, scalar_prefetch = 0 : i64, scratch_operands = 3 : i64, tpu.core_type = #tpu.core_type<tc>, window_params = [{transform_indices = @transform_0, window_bounds = array<i64: 1, 4, 16, 16>}, {pipeline_mode = #tpu.pipeline_mode<synchronous>, transform_indices = @transform_1, window_bounds = array<i64: 8, 15>}, {pipeline_mode = #tpu.pipeline_mode<synchronous>, transform_indices = @transform_2, window_bounds = array<i64: 15, 8>}, {pipeline_mode = #tpu.pipeline_mode<synchronous>, transform_indices = @transform_3, window_bounds = array<i64: 8, 37>}, {pipeline_mode = #tpu.pipeline_mode<synchronous>, transform_indices = @transform_4, window_bounds = array<i64: 8, 8, 8>}, {pipeline_mode = #tpu.pipeline_mode<synchronous>, transform_indices = @transform_5, window_bounds = array<i64: 8, 8>}, {pipeline_mode = #tpu.pipeline_mode<synchronous>, transform_indices = @transform_6, window_bounds = array<i64: 8, 8>}, {pipeline_mode = #tpu.pipeline_mode<synchronous>, transform_indices = @transform_7, window_bounds = array<i64: 8, 8>}, {pipeline_mode = #tpu.pipeline_mode<synchronous>, transform_indices = @transform_8, window_bounds = array<i64: 8, 8>}, {transform_indices = @transform_9, window_bounds = array<i64: 1, 8, 8, 8>}]} {
    %c0 = arith.constant 0 : index
    %c0_0 = arith.constant 0 : index
    %c0_1 = arith.constant 0 : index
    %c0_2 = arith.constant 0 : index
    %0 = vector.load %arg1[%c0, %c0_0, %c0_1, %c0_2] : memref<1x4x16x16xf32, #tpu.memory_space<vmem>>, vector<1x4x16x16xf32>
    %1 = vector.shape_cast %0 : vector<1x4x16x16xf32> to vector<4x16x16xf32>
    %2 = vector.extract_strided_slice %1 {offsets = [0, 0, 0], sizes = [4, 15, 15], strides = [1, 1, 1]} : vector<4x16x16xf32> to vector<4x15x15xf32>
    %3 = vector.extract_strided_slice %1 {offsets = [0, 0, 1], sizes = [4, 15, 15], strides = [1, 1, 1]} : vector<4x16x16xf32> to vector<4x15x15xf32>
    %4 = arith.maximumf %2, %3 : vector<4x15x15xf32>
    %5 = vector.extract_strided_slice %1 {offsets = [0, 1, 0], sizes = [4, 15, 15], strides = [1, 1, 1]} : vector<4x16x16xf32> to vector<4x15x15xf32>
    %6 = arith.maximumf %4, %5 : vector<4x15x15xf32>
    %7 = vector.extract_strided_slice %1 {offsets = [0, 1, 1], sizes = [4, 15, 15], strides = [1, 1, 1]} : vector<4x16x16xf32> to vector<4x15x15xf32>
    %8 = arith.maximumf %6, %7 : vector<4x15x15xf32>
    %c0_3 = arith.constant 0 : index
    %c0_4 = arith.constant 0 : index
    %9 = vector.load %arg3[%c0_3, %c0_4] : memref<15x8xf32, #tpu.memory_space<vmem>>, vector<15x8xf32>
    %10 = vector.shape_cast %9 : vector<15x8xf32> to vector<1x15x8xf32>
    %11 = vector.broadcast %10 : vector<1x15x8xf32> to vector<4x15x8xf32>
    %c0_5 = arith.constant 0 : index
    %c0_6 = arith.constant 0 : index
    %12 = vector.load %arg2[%c0_5, %c0_6] : memref<8x15xf32, #tpu.memory_space<vmem>>, vector<8x15xf32>
    %13 = vector.shape_cast %12 : vector<8x15xf32> to vector<1x8x15xf32>
    %14 = vector.broadcast %13 : vector<1x8x15xf32> to vector<4x8x15xf32>
    "tpu.trace_start"() <{level = 10 : i32, message = "cij,cjk->cik"}> : () -> ()
    %cst = arith.constant dense<0.000000e+00> : vector<4x15x8xf32>
    %15 = tpu.matmul %8, %11, %cst {dimension_numbers = #tpu.dot_dimension_numbers<[2], [1], [1], [2], [0, 0, 0, 1, 1, 2], [0], [0]>} : vector<4x15x15xf32>, vector<4x15x8xf32>, vector<4x15x8xf32> -> vector<4x15x8xf32>
    %cst_7 = arith.constant dense<0.000000e+00> : vector<4x8x8xf32>
    %16 = tpu.matmul %14, %15, %cst_7 {dimension_numbers = #tpu.dot_dimension_numbers<[2], [1], [1], [2], [0, 0, 0, 1, 1, 2], [0], [0]>} : vector<4x8x15xf32>, vector<4x15x8xf32>, vector<4x8x8xf32> -> vector<4x8x8xf32>
    %cst_8 = arith.constant 0.000000e+00 : f32
    "tpu.trace_stop"() : () -> ()
    %17 = vector.broadcast %cst_8 : f32 to vector<10x4x10xf32>
    %c0_9 = arith.constant 0 : index
    %c0_10 = arith.constant 0 : index
    %c0_11 = arith.constant 0 : index
    %18 = vector.load %arg11[%c0_9, %c0_10, %c0_11] : memref<10x4x10xf32, #tpu.memory_space<vmem>>, vector<10x4x10xf32>
    tpu.vector_store %arg11[%c0_9, %c0_10, %c0_11], %17 {strides = array<i32>} : memref<10x4x10xf32, #tpu.memory_space<vmem>>, vector<10x4x10xf32>,
    %19 = vector.extract_strided_slice %16 {offsets = [0, 0, 0], sizes = [1, 8, 8], strides = [1, 1, 1]} : vector<4x8x8xf32> to vector<1x8x8xf32>
    %20 = vector.shape_cast %19 : vector<1x8x8xf32> to vector<8x8xf32>
    %c1 = arith.constant 1 : index
    %c0_12 = arith.constant 0 : index
    %c1_13 = arith.constant 1 : index
    %21 = vector.load %arg11[%c1, %c0_12, %c1_13] : memref<10x4x10xf32, #tpu.memory_space<vmem>>, vector<8x1x8xf32>
    %22 = vector.shape_cast %21 : vector<8x1x8xf32> to vector<8x8xf32>
    %23 = vector.shape_cast %20 : vector<8x8xf32> to vector<8x1x8xf32>
    tpu.vector_store %arg11[%c1, %c0_12, %c1_13], %23 {strides = array<i32>} : memref<10x4x10xf32, #tpu.memory_space<vmem>>, vector<8x1x8xf32>,
    %24 = vector.extract_strided_slice %16 {offsets = [1, 0, 0], sizes = [1, 8, 8], strides = [1, 1, 1]} : vector<4x8x8xf32> to vector<1x8x8xf32>
    %25 = vector.shape_cast %24 : vector<1x8x8xf32> to vector<8x8xf32>
    %c1_14 = arith.constant 1 : index
    %c1_15 = arith.constant 1 : index
    %c1_16 = arith.constant 1 : index
    %26 = vector.load %arg11[%c1_14, %c1_15, %c1_16] : memref<10x4x10xf32, #tpu.memory_space<vmem>>, vector<8x1x8xf32>
    %27 = vector.shape_cast %26 : vector<8x1x8xf32> to vector<8x8xf32>
    %28 = vector.shape_cast %25 : vector<8x8xf32> to vector<8x1x8xf32>
    tpu.vector_store %arg11[%c1_14, %c1_15, %c1_16], %28 {strides = array<i32>} : memref<10x4x10xf32, #tpu.memory_space<vmem>>, vector<8x1x8xf32>,
    %29 = vector.extract_strided_slice %16 {offsets = [2, 0, 0], sizes = [1, 8, 8], strides = [1, 1, 1]} : vector<4x8x8xf32> to vector<1x8x8xf32>
    %30 = vector.shape_cast %29 : vector<1x8x8xf32> to vector<8x8xf32>
    %c1_17 = arith.constant 1 : index
    %c2 = arith.constant 2 : index
    %c1_18 = arith.constant 1 : index
    %31 = vector.load %arg11[%c1_17, %c2, %c1_18] : memref<10x4x10xf32, #tpu.memory_space<vmem>>, vector<8x1x8xf32>
    %32 = vector.shape_cast %31 : vector<8x1x8xf32> to vector<8x8xf32>
    %33 = vector.shape_cast %30 : vector<8x8xf32> to vector<8x1x8xf32>
    tpu.vector_store %arg11[%c1_17, %c2, %c1_18], %33 {strides = array<i32>} : memref<10x4x10xf32, #tpu.memory_space<vmem>>, vector<8x1x8xf32>,
    %34 = vector.extract_strided_slice %16 {offsets = [3, 0, 0], sizes = [1, 8, 8], strides = [1, 1, 1]} : vector<4x8x8xf32> to vector<1x8x8xf32>
    %35 = vector.shape_cast %34 : vector<1x8x8xf32> to vector<8x8xf32>
    %c1_19 = arith.constant 1 : index
    %c3 = arith.constant 3 : index
    %c1_20 = arith.constant 1 : index
    %36 = vector.load %arg11[%c1_19, %c3, %c1_20] : memref<10x4x10xf32, #tpu.memory_space<vmem>>, vector<8x1x8xf32>
    %37 = vector.shape_cast %36 : vector<8x1x8xf32> to vector<8x8xf32>
    %38 = vector.shape_cast %35 : vector<8x8xf32> to vector<8x1x8xf32>
    tpu.vector_store %arg11[%c1_19, %c3, %c1_20], %38 {strides = array<i32>} : memref<10x4x10xf32, #tpu.memory_space<vmem>>, vector<8x1x8xf32>,
    %c0_21 = arith.constant 0 : index
    %c0_22 = arith.constant 0 : index
    %c0_23 = arith.constant 0 : index
    %39 = vector.load %arg11[%c0_21, %c0_22, %c0_23] : memref<10x4x10xf32, #tpu.memory_space<vmem>>, vector<8x4x8xf32>
    %c0_24 = arith.constant 0 : index
    %c0_25 = arith.constant 0 : index
    %c0_26 = arith.constant 0 : index
    %40 = vector.load %arg12[%c0_24, %c0_25, %c0_26] : memref<8x37x8xf32, #tpu.memory_space<vmem>>, vector<8x4x8xf32>
    tpu.vector_store %arg12[%c0_24, %c0_25, %c0_26], %39 {strides = array<i32>} : memref<8x37x8xf32, #tpu.memory_space<vmem>>, vector<8x4x8xf32>,
    %c0_27 = arith.constant 0 : index
    %c0_28 = arith.constant 0 : index
    %c1_29 = arith.constant 1 : index
    %41 = vector.load %arg11[%c0_27, %c0_28, %c1_29] : memref<10x4x10xf32, #tpu.memory_space<vmem>>, vector<8x4x8xf32>
    %c0_30 = arith.constant 0 : index
    %c4 = arith.constant 4 : index
    %c0_31 = arith.constant 0 : index
    %42 = vector.load %arg12[%c0_30, %c4, %c0_31] : memref<8x37x8xf32, #tpu.memory_space<vmem>>, vector<8x4x8xf32>
    tpu.vector_store %arg12[%c0_30, %c4, %c0_31], %41 {strides = array<i32>} : memref<8x37x8xf32, #tpu.memory_space<vmem>>, vector<8x4x8xf32>,
    %c0_32 = arith.constant 0 : index
    %c0_33 = arith.constant 0 : index
    %c2_34 = arith.constant 2 : index
    %43 = vector.load %arg11[%c0_32, %c0_33, %c2_34] : memref<10x4x10xf32, #tpu.memory_space<vmem>>, vector<8x4x8xf32>
    %c0_35 = arith.constant 0 : index
    %c8 = arith.constant 8 : index
    %c0_36 = arith.constant 0 : index
    %44 = vector.load %arg12[%c0_35, %c8, %c0_36] : memref<8x37x8xf32, #tpu.memory_space<vmem>>, vector<8x4x8xf32>
    tpu.vector_store %arg12[%c0_35, %c8, %c0_36], %43 {strides = array<i32>} : memref<8x37x8xf32, #tpu.memory_space<vmem>>, vector<8x4x8xf32>,
    %c1_37 = arith.constant 1 : index
    %c0_38 = arith.constant 0 : index
    %c0_39 = arith.constant 0 : index
    %45 = vector.load %arg11[%c1_37, %c0_38, %c0_39] : memref<10x4x10xf32, #tpu.memory_space<vmem>>, vector<8x4x8xf32>
    %c0_40 = arith.constant 0 : index
    %c12 = arith.constant 12 : index
    %c0_41 = arith.constant 0 : index
    %46 = vector.load %arg12[%c0_40, %c12, %c0_41] : memref<8x37x8xf32, #tpu.memory_space<vmem>>, vector<8x4x8xf32>
    tpu.vector_store %arg12[%c0_40, %c12, %c0_41], %45 {strides = array<i32>} : memref<8x37x8xf32, #tpu.memory_space<vmem>>, vector<8x4x8xf32>,
    %c1_42 = arith.constant 1 : index
    %c0_43 = arith.constant 0 : index
    %c1_44 = arith.constant 1 : index
    %47 = vector.load %arg11[%c1_42, %c0_43, %c1_44] : memref<10x4x10xf32, #tpu.memory_space<vmem>>, vector<8x4x8xf32>
    %c0_45 = arith.constant 0 : index
    %c16 = arith.constant 16 : index
    %c0_46 = arith.constant 0 : index
    %48 = vector.load %arg12[%c0_45, %c16, %c0_46] : memref<8x37x8xf32, #tpu.memory_space<vmem>>, vector<8x4x8xf32>
    tpu.vector_store %arg12[%c0_45, %c16, %c0_46], %47 {strides = array<i32>} : memref<8x37x8xf32, #tpu.memory_space<vmem>>, vector<8x4x8xf32>,
    %c1_47 = arith.constant 1 : index
    %c0_48 = arith.constant 0 : index
    %c2_49 = arith.constant 2 : index
    %49 = vector.load %arg11[%c1_47, %c0_48, %c2_49] : memref<10x4x10xf32, #tpu.memory_space<vmem>>, vector<8x4x8xf32>
    %c0_50 = arith.constant 0 : index
    %c20 = arith.constant 20 : index
    %c0_51 = arith.constant 0 : index
    %50 = vector.load %arg12[%c0_50, %c20, %c0_51] : memref<8x37x8xf32, #tpu.memory_space<vmem>>, vector<8x4x8xf32>
    tpu.vector_store %arg12[%c0_50, %c20, %c0_51], %49 {strides = array<i32>} : memref<8x37x8xf32, #tpu.memory_space<vmem>>, vector<8x4x8xf32>,
    %c2_52 = arith.constant 2 : index
    %c0_53 = arith.constant 0 : index
    %c0_54 = arith.constant 0 : index
    %51 = vector.load %arg11[%c2_52, %c0_53, %c0_54] : memref<10x4x10xf32, #tpu.memory_space<vmem>>, vector<8x4x8xf32>
    %c0_55 = arith.constant 0 : index
    %c24 = arith.constant 24 : index
    %c0_56 = arith.constant 0 : index
    %52 = vector.load %arg12[%c0_55, %c24, %c0_56] : memref<8x37x8xf32, #tpu.memory_space<vmem>>, vector<8x4x8xf32>
    tpu.vector_store %arg12[%c0_55, %c24, %c0_56], %51 {strides = array<i32>} : memref<8x37x8xf32, #tpu.memory_space<vmem>>, vector<8x4x8xf32>,
    %c2_57 = arith.constant 2 : index
    %c0_58 = arith.constant 0 : index
    %c1_59 = arith.constant 1 : index
    %53 = vector.load %arg11[%c2_57, %c0_58, %c1_59] : memref<10x4x10xf32, #tpu.memory_space<vmem>>, vector<8x4x8xf32>
    %c0_60 = arith.constant 0 : index
    %c28 = arith.constant 28 : index
    %c0_61 = arith.constant 0 : index
    %54 = vector.load %arg12[%c0_60, %c28, %c0_61] : memref<8x37x8xf32, #tpu.memory_space<vmem>>, vector<8x4x8xf32>
    tpu.vector_store %arg12[%c0_60, %c28, %c0_61], %53 {strides = array<i32>} : memref<8x37x8xf32, #tpu.memory_space<vmem>>, vector<8x4x8xf32>,
    %c2_62 = arith.constant 2 : index
    %c0_63 = arith.constant 0 : index
    %c2_64 = arith.constant 2 : index
    %55 = vector.load %arg11[%c2_62, %c0_63, %c2_64] : memref<10x4x10xf32, #tpu.memory_space<vmem>>, vector<8x4x8xf32>
    %c0_65 = arith.constant 0 : index
    %c32 = arith.constant 32 : index
    %c0_66 = arith.constant 0 : index
    %56 = vector.load %arg12[%c0_65, %c32, %c0_66] : memref<8x37x8xf32, #tpu.memory_space<vmem>>, vector<8x4x8xf32>
    tpu.vector_store %arg12[%c0_65, %c32, %c0_66], %55 {strides = array<i32>} : memref<8x37x8xf32, #tpu.memory_space<vmem>>, vector<8x4x8xf32>,
    %cst_67 = arith.constant 1.000000e+00 : f32
    %57 = vector.broadcast %cst_67 : f32 to vector<8x8xf32>
    %c0_68 = arith.constant 0 : index
    %c36 = arith.constant 36 : index
    %c0_69 = arith.constant 0 : index
    %58 = vector.load %arg12[%c0_68, %c36, %c0_69] : memref<8x37x8xf32, #tpu.memory_space<vmem>>, vector<8x1x8xf32>
    %59 = vector.shape_cast %58 : vector<8x1x8xf32> to vector<8x8xf32>
    %60 = vector.shape_cast %57 : vector<8x8xf32> to vector<8x1x8xf32>
    tpu.vector_store %arg12[%c0_68, %c36, %c0_69], %60 {strides = array<i32>} : memref<8x37x8xf32, #tpu.memory_space<vmem>>, vector<8x1x8xf32>,
    %c0_70 = arith.constant 0 : index
    %c0_71 = arith.constant 0 : index
    %c0_72 = arith.constant 0 : index
    %61 = vector.load %arg12[%c0_70, %c0_71, %c0_72] : memref<8x37x8xf32, #tpu.memory_space<vmem>>, vector<8x37x8xf32>
    %62 = arith.truncf %61 : vector<8x37x8xf32> to vector<8x37x8xbf16>
    %c0_73 = arith.constant 0 : index
    %c0_74 = arith.constant 0 : index
    %63 = vector.load %arg4[%c0_73, %c0_74] : memref<8x37xbf16, #tpu.memory_space<vmem>>, vector<8x37xbf16>
    %64 = vector.shape_cast %63 : vector<8x37xbf16> to vector<1x8x37xbf16>
    %65 = vector.broadcast %64 : vector<1x8x37xbf16> to vector<8x8x37xbf16>
    "tpu.trace_start"() <{level = 10 : i32, message = "hok,hkw->how"}> : () -> ()
    %cst_75 = arith.constant dense<0.000000e+00> : vector<8x8x8xf32>
    %66 = tpu.matmul %65, %62, %cst_75 {dimension_numbers = #tpu.dot_dimension_numbers<[2], [1], [1], [2], [0, 0, 0, 1, 1, 2], [0], [0]>} : vector<8x8x37xbf16>, vector<8x37x8xbf16>, vector<8x8x8xf32> -> vector<8x8x8xf32>
    "tpu.trace_stop"() : () -> ()
    %cst_76 = arith.constant 0.000000e+00 : f32
    %67 = vector.broadcast %cst_76 : f32 to vector<8x8x8xf32>
    %68 = arith.maximumf %66, %67 : vector<8x8x8xf32>
    %69 = vector.extract_strided_slice %68 {offsets = [0, 0, 0], sizes = [1, 8, 8], strides = [1, 1, 1]} : vector<8x8x8xf32> to vector<1x8x8xf32>
    %70 = vector.shape_cast %69 : vector<1x8x8xf32> to vector<8x8xf32>
    %c0_77 = arith.constant 0 : index
    %c0_78 = arith.constant 0 : index
    %c0_79 = arith.constant 0 : index
    %71 = vector.load %arg13[%c0_77, %c0_78, %c0_79] : memref<8x8x8xf32, #tpu.memory_space<vmem>>, vector<8x1x8xf32>
    %72 = vector.shape_cast %71 : vector<8x1x8xf32> to vector<8x8xf32>
    %73 = vector.shape_cast %70 : vector<8x8xf32> to vector<8x1x8xf32>
    tpu.vector_store %arg13[%c0_77, %c0_78, %c0_79], %73 {strides = array<i32>} : memref<8x8x8xf32, #tpu.memory_space<vmem>>, vector<8x1x8xf32>,
    %74 = vector.extract_strided_slice %68 {offsets = [1, 0, 0], sizes = [1, 8, 8], strides = [1, 1, 1]} : vector<8x8x8xf32> to vector<1x8x8xf32>
    %75 = vector.shape_cast %74 : vector<1x8x8xf32> to vector<8x8xf32>
    %c0_80 = arith.constant 0 : index
    %c1_81 = arith.constant 1 : index
    %c0_82 = arith.constant 0 : index
    %76 = vector.load %arg13[%c0_80, %c1_81, %c0_82] : memref<8x8x8xf32, #tpu.memory_space<vmem>>, vector<8x1x8xf32>
    %77 = vector.shape_cast %76 : vector<8x1x8xf32> to vector<8x8xf32>
    %78 = vector.shape_cast %75 : vector<8x8xf32> to vector<8x1x8xf32>
    tpu.vector_store %arg13[%c0_80, %c1_81, %c0_82], %78 {strides = array<i32>} : memref<8x8x8xf32, #tpu.memory_space<vmem>>, vector<8x1x8xf32>,
    %79 = vector.extract_strided_slice %68 {offsets = [2, 0, 0], sizes = [1, 8, 8], strides = [1, 1, 1]} : vector<8x8x8xf32> to vector<1x8x8xf32>
    %80 = vector.shape_cast %79 : vector<1x8x8xf32> to vector<8x8xf32>
    %c0_83 = arith.constant 0 : index
    %c2_84 = arith.constant 2 : index
    %c0_85 = arith.constant 0 : index
    %81 = vector.load %arg13[%c0_83, %c2_84, %c0_85] : memref<8x8x8xf32, #tpu.memory_space<vmem>>, vector<8x1x8xf32>
    %82 = vector.shape_cast %81 : vector<8x1x8xf32> to vector<8x8xf32>
    %83 = vector.shape_cast %80 : vector<8x8xf32> to vector<8x1x8xf32>
    tpu.vector_store %arg13[%c0_83, %c2_84, %c0_85], %83 {strides = array<i32>} : memref<8x8x8xf32, #tpu.memory_space<vmem>>, vector<8x1x8xf32>,
    %84 = vector.extract_strided_slice %68 {offsets = [3, 0, 0], sizes = [1, 8, 8], strides = [1, 1, 1]} : vector<8x8x8xf32> to vector<1x8x8xf32>
    %85 = vector.shape_cast %84 : vector<1x8x8xf32> to vector<8x8xf32>
    %c0_86 = arith.constant 0 : index
    %c3_87 = arith.constant 3 : index
    %c0_88 = arith.constant 0 : index
    %86 = vector.load %arg13[%c0_86, %c3_87, %c0_88] : memref<8x8x8xf32, #tpu.memory_space<vmem>>, vector<8x1x8xf32>
    %87 = vector.shape_cast %86 : vector<8x1x8xf32> to vector<8x8xf32>
    %88 = vector.shape_cast %85 : vector<8x8xf32> to vector<8x1x8xf32>
    tpu.vector_store %arg13[%c0_86, %c3_87, %c0_88], %88 {strides = array<i32>} : memref<8x8x8xf32, #tpu.memory_space<vmem>>, vector<8x1x8xf32>,
    %89 = vector.extract_strided_slice %68 {offsets = [4, 0, 0], sizes = [1, 8, 8], strides = [1, 1, 1]} : vector<8x8x8xf32> to vector<1x8x8xf32>
    %90 = vector.shape_cast %89 : vector<1x8x8xf32> to vector<8x8xf32>
    %c0_89 = arith.constant 0 : index
    %c4_90 = arith.constant 4 : index
    %c0_91 = arith.constant 0 : index
    %91 = vector.load %arg13[%c0_89, %c4_90, %c0_91] : memref<8x8x8xf32, #tpu.memory_space<vmem>>, vector<8x1x8xf32>
    %92 = vector.shape_cast %91 : vector<8x1x8xf32> to vector<8x8xf32>
    %93 = vector.shape_cast %90 : vector<8x8xf32> to vector<8x1x8xf32>
    tpu.vector_store %arg13[%c0_89, %c4_90, %c0_91], %93 {strides = array<i32>} : memref<8x8x8xf32, #tpu.memory_space<vmem>>, vector<8x1x8xf32>,
    %94 = vector.extract_strided_slice %68 {offsets = [5, 0, 0], sizes = [1, 8, 8], strides = [1, 1, 1]} : vector<8x8x8xf32> to vector<1x8x8xf32>
    %95 = vector.shape_cast %94 : vector<1x8x8xf32> to vector<8x8xf32>
    %c0_92 = arith.constant 0 : index
    %c5 = arith.constant 5 : index
    %c0_93 = arith.constant 0 : index
    %96 = vector.load %arg13[%c0_92, %c5, %c0_93] : memref<8x8x8xf32, #tpu.memory_space<vmem>>, vector<8x1x8xf32>
    %97 = vector.shape_cast %96 : vector<8x1x8xf32> to vector<8x8xf32>
    %98 = vector.shape_cast %95 : vector<8x8xf32> to vector<8x1x8xf32>
    tpu.vector_store %arg13[%c0_92, %c5, %c0_93], %98 {strides = array<i32>} : memref<8x8x8xf32, #tpu.memory_space<vmem>>, vector<8x1x8xf32>,
    %99 = vector.extract_strided_slice %68 {offsets = [6, 0, 0], sizes = [1, 8, 8], strides = [1, 1, 1]} : vector<8x8x8xf32> to vector<1x8x8xf32>
    %100 = vector.shape_cast %99 : vector<1x8x8xf32> to vector<8x8xf32>
    %c0_94 = arith.constant 0 : index
    %c6 = arith.constant 6 : index
    %c0_95 = arith.constant 0 : index
    %101 = vector.load %arg13[%c0_94, %c6, %c0_95] : memref<8x8x8xf32, #tpu.memory_space<vmem>>, vector<8x1x8xf32>
    %102 = vector.shape_cast %101 : vector<8x1x8xf32> to vector<8x8xf32>
    %103 = vector.shape_cast %100 : vector<8x8xf32> to vector<8x1x8xf32>
    tpu.vector_store %arg13[%c0_94, %c6, %c0_95], %103 {strides = array<i32>} : memref<8x8x8xf32, #tpu.memory_space<vmem>>, vector<8x1x8xf32>,
    %104 = vector.extract_strided_slice %68 {offsets = [7, 0, 0], sizes = [1, 8, 8], strides = [1, 1, 1]} : vector<8x8x8xf32> to vector<1x8x8xf32>
    %105 = vector.shape_cast %104 : vector<1x8x8xf32> to vector<8x8xf32>
    %c0_96 = arith.constant 0 : index
    %c7 = arith.constant 7 : index
    %c0_97 = arith.constant 0 : index
    %106 = vector.load %arg13[%c0_96, %c7, %c0_97] : memref<8x8x8xf32, #tpu.memory_space<vmem>>, vector<8x1x8xf32>
    %107 = vector.shape_cast %106 : vector<8x1x8xf32> to vector<8x8xf32>
    %108 = vector.shape_cast %105 : vector<8x8xf32> to vector<8x1x8xf32>
    tpu.vector_store %arg13[%c0_96, %c7, %c0_97], %108 {strides = array<i32>} : memref<8x8x8xf32, #tpu.memory_space<vmem>>, vector<8x1x8xf32>,
    %c0_98 = arith.constant 0 : index
    %c0_99 = arith.constant 0 : index
    %c0_100 = arith.constant 0 : index
    %109 = vector.load %arg13[%c0_98, %c0_99, %c0_100] : memref<8x8x8xf32, #tpu.memory_space<vmem>>, vector<8x8x8xf32>
    %c0_101 = arith.constant 0 : index
    %c0_102 = arith.constant 0 : index
    %110 = vector.load %arg6[%c0_101, %c0_102] : memref<8x8xf32, #tpu.memory_space<vmem>>, vector<8x8xf32>
    %111 = vector.shape_cast %110 : vector<8x8xf32> to vector<1x8x8xf32>
    %112 = vector.broadcast %111 : vector<1x8x8xf32> to vector<8x8x8xf32>
    %c0_103 = arith.constant 0 : index
    %c0_104 = arith.constant 0 : index
    %113 = vector.load %arg7[%c0_103, %c0_104] : memref<8x8xf32, #tpu.memory_space<vmem>>, vector<8x8xf32>
    %114 = vector.shape_cast %113 : vector<8x8xf32> to vector<1x8x8xf32>
    %115 = vector.broadcast %114 : vector<1x8x8xf32> to vector<8x8x8xf32>
    %c0_105 = arith.constant 0 : index
    %c0_106 = arith.constant 0 : index
    %116 = vector.load %arg8[%c0_105, %c0_106] : memref<8x8xf32, #tpu.memory_space<vmem>>, vector<8x8xf32>
    %117 = vector.shape_cast %116 : vector<8x8xf32> to vector<1x8x8xf32>
    %118 = vector.broadcast %117 : vector<1x8x8xf32> to vector<8x8x8xf32>
    %c0_107 = arith.constant 0 : index
    %c0_108 = arith.constant 0 : index
    %119 = vector.load %arg9[%c0_107, %c0_108] : memref<8x8xf32, #tpu.memory_space<vmem>>, vector<8x8xf32>
    %120 = vector.shape_cast %119 : vector<8x8xf32> to vector<1x8x8xf32>
    %121 = vector.broadcast %120 : vector<1x8x8xf32> to vector<8x8x8xf32>
    "tpu.trace_start"() <{level = 10 : i32, message = "cij,cjk->cik"}> : () -> ()
    %cst_109 = arith.constant dense<0.000000e+00> : vector<8x8x8xf32>
    %122 = tpu.matmul %112, %109, %cst_109 {dimension_numbers = #tpu.dot_dimension_numbers<[2], [1], [1], [2], [0, 0, 0, 1, 1, 2], [0], [0]>} : vector<8x8x8xf32>, vector<8x8x8xf32>, vector<8x8x8xf32> -> vector<8x8x8xf32>
    %cst_110 = arith.constant dense<0.000000e+00> : vector<8x8x8xf32>
    %123 = tpu.matmul %115, %109, %cst_110 {dimension_numbers = #tpu.dot_dimension_numbers<[2], [1], [1], [2], [0, 0, 0, 1, 1, 2], [0], [0]>} : vector<8x8x8xf32>, vector<8x8x8xf32>, vector<8x8x8xf32> -> vector<8x8x8xf32>
    "tpu.trace_stop"() : () -> ()
    %cst_111 = arith.constant 0.000000e+00 : f32
    %124 = vector.broadcast %cst_111 : f32 to vector<8x8x8xf32>
    %125 = arith.subf %124, %123 : vector<8x8x8xf32>
    "tpu.trace_start"() <{level = 10 : i32, message = "cij,cjk->cik"}> : () -> ()
    %cst_112 = arith.constant dense<0.000000e+00> : vector<8x8x8xf32>
    %126 = tpu.matmul %122, %118, %cst_112 {dimension_numbers = #tpu.dot_dimension_numbers<[2], [1], [1], [2], [0, 0, 0, 1, 1, 2], [0], [0]>} : vector<8x8x8xf32>, vector<8x8x8xf32>, vector<8x8x8xf32> -> vector<8x8x8xf32>
    %cst_113 = arith.constant dense<0.000000e+00> : vector<8x8x8xf32>
    %127 = tpu.matmul %125, %121, %cst_113 {dimension_numbers = #tpu.dot_dimension_numbers<[2], [1], [1], [2], [0, 0, 0, 1, 1, 2], [0], [0]>} : vector<8x8x8xf32>, vector<8x8x8xf32>, vector<8x8x8xf32> -> vector<8x8x8xf32>
    "tpu.trace_stop"() : () -> ()
    %128 = arith.addf %126, %127 : vector<8x8x8xf32>
    "tpu.trace_start"() <{level = 10 : i32, message = "cij,cjk->cik"}> : () -> ()
    %cst_114 = arith.constant dense<0.000000e+00> : vector<8x8x8xf32>
    %129 = tpu.matmul %125, %118, %cst_114 {dimension_numbers = #tpu.dot_dimension_numbers<[2], [1], [1], [2], [0, 0, 0, 1, 1, 2], [0], [0]>} : vector<8x8x8xf32>, vector<8x8x8xf32>, vector<8x8x8xf32> -> vector<8x8x8xf32>
    %cst_115 = arith.constant dense<0.000000e+00> : vector<8x8x8xf32>
    %130 = tpu.matmul %122, %121, %cst_115 {dimension_numbers = #tpu.dot_dimension_numbers<[2], [1], [1], [2], [0, 0, 0, 1, 1, 2], [0], [0]>} : vector<8x8x8xf32>, vector<8x8x8xf32>, vector<8x8x8xf32> -> vector<8x8x8xf32>
    "tpu.trace_stop"() : () -> ()
    %131 = arith.subf %129, %130 : vector<8x8x8xf32>
    %c0_116 = arith.constant 0 : index
    %c0_117 = arith.constant 0 : index
    %c0_118 = arith.constant 0 : index
    %132 = vector.load %arg5[%c0_116, %c0_117, %c0_118] : memref<8x8x8xf32, #tpu.memory_space<vmem>>, vector<8x8x8xf32>
    %133 = arith.mulf %132, %128 : vector<8x8x8xf32>
    %134 = arith.mulf %132, %131 : vector<8x8x8xf32>
    "tpu.trace_start"() <{level = 10 : i32, message = "cij,cjk->cik"}> : () -> ()
    %cst_119 = arith.constant dense<0.000000e+00> : vector<8x8x8xf32>
    %135 = tpu.matmul %112, %133, %cst_119 {dimension_numbers = #tpu.dot_dimension_numbers<[2], [1], [1], [2], [0, 0, 0, 1, 1, 2], [0], [0]>} : vector<8x8x8xf32>, vector<8x8x8xf32>, vector<8x8x8xf32> -> vector<8x8x8xf32>
    %cst_120 = arith.constant dense<0.000000e+00> : vector<8x8x8xf32>
    %136 = tpu.matmul %115, %134, %cst_120 {dimension_numbers = #tpu.dot_dimension_numbers<[2], [1], [1], [2], [0, 0, 0, 1, 1, 2], [0], [0]>} : vector<8x8x8xf32>, vector<8x8x8xf32>, vector<8x8x8xf32> -> vector<8x8x8xf32>
    "tpu.trace_stop"() : () -> ()
    %137 = arith.subf %135, %136 : vector<8x8x8xf32>
    "tpu.trace_start"() <{level = 10 : i32, message = "cij,cjk->cik"}> : () -> ()
    %cst_121 = arith.constant dense<0.000000e+00> : vector<8x8x8xf32>
    %138 = tpu.matmul %112, %134, %cst_121 {dimension_numbers = #tpu.dot_dimension_numbers<[2], [1], [1], [2], [0, 0, 0, 1, 1, 2], [0], [0]>} : vector<8x8x8xf32>, vector<8x8x8xf32>, vector<8x8x8xf32> -> vector<8x8x8xf32>
    %cst_122 = arith.constant dense<0.000000e+00> : vector<8x8x8xf32>
    %139 = tpu.matmul %115, %133, %cst_122 {dimension_numbers = #tpu.dot_dimension_numbers<[2], [1], [1], [2], [0, 0, 0, 1, 1, 2], [0], [0]>} : vector<8x8x8xf32>, vector<8x8x8xf32>, vector<8x8x8xf32> -> vector<8x8x8xf32>
    "tpu.trace_stop"() : () -> ()
    %140 = arith.addf %138, %139 : vector<8x8x8xf32>
    "tpu.trace_start"() <{level = 10 : i32, message = "cij,cjk->cik"}> : () -> ()
    %cst_123 = arith.constant dense<0.000000e+00> : vector<8x8x8xf32>
    %141 = tpu.matmul %137, %118, %cst_123 {dimension_numbers = #tpu.dot_dimension_numbers<[2], [1], [1], [2], [0, 0, 0, 1, 1, 2], [0], [0]>} : vector<8x8x8xf32>, vector<8x8x8xf32>, vector<8x8x8xf32> -> vector<8x8x8xf32>
    %cst_124 = arith.constant dense<0.000000e+00> : vector<8x8x8xf32>
    %142 = tpu.matmul %140, %121, %cst_124 {dimension_numbers = #tpu.dot_dimension_numbers<[2], [1], [1], [2], [0, 0, 0, 1, 1, 2], [0], [0]>} : vector<8x8x8xf32>, vector<8x8x8xf32>, vector<8x8x8xf32> -> vector<8x8x8xf32>
    "tpu.trace_stop"() : () -> ()
    %143 = arith.subf %141, %142 : vector<8x8x8xf32>
    %cst_125 = arith.constant 1.562500e-02 : f32
    %144 = vector.broadcast %cst_125 : f32 to vector<8x8x8xf32>
    %145 = arith.mulf %143, %144 : vector<8x8x8xf32>
    %c0_126 = arith.constant 0 : index
    %c0_127 = arith.constant 0 : index
    %c0_128 = arith.constant 0 : index
    %c0_129 = arith.constant 0 : index
    %146 = vector.load %arg10[%c0_126, %c0_127, %c0_128, %c0_129] : memref<1x8x8x8xf32, #tpu.memory_space<vmem>>, vector<1x8x8x8xf32>
    %147 = vector.shape_cast %146 : vector<1x8x8x8xf32> to vector<8x8x8xf32>
    %148 = vector.shape_cast %145 : vector<8x8x8xf32> to vector<1x8x8x8xf32>
    tpu.vector_store %arg10[%c0_126, %c0_127, %c0_128, %c0_129], %148 {strides = array<i32>} : memref<1x8x8x8xf32, #tpu.memory_space<vmem>>, vector<1x8x8x8xf32>,
    return
  }
  func.func @transform_0(%arg0: i32) -> (i32, i32, i32, i32) {
    %c0_i32 = arith.constant 0 : i32
    %c0_i32_0 = arith.constant 0 : i32
    %c0_i32_1 = arith.constant 0 : i32
    %c0_i32_2 = arith.constant 0 : i32
    return %arg0, %c0_i32, %c0_i32_0, %c0_i32_1 : i32, i32, i32, i32
  }
  func.func @transform_1(%arg0: i32) -> (i32, i32) {
    %c0_i32 = arith.constant 0 : i32
    %c0_i32_0 = arith.constant 0 : i32
    %c0_i32_1 = arith.constant 0 : i32
    return %c0_i32, %c0_i32_0 : i32, i32
  }
  func.func @transform_2(%arg0: i32) -> (i32, i32) {
    %c0_i32 = arith.constant 0 : i32
    %c0_i32_0 = arith.constant 0 : i32
    %c0_i32_1 = arith.constant 0 : i32
    return %c0_i32, %c0_i32_0 : i32, i32
  }
  func.func @transform_3(%arg0: i32) -> (i32, i32) {
    %c0_i32 = arith.constant 0 : i32
    %c0_i32_0 = arith.constant 0 : i32
    %c0_i32_1 = arith.constant 0 : i32
    return %c0_i32, %c0_i32_0 : i32, i32
  }
  func.func @transform_4(%arg0: i32) -> (i32, i32, i32) {
    %c0_i32 = arith.constant 0 : i32
    %c0_i32_0 = arith.constant 0 : i32
    %c0_i32_1 = arith.constant 0 : i32
    %c0_i32_2 = arith.constant 0 : i32
    return %c0_i32, %c0_i32_0, %c0_i32_1 : i32, i32, i32
  }
  func.func @transform_5(%arg0: i32) -> (i32, i32) {
    %c0_i32 = arith.constant 0 : i32
    %c0_i32_0 = arith.constant 0 : i32
    %c0_i32_1 = arith.constant 0 : i32
    return %c0_i32, %c0_i32_0 : i32, i32
  }
  func.func @transform_6(%arg0: i32) -> (i32, i32) {
    %c0_i32 = arith.constant 0 : i32
    %c0_i32_0 = arith.constant 0 : i32
    %c0_i32_1 = arith.constant 0 : i32
    return %c0_i32, %c0_i32_0 : i32, i32
  }
  func.func @transform_7(%arg0: i32) -> (i32, i32) {
    %c0_i32 = arith.constant 0 : i32
    %c0_i32_0 = arith.constant 0 : i32
    %c0_i32_1 = arith.constant 0 : i32
    return %c0_i32, %c0_i32_0 : i32, i32
  }
  func.func @transform_8(%arg0: i32) -> (i32, i32) {
    %c0_i32 = arith.constant 0 : i32
    %c0_i32_0 = arith.constant 0 : i32
    %c0_i32_1 = arith.constant 0 : i32
    return %c0_i32, %c0_i32_0 : i32, i32
  }
  func.func @transform_9(%arg0: i32) -> (i32, i32, i32, i32) {
    %c0_i32 = arith.constant 0 : i32
    %c0_i32_0 = arith.constant 0 : i32
    %c0_i32_1 = arith.constant 0 : i32
    %c0_i32_2 = arith.constant 0 : i32
    return %arg0, %c0_i32, %c0_i32_0, %c0_i32_1 : i32, i32, i32, i32
  }
}

</mosaic_0001>

<bundles_post_ra>
// kernel: skip_con_block_forward.1
= control target key start
LH: loop header
LB: loop body
LE: loop exit
PB: predicated region body
PF: predicated region fallthrough
CT: control target
= control target key end

     0   :  { %14 = vsyncpa [#allocation6], 0  ;;  %s12472_s0 = inlined_call_operand.vmem [shape: f32[2,4,16,16], index: 0, kind: input, shape index: {}]   ;;  %s12473_s1 = inlined_call_operand.vmem [shape: f32[8,15], index: 1, kind: input, shape index: {}]   ;;  %s12474_s2 = inlined_call_operand.vmem [shape: f32[15,8], index: 2, kind: input, shape index: {}]   ;;  %s12475_s3 = inlined_call_operand.vmem [shape: bf16[8,37], index: 3, kind: input, shape index: {}]   ;;  %s12476_s4 = inlined_call_operand.vmem [shape: f32[8,8,8], index: 4, kind: input, shape index: {}]   ;;  %s12477_s5 = inlined_call_operand.vmem [shape: f32[8,8], index: 5, kind: input, shape index: {}, may-alias: {5,7}]   ;;  %s12478_s6 = inlined_call_operand.vmem [shape: f32[8,8], index: 6, kind: input, shape index: {}, may-alias: {6,8}]   ;;  %s12479_s7 = inlined_call_operand.vmem [shape: f32[8,8], index: 7, kind: input, shape index: {}, may-alias: {5,7}]   ;;  %s12480_s8 = inlined_call_operand.vmem [shape: f32[8,8], index: 8, kind: input, shape index: {}, may-alias: {6,8}]   ;;  %s12481_s9 = inlined_call_operand.hbm [shape: f32[2,8,8,8], index: 9, kind: output, shape index: {}]  }
   0x1   :  { %16 = vsyncpa [#allocation6 + $0x1], 0  ;;  %s11075_s30 = smov 0   ;;  %s11077_s10 = smov 0  }
   0x2   :  { %s11079_s11 = smov 0   ;;  %s11081_s12 = smov 0  }
   0x3 LB: > { %s11096_s13 = sadd.s32 4294967295, %s11010_s12   ;;  %s9819_s14 = sadd.s32 4294967294, %s11010_s12   ;;  %s11010_s12 = sphi %s11081_s12, %s12489_s12   ;;  %s11006_s11 = sphi %s11079_s11, %s12488_s11   ;;  %s11002_s10 = sphi %s11077_s10, %s12487_s10   ;;  %s10998_s30 = sphi %s11075_s30, %s12486_s30  }
   0x4   : > { %s11100_s15 = sadd.s32 1, %s11010_s12   ;;  %s223_s16 = sadd.s32 1, %s11006_s11 }
   0x5   : > { %s220_s17 = ssub.s32 %s11010_s12, %s11100_s15  ;;  %p233_p0 = scmp.ne.s32.totalorder %s11006_s11, %s11002_s10 }
   0x6   : > { %p221_p1 = scmp.eq.s32.totalorder %s220_s17, 0  ;;  %p234_p2 = scmp.eq.s32.totalorder %s11096_s13, 1 }
   0x7   : > { %p239_p3 = scmp.ne.s32.totalorder %s11002_s10, %s10998_s30  ;;  %p240_p4 = scmp.eq.s32.totalorder %s9819_s14, 1 }
   0x8   : > { %s11111_s18 = scalar_select %p221_p1, %s11006_s11, %s223_s16  }
   0x9   : > { %p11113_p5 = por %p234_p2, %p233_p0  ;;  %p11117_p6 = por %p240_p4, %p239_p3 }
   0xa   : > { %p9822_p7 = scmp.ge.s32.totalorder %s11010_s12, 1  ;;  %p290_p8 = scmp.lt.s32.totalorder %s11010_s12, 3 }
   0xc   : > { %p291_p9 = pnand %p9822_p7, %p290_p8 }
   0xd   : > { %p326_p10 = scmp.lt.s32.totalorder (!%p291_p9), %s11096_s13, 1  ;;  %s11012_s26 = smov (!%p291_p9), 127   ;;  %vm380_vm0 = vcmask (!%p291_p9), 1046528   ;;  %vm11013_vm1 = vmmov (!%p291_p9), 1   ;;  %v441_v5 = vld [vmem:[%s12474_s2] sm:$0xff] (!%p291_p9)  ;;  %vm444_vm3 = vcmask (!%p291_p9), 121856  }
   0xe   : > { %294 = sbr.rel (%p291_p9) target bundleno = 2184 (0x888), region = 56  ;;  %vm11142_vm2 = vmpackc.low (!%p291_p9), %vm380_vm0, %vm11013_vm1  ;;  %v442_v6 = vld [vmem:[%s12474_s2 + $0x8] sm:$0x7f] (!%p291_p9)  ;;  %vm11015_vm4 = vmmov (!%p291_p9), 0   ;;  %vm1067_vm5 = vcmask (!%p291_p9), 76800   ;;  %vm1544_vm6 = vcmask (!%p291_p9), 60416  }
   0xf   : > { %v11152_v7 = vpack.c.bf16 (!%p291_p9), %v442_v6, %v441_v5  ;;  %vm1185_vm7 = vcmask (!%p291_p9), 65544   ;;  %vm1874_vm8 = vcmask (!%p291_p9), 57344   ;;  %vm1952_vm9 = vcmask (!%p291_p9), 1041408   ;;  %s9956_s28 = sshll.u32 (!%p291_p9), %s11096_s13, 10 }
  0x10   : > { %vm1953_vm10 = vcmask (!%p291_p9), 1042432   ;;  %vm1948_vm11 = vcmask (!%p291_p9), 302080   ;;  %vm2848_vm12 = vcmask (!%p291_p9), 64512   ;;  %s12421_s17 = scalar_lea.hbm (!%p291_p9), %s12481_s9, %s9956_s28 }
  0x11   : > { %10827 = vmatprep.subr.msk.bf16.mxu0 (!%p291_p9), %vm11142_vm2, %v11152_v7  ;;  %10833 = vmatprep.subr.msk.bf16.mxu1 (!%p291_p9), %vm11142_vm2, %v11152_v7 }
  0x12   : > { %10830 = vmatpush3.bf16.msk.msra.mxu0 (!%p291_p9), %vm11142_vm2, %v11152_v7  ;;  %10836 = vmatpush3.bf16.msk.msra.mxu1 (!%p291_p9), %vm11142_vm2, %v11152_v7 }
  0x13   : > { %10839 = vmatprep.subr.msk.bf16.mxu0 (!%p291_p9), %vm11142_vm2, %v11152_v7  ;;  %10845 = vmatprep.subr.msk.bf16.mxu1 (!%p291_p9), %vm11142_vm2, %v11152_v7 }
  0x15   : > { %s327_s21 = scalar_select %p326_p10, %s11096_s13, 1 }
  0x17   : > { %s9955_s22 = sshll.u32 %s327_s21, 6  ;;  %s11017_s21 = smov 126  }
  0x18   : > { %s11128_s25 = scalar_lea.vmem %s12472_s0, %s9955_s22  ;;  %s11019_s22 = smov 1  }
  0x19   : > { %v11131_v0 = vld [vmem:[%s11128_s25 + $0x8] sm:$0xff]  ;;  %v332_v1 = vld [vmem:[%s11128_s25] sm:$0xff]  ;;  %v11138_v2 = vld [vmem:[%s11128_s25 + $0x18] sm:$0xff] }
  0x1a   : > { %350 = vrot.lane.b32.xlu1 %v11131_v0, %s11012_s26  ;;  %348 = vrot.lane.b32.xlu0 %v332_v1, %s11012_s26  ;;  %v334_v3 = vld [vmem:[%s11128_s25 + $0x10] sm:$0xff]  ;;  %v382_v8 = vrot.slane %v11131_v0, 1  ;;  %v381_v9 = vrot.slane %v332_v1, 1  ;;  %v385_v10 = vrot.slane %v11138_v2, 1  ;;  %v11161_v13 = vld [vmem:[%s11128_s25 + $0x20] sm:$0xff] }
  0x1b   : > { %v384_v11 = vrot.slane %v334_v3, 1  ;;  %v338_v12 = vld [vmem:[%s11128_s25 + $0x30] sm:$0xff]  ;;  %v339_v16 = vld [vmem:[%s11128_s25 + $0x38] sm:$0xff]  ;;  %v337_v17 = vld [vmem:[%s11128_s25 + $0x28] sm:$0xff]  ;;  %v387_v19 = vrot.slane %v11161_v13, 1  ;;  %s323_s25 = sand.u32 1, %s11002_s10  }
  0x1c   : > { %v383_v15 = vsel %vm380_vm0, %v381_v9, %v382_v8  ;;  %v390_v18 = vrot.slane %v338_v12, 1  ;;  %v391_v20 = vrot.slane %v339_v16, 1  ;;  %v388_v21 = vrot.slane %v337_v17, 1  ;;  %s12431_s13 = scalar_lea.sflag [#allocation6], %s323_s25 }
  0x1d   : > { %v386_v14 = vsel %vm380_vm0, %v384_v11, %v385_v10 }
  0x1e   : > { %354 = vrot.lane.b32.xlu1 %v11138_v2, %s11012_s26  ;;  %352 = vrot.lane.b32.xlu0 %v334_v3, %s11012_s26  ;;  %v392_v22 = vsel %vm380_vm0, %v390_v18, %v391_v20  ;;  %v389_v23 = vsel %vm380_vm0, %v387_v19, %v388_v21  ;;  %v11018_v19 = vmov 1966171168  }
  0x22   : > { %360 = vrot.lane.b32.xlu1 %v338_v12, %s11012_s26  ;;  %356 = vrot.lane.b32.xlu0 %v11161_v13, %s11012_s26 }
  0x26   : > { %413 = vrot.lane.b32.xlu1 %v386_v14, %s11012_s26  ;;  %409 = vrot.lane.b32.xlu0 %v383_v15, %s11012_s26 }
  0x2a   : > { %362 = vrot.lane.b32.xlu1 %v339_v16, %s11012_s26  ;;  %358 = vrot.lane.b32.xlu0 %v337_v17, %s11012_s26 }
  0x2e   : > { %415 = vrot.lane.b32.xlu1 %v385_v10, %s11012_s26  ;;  %411 = vrot.lane.b32.xlu0 %v382_v8, %s11012_s26 }
  0x32   : > { %421 = vrot.lane.b32.xlu1 %v392_v22, %s11012_s26  ;;  %417 = vrot.lane.b32.xlu0 %v389_v23, %s11012_s26 }
  0x36   : > { %423 = vrot.lane.b32.xlu1 %v391_v20, %s11012_s26  ;;  %419 = vrot.lane.b32.xlu0 %v388_v21, %s11012_s26 }
  0x8c   : > { %v351_v24 = vpop.permute.xlu1 %350  ;;  %v349_v25 = vpop.permute.xlu0 %348 }
  0x8d   : > { %v372_v28 = vmax.f32 %v332_v1, %v349_v25  ;;  %v373_v38 = vmax.f32 %v11131_v0, %v351_v24  ;;  %v11014_v0 = vmov 0.0|0.0   ;;  %v11016_v1 = vmov 0.0  }
  0x8e   : > { %1068 = vst.msk [vmem:[#allocation2] sm:$0xf] %vm1067_vm5, %v11016_v1  ;;  %1069 = vst.msk [vmem:[#allocation2 + $0x4] sm:$0xf] %vm1067_vm5, %v11016_v1 }
  0x8f   : > { %v401_v33 = vmax.f32 %v372_v28, %v383_v15  ;;  %v402_v45 = vmax.f32 %v373_v38, %v382_v8  ;;  %1070 = vst.msk [vmem:[#allocation2 + $0x8] sm:$0xf] %vm1067_vm5, %v11016_v1  ;;  %1071 = vst.msk [vmem:[#allocation2 + $0xc] sm:$0xf] %vm1067_vm5, %v11016_v1 }
  0x90   : > { %v355_v26 = vpop.permute.xlu1 %354  ;;  %v353_v27 = vpop.permute.xlu0 %352  ;;  %1072 = vst.msk [vmem:[#allocation2 + $0x10] sm:$0xf] %vm1067_vm5, %v11016_v1  ;;  %1073 = vst.msk [vmem:[#allocation2 + $0x14] sm:$0xf] %vm1067_vm5, %v11016_v1 }
  0x91   : > { %v374_v29 = vmax.f32 %v334_v3, %v353_v27  ;;  %v375_v39 = vmax.f32 %v11138_v2, %v355_v26  ;;  %1074 = vst.msk [vmem:[#allocation2 + $0x18] sm:$0xf] %vm1067_vm5, %v11016_v1  ;;  %1075 = vst.msk [vmem:[#allocation2 + $0x1c] sm:$0xf] %vm1067_vm5, %v11016_v1 }
  0x92   : > { %1076 = vst.msk [vmem:[#allocation2 + $0x20] sm:$0xf] %vm1067_vm5, %v11016_v1  ;;  %1077 = vst.msk [vmem:[#allocation2 + $0x24] sm:$0xf] %vm1067_vm5, %v11016_v1 }
  0x93   : > { %v403_v32 = vmax.f32 %v374_v29, %v386_v14  ;;  %v404_v44 = vmax.f32 %v375_v39, %v385_v10  ;;  %v443_v10 = vld [vmem:[%s12473_s1] sm:$0xff] }
  0x94   : > { %v361_v30 = vpop.permute.xlu1 %360  ;;  %v357_v31 = vpop.permute.xlu0 %356 }
  0x95   : > { %v378_v42 = vmax.f32 %v338_v12, %v361_v30  ;;  %v376_v43 = vmax.f32 %v11161_v13, %v357_v31  ;;  %v1553_v2 = vld [vmem:[#allocation2] sm:$0xf] }
  0x96   : > { %1569 = vrot.lane.b32.xlu0 %v1553_v2, %s11012_s26  ;;  %v1601_v18 = vld [vmem:[#allocation2] sm:$0xf] }
  0x97   : > { %v407_v50 = vmax.f32 %v378_v42, %v392_v22  ;;  %v405_v53 = vmax.f32 %v376_v43, %v389_v23  ;;  %v1536_v26 = vld [vmem:[#allocation2] sm:$0xf] }
  0x98   : > { %v414_v34 = vpop.permute.xlu1 %413  ;;  %v410_v35 = vpop.permute.xlu0 %409  ;;  %1545 = vst.msk [vmem:[#allocation3] sm:$0xf] %vm1544_vm6, %v1536_v26 }
  0x99   : > { %v435_v36 = vmax.f32 %v403_v32, %v414_v34  ;;  %v433_v37 = vmax.f32 %v401_v33, %v410_v35 }
  0x9a   : > { %1617 = vrot.lane.b32.xlu0 %v1601_v18, %s11017_s21 }
  0x9b   : > { %10213 = vmatprep.mubr.msk.f32.mxu0 %vm444_vm3, %v433_v37  ;;  %10220 = vmatprep.mubr.msk.f32.mxu1 %vm444_vm3, %v435_v36 }
  0x9c   : > { %v363_v40 = vpop.permute.xlu1 %362  ;;  %v359_v41 = vpop.permute.xlu0 %358 }
  0x9d   : > { %v379_v51 = vmax.f32 %v339_v16, %v363_v40  ;;  %v377_v52 = vmax.f32 %v337_v17, %v359_v41  ;;  %v1785_v17 = vld [vmem:[#allocation2 + $0x24] sm:$0xf] }
  0x9e   : > { %1808 = vrot.lane.b32.xlu1 %v1785_v17, %s11012_s26  ;;  %v1769_v40 = vld [vmem:[#allocation2 + $0x24] sm:$0xf] }
  0x9f   : > { %v408_v58 = vmax.f32 %v379_v51, %v391_v20  ;;  %v406_v59 = vmax.f32 %v377_v52, %v388_v21  ;;  %v1081_v20 = vunpack.c.l.s4 %v11018_v19  ;;  %v1083_v21 = vlaneseq  ;;  %1777 = vst.msk [vmem:[#allocation3 + $0x130] sm:$0xf] %vm1544_vm6, %v1769_v40 }
  0xa0   : > { %v416_v46 = vpop.permute.xlu1 %415  ;;  %v412_v47 = vpop.permute.xlu0 %411 }
  0xa1   : > { %v436_v48 = vmax.f32 %v404_v44, %v416_v46  ;;  %v434_v49 = vmax.f32 %v402_v45, %v412_v47  ;;  %v1082_v24 = vunpack.c.0.s8 %v1081_v20  ;;  %v1084_v25 = vshrl.u32 %v1083_v21, 7 }
  0xa3   : > { %10214 = vmatmul.mubr.msk.f32.vlgmr.msra.gmra.mrb[0].mxu0 %vm444_vm3, %v434_v49  ;;  %10221 = vmatmul.mubr.msk.f32.vlgmr.msra.gmra.mrb[0].mxu1 %vm444_vm3, %v436_v48  ;;  %v11264_v27 = vsub.s32 %v1082_v24, %v1084_v25  ;;  %v11269_v36 = vsub.s32 0, %v1084_v25 }
  0xa4   : > { %v422_v54 = vpop.permute.xlu1 %421  ;;  %v418_v55 = vpop.permute.xlu0 %417  ;;  %10848 = vmatpush3.bf16.msk.msra.mxu1 %vm11142_vm2, %v11152_v7  ;;  %10842 = vmatpush3.bf16.msk.msra.mxu0 %vm11142_vm2, %v11152_v7 }
  0xa5   : > { %v439_v56 = vmax.f32 %v407_v50, %v422_v54  ;;  %v437_v57 = vmax.f32 %v405_v53, %v418_v55  ;;  %10849 = vmatprep.subr.bf16.mxu0 %v11014_v0  ;;  %10853 = vmatprep.subr.bf16.mxu1 %v11014_v0 }
  0xa7   : > { %10227 = vmatprep.mubr.msk.f32.mxu0 %vm444_vm3, %v437_v57  ;;  %10234 = vmatprep.mubr.msk.f32.mxu1 %vm444_vm3, %v439_v56 }
  0xa8   : > { %v424_v60 = vpop.permute.xlu1 %423  ;;  %v420_v61 = vpop.permute.xlu0 %419 }
  0xa9   : > { %v440_v62 = vmax.f32 %v408_v58, %v424_v60  ;;  %v438_v63 = vmax.f32 %v406_v59, %v420_v61 }
  0xab   : > { %10228 = vmatmul.mubr.msk.f32.vlgmr.msra.gmra.mrb[2].mxu0 %vm444_vm3, %v438_v63  ;;  %10235 = vmatmul.mubr.msk.f32.vlgmr.msra.gmra.mrb[2].mxu1 %vm444_vm3, %v440_v62 }
  0xac   : > { %10241 = vmatprep.mubr.msk.f32.mxu0 %vm11015_vm4, %v11016_v1  ;;  %10248 = vmatprep.mubr.msk.f32.mxu1 %vm11015_vm4, %v11016_v1 }
 0x108   : > { %v1570_v4 = vpop.permute.xlu0 %1569 }
 0x109   : > { %1593 = vst.msk [vmem:[#allocation3 + $0x4] sm:$0xf] %vm1544_vm6, %v1570_v4 }
 0x10c   : > { %v1618_v23 = vpop.permute.xlu0 %1617 }
 0x10d   : > { %1641 = vst.msk [vmem:[#allocation3 + $0x8] sm:$0xf] %vm1544_vm6, %v1618_v23 }
 0x110   : > { %v1809_v22 = vpop.permute.xlu1 %1808 }
 0x111   : > { %1825 = vst.msk [vmem:[#allocation3 + $0x134] sm:$0xf] %vm1544_vm6, %v1809_v22 }
 0x176   : > { %v10215_v3 = vpop.f32.mrb[0].mxu0  ;;  %v10222_v5 = vpop.f32.mrb[0].mxu1 }
 0x177   : > { %v520_v6 = vpop.f32.mrb[1].mxu0  ;;  %v601_v7 = vpop.f32.mrb[1].mxu1 }
 0x178   : > { %v10850_v8 = vpack.c.bf16 %v10215_v3, %v520_v6  ;;  %v10854_v9 = vpack.c.bf16 %v10222_v5, %v601_v7 }
 0x17a   : > { %10852 = vmatpush3.bf16.msk.msra.mxu0 %vm11142_vm2, %v10850_v8  ;;  %10856 = vmatpush3.bf16.msk.msra.mxu1 %vm11142_vm2, %v10854_v9 }
 0x17b   : > { %10857 = vmatprep.subr.bf16.mxu0 %v11014_v0  ;;  %10861 = vmatprep.subr.bf16.mxu1 %v11014_v0 }
 0x17d   : > { %10242 = vmatmul.mubr.msk.f32.vlgmr.msra.gmra.mrb[4].mxu0 %vm444_vm3, %v443_v10  ;;  %10249 = vmatmul.mubr.msk.f32.vlgmr.msra.gmra.mrb[4].mxu1 %vm444_vm3, %v443_v10 }
 0x17e   : > { %v10229_v11 = vpop.f32.mrb[2].mxu0  ;;  %v10236_v12 = vpop.f32.mrb[2].mxu1  ;;  %10255 = vmatprep.mubr.msk.f32.mxu0 %vm11015_vm4, %v11016_v1  ;;  %10262 = vmatprep.mubr.msk.f32.mxu1 %vm11015_vm4, %v11016_v1 }
 0x17f   : > { %v682_v13 = vpop.f32.mrb[3].mxu0  ;;  %v763_v14 = vpop.f32.mrb[3].mxu1 }
 0x180   : > { %v10858_v15 = vpack.c.bf16 %v10229_v11, %v682_v13  ;;  %v10862_v16 = vpack.c.bf16 %v10236_v12, %v763_v14 }
 0x182   : > { %10860 = vmatpush3.bf16.msk.msra.mxu0 %vm11142_vm2, %v10858_v15  ;;  %10864 = vmatpush3.bf16.msk.msra.mxu1 %vm11142_vm2, %v10862_v16 }
 0x183   : > { %10265 = vmatprep.subr.bf16.mxu0 %v11016_v1  ;;  %10275 = vmatprep.subr.bf16.mxu1 %v11016_v1 }
 0x185   : > { %10256 = vmatmul.mubr.msk.f32.vlgmr.msra.gmra.mrb[6].mxu0 %vm444_vm3, %v443_v10  ;;  %10263 = vmatmul.mubr.msk.f32.vlgmr.msra.gmra.mrb[6].mxu1 %vm444_vm3, %v443_v10 }
 0x186   : > { %10271 = vmatprep.mubr.msk.bf16.mxu0 %vm11015_vm4, %v11016_v1  ;;  %10281 = vmatprep.mubr.msk.bf16.mxu1 %vm11015_vm4, %v11016_v1 }
 0x250   : > { %v844_v28 = vpop.f32.mrb[4].mxu0  ;;  %v917_v29 = vpop.f32.mrb[4].mxu1 }
 0x251   : > { %v1086_v30 = vrot.slane %v844_v28, %v11264_v27  ;;  %v1202_v31 = vrot.slane %v917_v29, %v11264_v27  ;;  %v10243_v32 = vpop.f32.mrb[5].mxu0  ;;  %v10250_v33 = vpop.f32.mrb[5].mxu1  ;;  %v1079_v39 = vcombine.high %v844_v28, %v844_v28  ;;  %v1195_v53 = vcombine.high %v917_v29, %v917_v29 }
 0x253   : > { %v1094_v34 = vcombine.high %v1086_v30, %v1086_v30  ;;  %v1102_v35 = vrot.slane %v1086_v30, %v11264_v27  ;;  %v1218_v37 = vrot.slane %v1202_v31, %v11264_v27  ;;  %v1210_v38 = vcombine.high %v1202_v31, %v1202_v31 }
 0x254   : > { %v1093_v52 = vrot.slane %v1079_v39, %v11264_v27  ;;  %v1209_v60 = vrot.slane %v1195_v53, %v11264_v27 }
 0x255   : > { %v1116_v41 = vrot.slane %v1094_v34, %v11264_v27  ;;  %v1124_v42 = vcombine.high %v1102_v35, %v1102_v35  ;;  %v1247_v43 = vrot.slane %v1218_v37, %v11269_v36  ;;  %v1131_v44 = vrot.slane %v1102_v35, %v11269_v36 }
 0x256   : > { %v1232_v47 = vrot.slane %v1210_v38, %v11264_v27  ;;  %v1240_v48 = vcombine.high %v1218_v37, %v1218_v37  ;;  %v1109_v59 = vrot.slane %v1093_v52, %v11264_v27  ;;  %v1225_v63 = vrot.slane %v1209_v60, %v11264_v27 }
 0x257   : > { %1276 = vrot.lane.b32.xlu1 %v1247_v43, %s11019_s22  ;;  %1160 = vrot.lane.b32.xlu0 %v1131_v44, %s11019_s22  ;;  %v1139_v54 = vrot.slane %v1124_v42, %v11269_v36  ;;  %v1135_v55 = vrot.slane %v1116_v41, %v11269_v36  ;;  %v1126_v2 = vcombine.high %v1116_v41, %v1116_v41 }
 0x258   : > { %v990_v45 = vpop.f32.mrb[6].mxu0  ;;  %v11276_v46 = vpop.f32.mrb[6].mxu1  ;;  %v1255_v57 = vrot.slane %v1240_v48, %v11269_v36  ;;  %v1251_v58 = vrot.slane %v1232_v47, %v11269_v36  ;;  %v1147_v0 = vrot.slane %v1109_v59, %v11269_v36  ;;  %v1095_v5 = vcombine.high %v1093_v52, %v1093_v52 }
 0x259   : > { %v1316_v49 = vrot.slane %v990_v45, %v11264_v27  ;;  %v10257_v50 = vpop.f32.mrb[7].mxu0  ;;  %v10264_v51 = vpop.f32.mrb[7].mxu1  ;;  %v1430_v62 = vrot.slane %v11276_v46, %v11264_v27  ;;  %v1263_v6 = vrot.slane %v1225_v63, %v11269_v36  ;;  %v1143_v7 = vrot.slane %v1126_v2, %v11269_v36 }
 0x25a   : > { %v1242_v8 = vcombine.high %v1232_v47, %v1232_v47  ;;  %v1211_v10 = vcombine.high %v1209_v60, %v1209_v60  ;;  %v1125_v12 = vcombine.high %v1109_v59, %v1109_v59  ;;  %v1123_v13 = vrot.slane %v1095_v5, %v11264_v27 }
 0x25b   : > { %1164 = vrot.lane.b32.xlu1 %v1139_v54, %s11019_s22  ;;  %1162 = vrot.lane.b32.xlu0 %v1135_v55, %s11019_s22  ;;  %v1332_v56 = vrot.slane %v1316_v49, %v11264_v27  ;;  %v1446_v3 = vrot.slane %v1430_v62, %v11264_v27  ;;  %v1324_v14 = vcombine.high %v1316_v49, %v1316_v49 }
 0x25c   : > { %v1259_v11 = vrot.slane %v1242_v8, %v11269_v36  ;;  %v1155_v15 = vrot.slane %v1125_v12, %v11269_v36  ;;  %v1151_v16 = vrot.slane %v1123_v13, %v11269_v36  ;;  %v1241_v17 = vcombine.high %v1225_v63, %v1225_v63 }
 0x25d   : > { %v1361_v61 = vrot.slane %v1332_v56, %v11269_v36  ;;  %v1475_v9 = vrot.slane %v1446_v3, %v11269_v36  ;;  %v1239_v18 = vrot.slane %v1211_v10, %v11264_v27  ;;  %v1309_v4 = vcombine.high %v990_v45, %v990_v45 }
 0x25e   : > { %v1438_v19 = vcombine.high %v1430_v62, %v1430_v62  ;;  %v1346_v20 = vrot.slane %v1324_v14, %v11264_v27  ;;  %v1354_v21 = vcombine.high %v1332_v56, %v1332_v56  ;;  %v1271_v22 = vrot.slane %v1241_v17, %v11269_v36 }
 0x25f   : > { %1280 = vrot.lane.b32.xlu1 %v1255_v57, %s11019_s22  ;;  %1278 = vrot.lane.b32.xlu0 %v1251_v58, %s11019_s22  ;;  %v1267_v23 = vrot.slane %v1239_v18, %v11269_v36  ;;  %v1323_v24 = vrot.slane %v1309_v4, %v11264_v27  ;;  %v1423_v25 = vcombine.high %v11276_v46, %v11276_v46 }
 0x260   : > { %v1460_v26 = vrot.slane %v1438_v19, %v11264_v27  ;;  %v1468_v28 = vcombine.high %v1446_v3, %v1446_v3  ;;  %v1369_v29 = vrot.slane %v1354_v21, %v11269_v36  ;;  %v1365_v30 = vrot.slane %v1346_v20, %v11269_v36 }
 0x261   : > { %v1437_v31 = vrot.slane %v1423_v25, %v11264_v27  ;;  %v1339_v32 = vrot.slane %v1323_v24, %v11264_v27  ;;  %v1127_v35 = vcombine.high %v1123_v13, %v1123_v13  ;;  %v1356_v40 = vcombine.high %v1346_v20, %v1346_v20 }
 0x262   : > { %v1483_v33 = vrot.slane %v1468_v28, %v11269_v36  ;;  %v1479_v34 = vrot.slane %v1460_v26, %v11269_v36  ;;  %v1325_v41 = vcombine.high %v1323_v24, %v1323_v24  ;;  %v1470_v44 = vcombine.high %v1460_v26, %v1460_v26 }
 0x263   : > { %1168 = vrot.lane.b32.xlu1 %v1147_v0, %s11019_s22  ;;  %1390 = vrot.lane.b32.xlu0 %v1361_v61, %s11019_s22  ;;  %v1453_v37 = vrot.slane %v1437_v31, %v11264_v27  ;;  %v1159_v38 = vrot.slane %v1127_v35, %v11269_v36  ;;  %v1377_v39 = vrot.slane %v1339_v32, %v11269_v36 }
 0x264   : > { %v1373_v42 = vrot.slane %v1356_v40, %v11269_v36  ;;  %v1243_v45 = vcombine.high %v1239_v18, %v1239_v18  ;;  %v1439_v46 = vcombine.high %v1437_v31, %v1437_v31  ;;  %v1487_v47 = vrot.slane %v1470_v44, %v11269_v36 }
 0x265   : > { %v1491_v43 = vrot.slane %v1453_v37, %v11269_v36  ;;  %v1355_v49 = vcombine.high %v1339_v32, %v1339_v32  ;;  %v1353_v50 = vrot.slane %v1325_v41, %v11264_v27  ;;  %v1469_v53 = vcombine.high %v1453_v37, %v1453_v37 }
 0x266   : > { %v1275_v48 = vrot.slane %v1243_v45, %v11269_v36  ;;  %v1467_v54 = vrot.slane %v1439_v46, %v11264_v27 }
 0x267   : > { %1284 = vrot.lane.b32.xlu1 %v1263_v6, %s11019_s22  ;;  %1166 = vrot.lane.b32.xlu0 %v1143_v7, %s11019_s22  ;;  %v1385_v51 = vrot.slane %v1355_v49, %v11269_v36  ;;  %v1381_v52 = vrot.slane %v1353_v50, %v11269_v36  ;;  %v1499_v55 = vrot.slane %v1469_v53, %v11269_v36 }
 0x268   : > { %v1495_v56 = vrot.slane %v1467_v54, %v11269_v36  ;;  %v1471_v57 = vcombine.high %v1467_v54, %v1467_v54  ;;  %v1357_v58 = vcombine.high %v1353_v50, %v1353_v50 }
 0x26a   : > { %v1503_v59 = vrot.slane %v1471_v57, %v11269_v36  ;;  %v1389_v60 = vrot.slane %v1357_v58, %v11269_v36 }
 0x26b   : > { %1504 = vrot.lane.b32.xlu1 %v1475_v9, %s11019_s22  ;;  %1282 = vrot.lane.b32.xlu0 %v1259_v11, %s11019_s22 }
 0x26f   : > { %1172 = vrot.lane.b32.xlu1 %v1155_v15, %s11019_s22  ;;  %1170 = vrot.lane.b32.xlu0 %v1151_v16, %s11019_s22 }
 0x273   : > { %1288 = vrot.lane.b32.xlu1 %v1271_v22, %s11019_s22  ;;  %1286 = vrot.lane.b32.xlu0 %v1267_v23, %s11019_s22  ;;  %v1883_v23 = vld [vmem:[#allocation3] sm:$0xff] }
 0x277   : > { %1394 = vrot.lane.b32.xlu1 %v1369_v29, %s11019_s22  ;;  %1392 = vrot.lane.b32.xlu0 %v1365_v30, %s11019_s22  ;;  %v11020_v29 = vmov 1.0  }
 0x278   : > { %1875 = vst.msk [vmem:[#allocation3 + $0x24] sm:$0x1] %vm1874_vm8, %v11020_v29  ;;  %1876 = vst.msk [vmem:[#allocation3 + $0x4c] sm:$0x1] %vm1874_vm8, %v11020_v29 }
 0x279   : > { %1877 = vst.msk [vmem:[#allocation3 + $0x74] sm:$0x1] %vm1874_vm8, %v11020_v29  ;;  %1878 = vst.msk [vmem:[#allocation3 + $0x9c] sm:$0x1] %vm1874_vm8, %v11020_v29 }
 0x27a   : > { %1879 = vst.msk [vmem:[#allocation3 + $0xc4] sm:$0x1] %vm1874_vm8, %v11020_v29  ;;  %1880 = vst.msk [vmem:[#allocation3 + $0xec] sm:$0x1] %vm1874_vm8, %v11020_v29 }
 0x27b   : > { %1508 = vrot.lane.b32.xlu1 %v1483_v33, %s11019_s22  ;;  %1506 = vrot.lane.b32.xlu0 %v1479_v34, %s11019_s22  ;;  %1881 = vst.msk [vmem:[#allocation3 + $0x114] sm:$0x1] %vm1874_vm8, %v11020_v29  ;;  %1882 = vst.msk [vmem:[#allocation3 + $0x13c] sm:$0x1] %vm1874_vm8, %v11020_v29 }
 0x27f   : > { %1174 = vrot.lane.b32.xlu0 %v1159_v38, %s11019_s22  ;;  %1398 = vrot.lane.b32.xlu1 %v1377_v39, %s11019_s22 }
 0x283   : > { %1396 = vrot.lane.b32.xlu0 %v1373_v42, %s11019_s22  ;;  %1512 = vrot.lane.b32.xlu1 %v1491_v43, %s11019_s22 }
 0x287   : > { %1510 = vrot.lane.b32.xlu0 %v1487_v47, %s11019_s22  ;;  %1290 = vrot.lane.b32.xlu1 %v1275_v48, %s11019_s22 }
 0x28b   : > { %1402 = vrot.lane.b32.xlu1 %v1385_v51, %s11019_s22  ;;  %1400 = vrot.lane.b32.xlu0 %v1381_v52, %s11019_s22 }
 0x28f   : > { %1516 = vrot.lane.b32.xlu1 %v1499_v55, %s11019_s22  ;;  %1514 = vrot.lane.b32.xlu0 %v1495_v56, %s11019_s22 }
 0x293   : > { %1518 = vrot.lane.b32.xlu1 %v1503_v59, %s11019_s22  ;;  %1404 = vrot.lane.b32.xlu0 %v1389_v60, %s11019_s22  ;;  %s11022_s22 = smov [#allocation5]  }
 0x294   : > { %s10952_s23 = sshll.u32 %s11022_s22, 4  ;;  %s10953_s23 = int_to_ptr.vmem [resolvable:$false] %s10952_s23 }
 0x295   : > { %s10954_s24 = scalar_lea.vmem %s10953_s23, 2048 }
 0x2c9   : > { %v1277_v61 = vpop.permute.xlu1 %1276  ;;  %v1161_v62 = vpop.permute.xlu0 %1160 }
 0x2ca   : > { %1300 = vst.msk [vmem:[#allocation2 + $0x5] sm:$0x1] %vm1185_vm7, %v1277_v61  ;;  %1186 = vst.msk [vmem:[#allocation2 + $0x4] sm:$0x1] %vm1185_vm7, %v1161_v62 }
 0x2cd   : > { %v1165_v63 = vpop.permute.xlu1 %1164  ;;  %v1163_v0 = vpop.permute.xlu0 %1162 }
 0x2ce   : > { %1188 = vst.msk [vmem:[#allocation2 + $0xc] sm:$0x1] %vm1185_vm7, %v1165_v63  ;;  %1187 = vst.msk [vmem:[#allocation2 + $0x8] sm:$0x1] %vm1185_vm7, %v1163_v0 }
 0x2d1   : > { %v1281_v2 = vpop.permute.xlu1 %1280  ;;  %v1279_v3 = vpop.permute.xlu0 %1278 }
 0x2d2   : > { %1302 = vst.msk [vmem:[#allocation2 + $0xd] sm:$0x1] %vm1185_vm7, %v1281_v2  ;;  %1301 = vst.msk [vmem:[#allocation2 + $0x9] sm:$0x1] %vm1185_vm7, %v1279_v3 }
 0x2d5   : > { %v1169_v36 = vpop.permute.xlu1 %1168  ;;  %v1391_v5 = vpop.permute.xlu0 %1390 }
 0x2d6   : > { %1190 = vst.msk [vmem:[#allocation2 + $0x14] sm:$0x1] %vm1185_vm7, %v1169_v36  ;;  %1414 = vst.msk [vmem:[#allocation2 + $0x6] sm:$0x1] %vm1185_vm7, %v1391_v5 }
 0x2d9   : > { %v1285_v6 = vpop.permute.xlu1 %1284  ;;  %v1167_v7 = vpop.permute.xlu0 %1166 }
 0x2da   : > { %1304 = vst.msk [vmem:[#allocation2 + $0x15] sm:$0x1] %vm1185_vm7, %v1285_v6  ;;  %1189 = vst.msk [vmem:[#allocation2 + $0x10] sm:$0x1] %vm1185_vm7, %v1167_v7 }
 0x2dd   : > { %v1505_v8 = vpop.permute.xlu1 %1504  ;;  %v1283_v9 = vpop.permute.xlu0 %1282 }
 0x2de   : > { %1528 = vst.msk [vmem:[#allocation2 + $0x7] sm:$0x1] %vm1185_vm7, %v1505_v8  ;;  %1303 = vst.msk [vmem:[#allocation2 + $0x11] sm:$0x1] %vm1185_vm7, %v1283_v9 }
 0x2e1   : > { %v1173_v10 = vpop.permute.xlu1 %1172  ;;  %v1171_v11 = vpop.permute.xlu0 %1170 }
 0x2e2   : > { %1192 = vst.msk [vmem:[#allocation2 + $0x1c] sm:$0x1] %vm1185_vm7, %v1173_v10  ;;  %1191 = vst.msk [vmem:[#allocation2 + $0x18] sm:$0x1] %vm1185_vm7, %v1171_v11 }
 0x2e5   : > { %v1537_v12 = vld [vmem:[#allocation2 + $0x4] sm:$0xf]  ;;  %v1289_v14 = vpop.permute.xlu1 %1288  ;;  %v1287_v15 = vpop.permute.xlu0 %1286 }
 0x2e6   : > { %v1649_v13 = vld [vmem:[#allocation2 + $0x4] sm:$0xf]  ;;  %1546 = vst.msk [vmem:[#allocation3 + $0x28] sm:$0xf] %vm1544_vm6, %v1537_v12 }
 0x2e7   : > { %v1554_v16 = vld [vmem:[#allocation2 + $0x4] sm:$0xf]  ;;  %1657 = vst.msk [vmem:[#allocation3 + $0xc] sm:$0xf] %vm1544_vm6, %v1649_v13 }
 0x2e8   : > { %1306 = vst.msk [vmem:[#allocation2 + $0x1d] sm:$0x1] %vm1185_vm7, %v1289_v14  ;;  %1305 = vst.msk [vmem:[#allocation2 + $0x19] sm:$0x1] %vm1185_vm7, %v1287_v15  ;;  %1571 = vrot.lane.b32.xlu1 %v1554_v16, %s11012_s26  ;;  %v1665_v17 = vld [vmem:[#allocation2 + $0x4] sm:$0xf] }
 0x2e9   : > { %1681 = vrot.lane.b32.xlu0 %v1665_v17, %s11012_s26  ;;  %v1395_v18 = vpop.permute.xlu1 %1394  ;;  %v1393_v4 = vpop.permute.xlu0 %1392  ;;  %v1602_v19 = vld [vmem:[#allocation2 + $0x4] sm:$0xf] }
 0x2ea   : > { %1416 = vst.msk [vmem:[#allocation2 + $0xe] sm:$0x1] %vm1185_vm7, %v1395_v18  ;;  %1415 = vst.msk [vmem:[#allocation2 + $0xa] sm:$0x1] %vm1185_vm7, %v1393_v4  ;;  %v1713_v20 = vld [vmem:[#allocation2 + $0x4] sm:$0xf] }
 0x2ec   : > { %1619 = vrot.lane.b32.xlu1 %v1602_v19, %s11017_s21 }
 0x2ed   : > { %1729 = vrot.lane.b32.xlu0 %v1713_v20, %s11017_s21  ;;  %v1509_v21 = vpop.permute.xlu1 %1508  ;;  %v1507_v22 = vpop.permute.xlu0 %1506 }
 0x2ee   : > { %v1884_v24 = vld [vmem:[#allocation3 + $0x8] sm:$0xff]  ;;  %1530 = vst.msk [vmem:[#allocation2 + $0xf] sm:$0x1] %vm1185_vm7, %v1509_v21  ;;  %1529 = vst.msk [vmem:[#allocation2 + $0xb] sm:$0x1] %vm1185_vm7, %v1507_v22 }
 0x2ef   : > { %v1923_v25 = vpack.c.bf16 %v1884_v24, %v1883_v23 }
 0x2f1   : > { %10266 = vmatpush3.bf16.msra.mxu0 %v1923_v25  ;;  %v1175_v26 = vpop.permute.xlu0 %1174  ;;  %v1399_v28 = vpop.permute.xlu1 %1398 }
 0x2f2   : > { %10267 = vmatprep.subr.bf16.mxu0 %v11016_v1  ;;  %1193 = vst.msk [vmem:[#allocation2 + $0x20] sm:$0x1] %vm1185_vm7, %v1175_v26  ;;  %1418 = vst.msk [vmem:[#allocation2 + $0x16] sm:$0x1] %vm1185_vm7, %v1399_v28 }
 0x2f5   : > { %v1539_v30 = vld [vmem:[#allocation2 + $0xc] sm:$0xf]  ;;  %v1397_v33 = vpop.permute.xlu0 %1396  ;;  %v1513_v34 = vpop.permute.xlu1 %1512  ;;  %v1538_v35 = vld [vmem:[#allocation2 + $0x8] sm:$0xf] }
 0x2f6   : > { %v1651_v31 = vld [vmem:[#allocation2 + $0xc] sm:$0xf]  ;;  %1548 = vst.msk [vmem:[#allocation3 + $0x78] sm:$0xf] %vm1544_vm6, %v1539_v30  ;;  %v1650_v37 = vld [vmem:[#allocation2 + $0x8] sm:$0xf] }
 0x2f7   : > { %v1763_v32 = vld [vmem:[#allocation2 + $0xc] sm:$0xf]  ;;  %1659 = vst.msk [vmem:[#allocation3 + $0x5c] sm:$0xf] %vm1544_vm6, %v1651_v31  ;;  %v1762_v38 = vld [vmem:[#allocation2 + $0x8] sm:$0xf] }
 0x2f8   : > { %1771 = vst.msk [vmem:[#allocation3 + $0x40] sm:$0xf] %vm1544_vm6, %v1763_v32  ;;  %1547 = vst.msk [vmem:[#allocation3 + $0x50] sm:$0xf] %vm1544_vm6, %v1538_v35  ;;  %v1666_v39 = vld [vmem:[#allocation2 + $0x8] sm:$0xf] }
 0x2f9   : > { %1417 = vst.msk [vmem:[#allocation2 + $0x12] sm:$0x1] %vm1185_vm7, %v1397_v33  ;;  %1532 = vst.msk [vmem:[#allocation2 + $0x17] sm:$0x1] %vm1185_vm7, %v1513_v34  ;;  %v1778_v40 = vld [vmem:[#allocation2 + $0x8] sm:$0xf]  ;;  %1683 = vrot.lane.b32.xlu1 %v1666_v39, %s11012_s26  ;;  %v1511_v41 = vpop.permute.xlu0 %1510  ;;  %v1291_v42 = vpop.permute.xlu1 %1290 }
 0x2fa   : > { %1658 = vst.msk [vmem:[#allocation3 + $0x34] sm:$0xf] %vm1544_vm6, %v1650_v37  ;;  %1770 = vst.msk [vmem:[#allocation3 + $0x18] sm:$0xf] %vm1544_vm6, %v1762_v38  ;;  %1794 = vrot.lane.b32.xlu0 %v1778_v40, %s11012_s26  ;;  %v1714_v43 = vld [vmem:[#allocation2 + $0x8] sm:$0xf] }
 0x2fb   : > { %1531 = vst.msk [vmem:[#allocation2 + $0x13] sm:$0x1] %vm1185_vm7, %v1511_v41  ;;  %1307 = vst.msk [vmem:[#allocation2 + $0x21] sm:$0x1] %vm1185_vm7, %v1291_v42  ;;  %v1826_v44 = vld [vmem:[#allocation2 + $0x8] sm:$0xf] }
 0x2fc   : > { %v1779_v50 = vld [vmem:[#allocation2 + $0xc] sm:$0xf]  ;;  %v1555_v51 = vld [vmem:[#allocation2 + $0x8] sm:$0xf]  ;;  %v1833_v39 = vld [vmem:[#allocation2 + $0x24] sm:$0xf] }
 0x2fd   : > { %1731 = vrot.lane.b32.xlu1 %v1714_v43, %s11017_s21  ;;  %v1403_v48 = vpop.permute.xlu1 %1402  ;;  %v1401_v49 = vpop.permute.xlu0 %1400  ;;  %v1827_v57 = vld [vmem:[#allocation2 + $0xc] sm:$0xf]  ;;  %v1603_v58 = vld [vmem:[#allocation2 + $0x8] sm:$0xf] }
 0x2fe   : > { %1842 = vrot.lane.b32.xlu0 %v1826_v44, %s11017_s21  ;;  %1420 = vst.msk [vmem:[#allocation2 + $0x1e] sm:$0x1] %vm1185_vm7, %v1403_v48  ;;  %1419 = vst.msk [vmem:[#allocation2 + $0x1a] sm:$0x1] %vm1185_vm7, %v1401_v49  ;;  %v1556_v61 = vld [vmem:[#allocation2 + $0xc] sm:$0xf] }
 0x2ff   : > { %v1667_v62 = vld [vmem:[#allocation2 + $0xc] sm:$0xf] }
 0x300   : > { %v1541_v45 = vld [vmem:[#allocation2 + $0x14] sm:$0xf]  ;;  %v1604_v6 = vld [vmem:[#allocation2 + $0xc] sm:$0xf] }
 0x301   : > { %v1653_v46 = vld [vmem:[#allocation2 + $0x14] sm:$0xf]  ;;  %1550 = vst.msk [vmem:[#allocation3 + $0xc8] sm:$0xf] %vm1544_vm6, %v1541_v45  ;;  %1796 = vrot.lane.b32.xlu1 %v1779_v50, %s11012_s26  ;;  %v1517_v55 = vpop.permute.xlu1 %1516  ;;  %v1515_v56 = vpop.permute.xlu0 %1514  ;;  %v1715_v7 = vld [vmem:[#allocation2 + $0xc] sm:$0xf] }
 0x302   : > { %v1765_v47 = vld [vmem:[#allocation2 + $0x14] sm:$0xf]  ;;  %1661 = vst.msk [vmem:[#allocation3 + $0xac] sm:$0xf] %vm1544_vm6, %v1653_v46  ;;  %1573 = vrot.lane.b32.xlu0 %v1555_v51, %s11012_s26  ;;  %v1540_v52 = vld [vmem:[#allocation2 + $0x10] sm:$0xf] }
 0x303   : > { %1773 = vst.msk [vmem:[#allocation3 + $0x90] sm:$0xf] %vm1544_vm6, %v1765_v47  ;;  %v1652_v53 = vld [vmem:[#allocation2 + $0x10] sm:$0xf]  ;;  %1549 = vst.msk [vmem:[#allocation3 + $0xa0] sm:$0xf] %vm1544_vm6, %v1540_v52 }
 0x304   : > { %v1764_v54 = vld [vmem:[#allocation2 + $0x10] sm:$0xf]  ;;  %1660 = vst.msk [vmem:[#allocation3 + $0x84] sm:$0xf] %vm1544_vm6, %v1652_v53  ;;  %v1781_v10 = vld [vmem:[#allocation2 + $0x14] sm:$0xf] }
 0x305   : > { %1772 = vst.msk [vmem:[#allocation3 + $0x68] sm:$0xf] %vm1544_vm6, %v1764_v54  ;;  %1844 = vrot.lane.b32.xlu1 %v1827_v57, %s11017_s21  ;;  %v1519_v59 = vpop.permute.xlu1 %1518  ;;  %v1405_v60 = vpop.permute.xlu0 %1404  ;;  %v1669_v11 = vld [vmem:[#allocation2 + $0x14] sm:$0xf]  ;;  %v1780_v15 = vld [vmem:[#allocation2 + $0x10] sm:$0xf] }
 0x306   : > { %1534 = vst.msk [vmem:[#allocation2 + $0x1f] sm:$0x1] %vm1185_vm7, %v1517_v55  ;;  %1533 = vst.msk [vmem:[#allocation2 + $0x1b] sm:$0x1] %vm1185_vm7, %v1515_v56  ;;  %1621 = vrot.lane.b32.xlu0 %v1603_v58, %s11017_s21  ;;  %v1829_v12 = vld [vmem:[#allocation2 + $0x14] sm:$0xf] }
 0x307   : > { %1535 = vst.msk [vmem:[#allocation2 + $0x23] sm:$0x1] %vm1185_vm7, %v1519_v59  ;;  %1421 = vst.msk [vmem:[#allocation2 + $0x22] sm:$0x1] %vm1185_vm7, %v1405_v60  ;;  %v1717_v13 = vld [vmem:[#allocation2 + $0x14] sm:$0xf] }
 0x308   : > { %v1558_v14 = vld [vmem:[#allocation2 + $0x14] sm:$0xf]  ;;  %v1828_v17 = vld [vmem:[#allocation2 + $0x10] sm:$0xf]  ;;  %v11021_v56 = vmov 65535  }
 0x309   : > { %1575 = vrot.lane.b32.xlu1 %v1556_v61, %s11012_s26  ;;  %v1606_v16 = vld [vmem:[#allocation2 + $0x14] sm:$0xf]  ;;  %v1668_v18 = vld [vmem:[#allocation2 + $0x10] sm:$0xf]  ;;  %v1954_v57 = vsel %vm1952_vm9, 4294967295, %v11021_v56 }
 0x30a   : > { %1685 = vrot.lane.b32.xlu0 %v1667_v62, %s11012_s26  ;;  %v1557_v4 = vld [vmem:[#allocation2 + $0x10] sm:$0xf]  ;;  %v11482_v61 = vsel %vm1953_vm10, %v1954_v57, 0 }
 0x30b   : > { %v1716_v19 = vld [vmem:[#allocation2 + $0x10] sm:$0xf] }
 0x30c   : > { %v1605_v20 = vld [vmem:[#allocation2 + $0x10] sm:$0xf] }
 0x30d   : > { %v1543_v63 = vld [vmem:[#allocation2 + $0x1c] sm:$0xf]  ;;  %v1542_v3 = vld [vmem:[#allocation2 + $0x18] sm:$0xf]  ;;  %1623 = vrot.lane.b32.xlu1 %v1604_v6, %s11017_s21  ;;  %v11492_v6 = vld [vmem:[%s12475_s3] sm:$0xf] }
 0x30e   : > { %v1655_v0 = vld [vmem:[#allocation2 + $0x1c] sm:$0xf]  ;;  %1552 = vst.msk [vmem:[#allocation3 + $0x118] sm:$0xf] %vm1544_vm6, %v1543_v63  ;;  %v1654_v36 = vld [vmem:[#allocation2 + $0x18] sm:$0xf]  ;;  %1733 = vrot.lane.b32.xlu0 %v1715_v7, %s11017_s21 }
 0x30f   : > { %v1767_v2 = vld [vmem:[#allocation2 + $0x1c] sm:$0xf]  ;;  %1663 = vst.msk [vmem:[#allocation3 + $0xfc] sm:$0xf] %vm1544_vm6, %v1655_v0  ;;  %v1766_v5 = vld [vmem:[#allocation2 + $0x18] sm:$0xf] }
 0x310   : > { %1775 = vst.msk [vmem:[#allocation3 + $0xe0] sm:$0xf] %vm1544_vm6, %v1767_v2  ;;  %1551 = vst.msk [vmem:[#allocation3 + $0xf0] sm:$0xf] %vm1544_vm6, %v1542_v3  ;;  %v1656_v8 = vld [vmem:[#allocation2 + $0x20] sm:$0xf] }
 0x311   : > { %1662 = vst.msk [vmem:[#allocation3 + $0xd4] sm:$0xf] %vm1544_vm6, %v1654_v36  ;;  %1774 = vst.msk [vmem:[#allocation3 + $0xb8] sm:$0xf] %vm1544_vm6, %v1766_v5  ;;  %v1768_v9 = vld [vmem:[#allocation2 + $0x20] sm:$0xf]  ;;  %1800 = vrot.lane.b32.xlu1 %v1781_v10, %s11012_s26 }
 0x312   : > { %1664 = vst.msk [vmem:[#allocation3 + $0x124] sm:$0xf] %vm1544_vm6, %v1656_v8  ;;  %1776 = vst.msk [vmem:[#allocation3 + $0x108] sm:$0xf] %vm1544_vm6, %v1768_v9  ;;  %1689 = vrot.lane.b32.xlu0 %v1669_v11, %s11012_s26  ;;  %v1670_v21 = vld [vmem:[#allocation2 + $0x18] sm:$0xf] }
 0x313   : > { %v1782_v22 = vld [vmem:[#allocation2 + $0x18] sm:$0xf]  ;;  %v1783_v25 = vld [vmem:[#allocation2 + $0x1c] sm:$0xf]  ;;  %v1784_v34 = vld [vmem:[#allocation2 + $0x20] sm:$0xf] }
 0x314   : > { %v1718_v23 = vld [vmem:[#allocation2 + $0x18] sm:$0xf]  ;;  %v1831_v28 = vld [vmem:[#allocation2 + $0x1c] sm:$0xf]  ;;  %v1672_v35 = vld [vmem:[#allocation2 + $0x20] sm:$0xf] }
 0x315   : > { %1848 = vrot.lane.b32.xlu1 %v1829_v12, %s11017_s21  ;;  %v1830_v24 = vld [vmem:[#allocation2 + $0x18] sm:$0xf]  ;;  %v1560_v30 = vld [vmem:[#allocation2 + $0x1c] sm:$0xf]  ;;  %v1832_v37 = vld [vmem:[#allocation2 + $0x20] sm:$0xf] }
 0x316   : > { %1737 = vrot.lane.b32.xlu0 %v1717_v13, %s11017_s21  ;;  %v1559_v26 = vld [vmem:[#allocation2 + $0x18] sm:$0xf]  ;;  %v1671_v31 = vld [vmem:[#allocation2 + $0x1c] sm:$0xf]  ;;  %v1720_v38 = vld [vmem:[#allocation2 + $0x20] sm:$0xf] }
 0x317   : > { %v1607_v29 = vld [vmem:[#allocation2 + $0x18] sm:$0xf]  ;;  %v1608_v32 = vld [vmem:[#allocation2 + $0x1c] sm:$0xf] }
 0x318   : > { %v1719_v33 = vld [vmem:[#allocation2 + $0x1c] sm:$0xf] }
 0x319   : > { %1579 = vrot.lane.b32.xlu1 %v1558_v14, %s11012_s26 }
 0x31a   : > { %1798 = vrot.lane.b32.xlu0 %v1780_v15, %s11012_s26 }
 0x31d   : > { %1627 = vrot.lane.b32.xlu1 %v1606_v16, %s11017_s21 }
 0x31e   : > { %1846 = vrot.lane.b32.xlu0 %v1828_v17, %s11017_s21 }
 0x321   : > { %1687 = vrot.lane.b32.xlu1 %v1668_v18, %s11012_s26 }
 0x322   : > { %1577 = vrot.lane.b32.xlu0 %v1557_v4, %s11012_s26 }
 0x325   : > { %1735 = vrot.lane.b32.xlu1 %v1716_v19, %s11017_s21 }
 0x326   : > { %1625 = vrot.lane.b32.xlu0 %v1605_v20, %s11017_s21 }
 0x329   : > { %1691 = vrot.lane.b32.xlu1 %v1670_v21, %s11012_s26 }
 0x32a   : > { %1802 = vrot.lane.b32.xlu0 %v1782_v22, %s11012_s26 }
 0x32d   : > { %1739 = vrot.lane.b32.xlu1 %v1718_v23, %s11017_s21 }
 0x32e   : > { %1850 = vrot.lane.b32.xlu0 %v1830_v24, %s11017_s21 }
 0x331   : > { %1804 = vrot.lane.b32.xlu1 %v1783_v25, %s11012_s26 }
 0x332   : > { %1581 = vrot.lane.b32.xlu0 %v1559_v26, %s11012_s26 }
 0x335   : > { %1852 = vrot.lane.b32.xlu1 %v1831_v28, %s11017_s21 }
 0x336   : > { %1629 = vrot.lane.b32.xlu0 %v1607_v29, %s11017_s21 }
 0x339   : > { %1583 = vrot.lane.b32.xlu1 %v1560_v30, %s11012_s26 }
 0x33a   : > { %1693 = vrot.lane.b32.xlu0 %v1671_v31, %s11012_s26 }
 0x33d   : > { %1631 = vrot.lane.b32.xlu1 %v1608_v32, %s11017_s21 }
 0x33e   : > { %1741 = vrot.lane.b32.xlu0 %v1719_v33, %s11017_s21 }
 0x341   : > { %1695 = vrot.lane.b32.xlu1 %v1672_v35, %s11012_s26 }
 0x342   : > { %1806 = vrot.lane.b32.xlu0 %v1784_v34, %s11012_s26  ;;  %s9823_s26 = sshll.u32 %s323_s25, 6 }
 0x343   : > { %s12402_s27 = scalar_lea.vmem [#allocation5], %s9823_s26 }
 0x344   : > { %s9757_s29 = sshll.u32 %s12402_s27, 4  ;;  %s12423_s29 = int_to_ptr.vmem [resolvable:$true] %s9757_s29 }
 0x345   : > { %1743 = vrot.lane.b32.xlu1 %v1720_v38, %s11017_s21  ;;  %p10955_p0 = scmp.lt.s32.totalorder %s12423_s29, %s10953_s23 }
 0x346   : > { %1854 = vrot.lane.b32.xlu0 %v1832_v37, %s11017_s21 }
 0x349   : > { %1856 = vrot.lane.b32.xlu1 %v1833_v39, %s11017_s21  ;;  %s10948_s21 = scalar_lea.vmem %s12423_s29, 1024 }
 0x34a   : > { %p10949_p11 = scmp.ne.s32.totalorder %s12423_s29, %s10948_s21  ;;  %p10956_p1 = scmp.lt.s32.totalorder %s10954_s24, %s10948_s21 }
 0x34c   : > { %p10950_p12 = pnand %p10949_p11, %p11113_p5  ;;  %p10957_p2 = por %p10956_p1, %p10955_p0 }
 0x34e   : > { %p10951_p13 = pneg %p10950_p12 }
 0x350   : > { %p10958_p3 = pnand %p10957_p2, %p10951_p13 }
 0x35a   : > { %v1572_v40 = vpop.permute.xlu1 %1571 }
 0x35b   : > { %1594 = vst.msk [vmem:[#allocation3 + $0x2c] sm:$0xf] %vm1544_vm6, %v1572_v40  ;;  %v1682_v41 = vpop.permute.xlu0 %1681 }
 0x35c   : > { %1705 = vst.msk [vmem:[#allocation3 + $0x10] sm:$0xf] %vm1544_vm6, %v1682_v41 }
 0x35e   : > { %v1620_v42 = vpop.permute.xlu1 %1619 }
 0x35f   : > { %1642 = vst.msk [vmem:[#allocation3 + $0x30] sm:$0xf] %vm1544_vm6, %v1620_v42  ;;  %v1730_v43 = vpop.permute.xlu0 %1729 }
 0x360   : > { %1753 = vst.msk [vmem:[#allocation3 + $0x14] sm:$0xf] %vm1544_vm6, %v1730_v43 }
 0x362   : > { %v1888_v44 = vld [vmem:[#allocation3 + $0x28] sm:$0xff] }
 0x366   : > { %v1889_v45 = vld [vmem:[#allocation3 + $0x30] sm:$0xff] }
 0x367   : > { %v1926_v46 = vpack.c.bf16 %v1889_v45, %v1888_v44  ;;  %v1885_v53 = vld [vmem:[#allocation3 + $0x10] sm:$0xff] }
 0x369   : > { %10276 = vmatpush3.bf16.msra.mxu1 %v1926_v46 }
 0x36a   : > { %10277 = vmatprep.subr.bf16.mxu1 %v11016_v1 }
 0x36b   : > { %v1684_v47 = vpop.permute.xlu1 %1683 }
 0x36c   : > { %v1795_v48 = vpop.permute.xlu0 %1794  ;;  %1706 = vst.msk [vmem:[#allocation3 + $0x38] sm:$0xf] %vm1544_vm6, %v1684_v47 }
 0x36d   : > { %1818 = vst.msk [vmem:[#allocation3 + $0x1c] sm:$0xf] %vm1544_vm6, %v1795_v48 }
 0x36f   : > { %v1732_v49 = vpop.permute.xlu1 %1731 }
 0x370   : > { %v1843_v50 = vpop.permute.xlu0 %1842  ;;  %1754 = vst.msk [vmem:[#allocation3 + $0x3c] sm:$0xf] %vm1544_vm6, %v1732_v49 }
 0x371   : > { %1866 = vst.msk [vmem:[#allocation3 + $0x20] sm:$0xf] %vm1544_vm6, %v1843_v50 }
 0x373   : > { %v1797_v51 = vpop.permute.xlu1 %1796 }
 0x374   : > { %v1574_v52 = vpop.permute.xlu0 %1573  ;;  %v1886_v54 = vld [vmem:[#allocation3 + $0x18] sm:$0xff]  ;;  %1819 = vst.msk [vmem:[#allocation3 + $0x44] sm:$0xf] %vm1544_vm6, %v1797_v51 }
 0x375   : > { %1595 = vst.msk [vmem:[#allocation3 + $0x54] sm:$0xf] %vm1544_vm6, %v1574_v52  ;;  %v1924_v55 = vpack.c.bf16 %v1886_v54, %v1885_v53 }
 0x377   : > { %10268 = vmatpush3.bf16.msra.mxu0 %v1924_v55  ;;  %v1845_v58 = vpop.permute.xlu1 %1844  ;;  %v1890_v3 = vld [vmem:[#allocation3 + $0x38] sm:$0xff] }
 0x378   : > { %v1622_v59 = vpop.permute.xlu0 %1621  ;;  %10269 = vmatprep.subr.bf16.mxu0 %v11016_v1  ;;  %v1887_v60 = vld [vmem:[#allocation3 + $0x20] sm:$0x1f]  ;;  %1867 = vst.msk [vmem:[#allocation3 + $0x48] sm:$0xf] %vm1544_vm6, %v1845_v58 }
 0x379   : > { %1643 = vst.msk [vmem:[#allocation3 + $0x58] sm:$0xf] %vm1544_vm6, %v1622_v59  ;;  %v1925_v62 = vpack.c.bf16 %v1887_v60, %v1887_v60 }
 0x37b   : > { %v1957_v63 = vand.u32 %v11482_v61, %v1925_v62  ;;  %v1576_v0 = vpop.permute.xlu1 %1575  ;;  %v1891_v36 = vld [vmem:[#allocation3 + $0x40] sm:$0xff] }
 0x37c   : > { %v1686_v2 = vpop.permute.xlu0 %1685  ;;  %1596 = vst.msk [vmem:[#allocation3 + $0x7c] sm:$0xf] %vm1544_vm6, %v1576_v0  ;;  %v1927_v5 = vpack.c.bf16 %v1891_v36, %v1890_v3  ;;  %v1893_v9 = vld [vmem:[#allocation3 + $0x50] sm:$0xff] }
 0x37d   : > { %1707 = vst.msk [vmem:[#allocation3 + $0x60] sm:$0xf] %vm1544_vm6, %v1686_v2  ;;  %10270 = vmatpush3.bf16.msra.mxu0 %v1957_v63 }
 0x37e   : > { %10285 = vmatprep.subr.bf16.mxu0 %v11016_v1  ;;  %10278 = vmatpush3.bf16.msra.mxu1 %v1927_v5 }
 0x37f   : > { %v1624_v7 = vpop.permute.xlu1 %1623  ;;  %10279 = vmatprep.subr.bf16.mxu1 %v11016_v1  ;;  %v1892_v11 = vld [vmem:[#allocation3 + $0x48] sm:$0x1f] }
 0x380   : > { %v1734_v8 = vpop.permute.xlu0 %1733  ;;  %10272 = vmatmul.mubr.msk.bf16.vlgmr.msra.gmra.mrb[8].mxu0 %vm1948_vm11, %v11492_v6  ;;  %v1894_v10 = vld [vmem:[#allocation3 + $0x58] sm:$0xff]  ;;  %1644 = vst.msk [vmem:[#allocation3 + $0x80] sm:$0xf] %vm1544_vm6, %v1624_v7  ;;  %v1928_v13 = vpack.c.bf16 %v1892_v11, %v1892_v11 }
 0x381   : > { %1755 = vst.msk [vmem:[#allocation3 + $0x64] sm:$0xf] %vm1544_vm6, %v1734_v8  ;;  %v1929_v12 = vpack.c.bf16 %v1894_v10, %v1893_v9  ;;  %10291 = vmatprep.mubr.msk.bf16.mxu0 %vm11015_vm4, %v11016_v1 }
 0x382   : > { %v2000_v14 = vand.u32 %v11482_v61, %v1928_v13 }
 0x383   : > { %10286 = vmatpush3.bf16.msra.mxu0 %v1929_v12  ;;  %v1801_v15 = vpop.permute.xlu1 %1800  ;;  %v1898_v4 = vld [vmem:[#allocation3 + $0x78] sm:$0xff] }
 0x384   : > { %v1690_v16 = vpop.permute.xlu0 %1689  ;;  %10287 = vmatprep.subr.bf16.mxu0 %v11016_v1  ;;  %1821 = vst.msk [vmem:[#allocation3 + $0x94] sm:$0xf] %vm1544_vm6, %v1801_v15  ;;  %10280 = vmatpush3.bf16.msra.mxu1 %v2000_v14 }
 0x385   : > { %1709 = vst.msk [vmem:[#allocation3 + $0xb0] sm:$0xf] %vm1544_vm6, %v1690_v16  ;;  %10295 = vmatprep.subr.bf16.mxu1 %v11016_v1 }
 0x387   : > { %v1849_v17 = vpop.permute.xlu1 %1848  ;;  %10282 = vmatmul.mubr.msk.bf16.vlgmr.msra.gmra.mrb[8].mxu1 %vm1948_vm11, %v11492_v6  ;;  %v1899_v19 = vld [vmem:[#allocation3 + $0x80] sm:$0xff] }
 0x388   : > { %v1738_v18 = vpop.permute.xlu0 %1737  ;;  %1869 = vst.msk [vmem:[#allocation3 + $0x98] sm:$0xf] %vm1544_vm6, %v1849_v17  ;;  %v1932_v20 = vpack.c.bf16 %v1899_v19, %v1898_v4  ;;  %10301 = vmatprep.mubr.msk.bf16.mxu1 %vm11015_vm4, %v11016_v1  ;;  %v1895_v28 = vld [vmem:[#allocation3 + $0x60] sm:$0xff] }
 0x389   : > { %1757 = vst.msk [vmem:[#allocation3 + $0xb4] sm:$0xf] %vm1544_vm6, %v1738_v18 }
 0x38a   : > { %10296 = vmatpush3.bf16.msra.mxu1 %v1932_v20 }
 0x38b   : > { %v1580_v21 = vpop.permute.xlu1 %1579  ;;  %10297 = vmatprep.subr.bf16.mxu1 %v11016_v1  ;;  %v1901_v40 = vld [vmem:[#allocation3 + $0x90] sm:$0xff] }
 0x38c   : > { %v1799_v22 = vpop.permute.xlu0 %1798  ;;  %1598 = vst.msk [vmem:[#allocation3 + $0xcc] sm:$0xf] %vm1544_vm6, %v1580_v21 }
 0x38d   : > { %1820 = vst.msk [vmem:[#allocation3 + $0x6c] sm:$0xf] %vm1544_vm6, %v1799_v22 }
 0x38f   : > { %v1628_v23 = vpop.permute.xlu1 %1627  ;;  %v1902_v39 = vld [vmem:[#allocation3 + $0x98] sm:$0x1f] }
 0x390   : > { %v1847_v24 = vpop.permute.xlu0 %1846  ;;  %1646 = vst.msk [vmem:[#allocation3 + $0xd0] sm:$0xf] %vm1544_vm6, %v1628_v23  ;;  %v1934_v48 = vpack.c.bf16 %v1902_v39, %v1902_v39  ;;  %v1905_v51 = vld [vmem:[#allocation3 + $0xb0] sm:$0xff] }
 0x391   : > { %1868 = vst.msk [vmem:[#allocation3 + $0x70] sm:$0xf] %vm1544_vm6, %v1847_v24 }
 0x392   : > { %v2086_v53 = vand.u32 %v11482_v61, %v1934_v48 }
 0x393   : > { %v1688_v25 = vpop.permute.xlu1 %1687  ;;  %v1908_v58 = vld [vmem:[#allocation3 + $0xc8] sm:$0xff] }
 0x394   : > { %v1578_v26 = vpop.permute.xlu0 %1577  ;;  %v1896_v29 = vld [vmem:[#allocation3 + $0x68] sm:$0xff]  ;;  %1708 = vst.msk [vmem:[#allocation3 + $0x88] sm:$0xf] %vm1544_vm6, %v1688_v25 }
 0x395   : > { %1597 = vst.msk [vmem:[#allocation3 + $0xa4] sm:$0xf] %vm1544_vm6, %v1578_v26  ;;  %v1930_v30 = vpack.c.bf16 %v1896_v29, %v1895_v28  ;;  %v1921_v26 = vld [vmem:[#allocation3 + $0x130] sm:$0xff] }
 0x397   : > { %10288 = vmatpush3.bf16.msra.mxu0 %v1930_v30  ;;  %v1736_v31 = vpop.permute.xlu1 %1735  ;;  %v1909_v55 = vld [vmem:[#allocation3 + $0xd0] sm:$0xff] }
 0x398   : > { %v1626_v32 = vpop.permute.xlu0 %1625  ;;  %10289 = vmatprep.subr.bf16.mxu0 %v11016_v1  ;;  %v1897_v33 = vld [vmem:[#allocation3 + $0x70] sm:$0x1f]  ;;  %1756 = vst.msk [vmem:[#allocation3 + $0x8c] sm:$0xf] %vm1544_vm6, %v1736_v31  ;;  %v1938_v60 = vpack.c.bf16 %v1909_v55, %v1908_v58 }
 0x399   : > { %1645 = vst.msk [vmem:[#allocation3 + $0xa8] sm:$0xf] %vm1544_vm6, %v1626_v32  ;;  %v1931_v34 = vpack.c.bf16 %v1897_v33, %v1897_v33 }
 0x39b   : > { %v2043_v35 = vand.u32 %v11482_v61, %v1931_v34  ;;  %v1692_v37 = vpop.permute.xlu1 %1691 }
 0x39c   : > { %v1803_v38 = vpop.permute.xlu0 %1802  ;;  %1710 = vst.msk [vmem:[#allocation3 + $0xd8] sm:$0xf] %vm1544_vm6, %v1692_v37  ;;  %v1903_v44 = vld [vmem:[#allocation3 + $0xa0] sm:$0xff] }
 0x39d   : > { %1822 = vst.msk [vmem:[#allocation3 + $0xbc] sm:$0xf] %vm1544_vm6, %v1803_v38  ;;  %10290 = vmatpush3.bf16.msra.mxu0 %v2043_v35 }
 0x39e   : > { %10305 = vmatprep.subr.bf16.mxu0 %v11016_v1 }
 0x39f   : > { %v1740_v41 = vpop.permute.xlu1 %1739  ;;  %v1900_v43 = vld [vmem:[#allocation3 + $0x88] sm:$0xff] }
 0x3a0   : > { %v1851_v42 = vpop.permute.xlu0 %1850  ;;  %10292 = vmatmul.mubr.msk.bf16.vlgmr.msra.gmra.mrb[12].mxu0 %vm1948_vm11, %v11492_v6  ;;  %v1904_v45 = vld [vmem:[#allocation3 + $0xa8] sm:$0xff]  ;;  %1758 = vst.msk [vmem:[#allocation3 + $0xdc] sm:$0xf] %vm1544_vm6, %v1740_v41  ;;  %v1933_v46 = vpack.c.bf16 %v1901_v40, %v1900_v43 }
 0x3a1   : > { %1870 = vst.msk [vmem:[#allocation3 + $0xc0] sm:$0xf] %vm1544_vm6, %v1851_v42  ;;  %v1935_v47 = vpack.c.bf16 %v1904_v45, %v1903_v44  ;;  %10311 = vmatprep.mubr.msk.bf16.mxu0 %vm11015_vm4, %v11016_v1 }
 0x3a2   : > { %10298 = vmatpush3.bf16.msra.mxu1 %v1933_v46 }
 0x3a3   : > { %10306 = vmatpush3.bf16.msra.mxu0 %v1935_v47  ;;  %v1805_v49 = vpop.permute.xlu1 %1804  ;;  %10299 = vmatprep.subr.bf16.mxu1 %v11016_v1 }
 0x3a4   : > { %v1582_v50 = vpop.permute.xlu0 %1581  ;;  %10307 = vmatprep.subr.bf16.mxu0 %v11016_v1  ;;  %v1906_v52 = vld [vmem:[#allocation3 + $0xb8] sm:$0xff]  ;;  %1823 = vst.msk [vmem:[#allocation3 + $0xe4] sm:$0xf] %vm1544_vm6, %v1805_v49 }
 0x3a5   : > { %1599 = vst.msk [vmem:[#allocation3 + $0xf4] sm:$0xf] %vm1544_vm6, %v1582_v50  ;;  %v1936_v54 = vpack.c.bf16 %v1906_v52, %v1905_v51 }
 0x3a6   : > { %10300 = vmatpush3.bf16.msra.mxu1 %v2086_v53 }
 0x3a7   : > { %10308 = vmatpush3.bf16.msra.mxu0 %v1936_v54  ;;  %v1853_v56 = vpop.permute.xlu1 %1852  ;;  %10315 = vmatprep.subr.bf16.mxu1 %v11016_v1  ;;  %v1910_v3 = vld [vmem:[#allocation3 + $0xd8] sm:$0xff] }
 0x3a8   : > { %v1630_v57 = vpop.permute.xlu0 %1629  ;;  %10309 = vmatprep.subr.bf16.mxu0 %v11016_v1  ;;  %v1907_v59 = vld [vmem:[#allocation3 + $0xc0] sm:$0x1f]  ;;  %1871 = vst.msk [vmem:[#allocation3 + $0xe8] sm:$0xf] %vm1544_vm6, %v1853_v56 }
 0x3a9   : > { %1647 = vst.msk [vmem:[#allocation3 + $0xf8] sm:$0xf] %vm1544_vm6, %v1630_v57  ;;  %v1937_v62 = vpack.c.bf16 %v1907_v59, %v1907_v59  ;;  %10302 = vmatmul.mubr.msk.bf16.vlgmr.msra.gmra.mrb[12].mxu1 %vm1948_vm11, %v11492_v6 }
 0x3aa   : > { %10316 = vmatpush3.bf16.msra.mxu1 %v1938_v60  ;;  %10321 = vmatprep.mubr.msk.bf16.mxu1 %vm11015_vm4, %v11016_v1 }
 0x3ab   : > { %v2129_v63 = vand.u32 %v11482_v61, %v1937_v62  ;;  %v1584_v0 = vpop.permute.xlu1 %1583  ;;  %10317 = vmatprep.subr.bf16.mxu1 %v11016_v1  ;;  %v1911_v36 = vld [vmem:[#allocation3 + $0xe0] sm:$0xff] }
 0x3ac   : > { %v1694_v2 = vpop.permute.xlu0 %1693  ;;  %1600 = vst.msk [vmem:[#allocation3 + $0x11c] sm:$0xf] %vm1544_vm6, %v1584_v0  ;;  %v1939_v5 = vpack.c.bf16 %v1911_v36, %v1910_v3  ;;  %v1913_v9 = vld [vmem:[#allocation3 + $0xf0] sm:$0xff] }
 0x3ad   : > { %1711 = vst.msk [vmem:[#allocation3 + $0x100] sm:$0xf] %vm1544_vm6, %v1694_v2  ;;  %10310 = vmatpush3.bf16.msra.mxu0 %v2129_v63 }
 0x3ae   : > { %10325 = vmatprep.subr.bf16.mxu0 %v11016_v1  ;;  %10318 = vmatpush3.bf16.msra.mxu1 %v1939_v5 }
 0x3af   : > { %v1632_v7 = vpop.permute.xlu1 %1631  ;;  %10319 = vmatprep.subr.bf16.mxu1 %v11016_v1  ;;  %v1912_v11 = vld [vmem:[#allocation3 + $0xe8] sm:$0x1f] }
 0x3b0   : > { %v1742_v8 = vpop.permute.xlu0 %1741  ;;  %10312 = vmatmul.mubr.msk.bf16.vlgmr.msra.gmra.mrb[16].mxu0 %vm1948_vm11, %v11492_v6  ;;  %v1914_v10 = vld [vmem:[#allocation3 + $0xf8] sm:$0xff]  ;;  %1648 = vst.msk [vmem:[#allocation3 + $0x120] sm:$0xf] %vm1544_vm6, %v1632_v7  ;;  %v1940_v13 = vpack.c.bf16 %v1912_v11, %v1912_v11 }
 0x3b1   : > { %1759 = vst.msk [vmem:[#allocation3 + $0x104] sm:$0xf] %vm1544_vm6, %v1742_v8  ;;  %v1941_v12 = vpack.c.bf16 %v1914_v10, %v1913_v9  ;;  %10331 = vmatprep.mubr.msk.bf16.mxu0 %vm11015_vm4, %v11016_v1 }
 0x3b2   : > { %v2172_v14 = vand.u32 %v11482_v61, %v1940_v13 }
 0x3b3   : > { %10326 = vmatpush3.bf16.msra.mxu0 %v1941_v12  ;;  %v1696_v15 = vpop.permute.xlu1 %1695  ;;  %v1918_v4 = vld [vmem:[#allocation3 + $0x118] sm:$0xff] }
 0x3b4   : > { %v1807_v16 = vpop.permute.xlu0 %1806  ;;  %10327 = vmatprep.subr.bf16.mxu0 %v11016_v1  ;;  %1712 = vst.msk [vmem:[#allocation3 + $0x128] sm:$0xf] %vm1544_vm6, %v1696_v15  ;;  %10320 = vmatpush3.bf16.msra.mxu1 %v2172_v14 }
 0x3b5   : > { %1824 = vst.msk [vmem:[#allocation3 + $0x10c] sm:$0xf] %vm1544_vm6, %v1807_v16  ;;  %10335 = vmatprep.subr.bf16.mxu1 %v11016_v1 }
 0x3b7   : > { %v1744_v17 = vpop.permute.xlu1 %1743  ;;  %10322 = vmatmul.mubr.msk.bf16.vlgmr.msra.gmra.mrb[16].mxu1 %vm1948_vm11, %v11492_v6  ;;  %v1919_v19 = vld [vmem:[#allocation3 + $0x120] sm:$0xff] }
 0x3b8   : > { %v1855_v18 = vpop.permute.xlu0 %1854  ;;  %1760 = vst.msk [vmem:[#allocation3 + $0x12c] sm:$0xf] %vm1544_vm6, %v1744_v17  ;;  %v1944_v20 = vpack.c.bf16 %v1919_v19, %v1918_v4  ;;  %10341 = vmatprep.mubr.msk.bf16.mxu1 %vm11015_vm4, %v11016_v1  ;;  %v1915_v22 = vld [vmem:[#allocation3 + $0x100] sm:$0xff] }
 0x3b9   : > { %1872 = vst.msk [vmem:[#allocation3 + $0x110] sm:$0xf] %vm1544_vm6, %v1855_v18 }
 0x3ba   : > { %10336 = vmatpush3.bf16.msra.mxu1 %v1944_v20 }
 0x3bb   : > { %v1857_v21 = vpop.permute.xlu1 %1856  ;;  %10337 = vmatprep.subr.bf16.mxu1 %v11016_v1 }
 0x3bc   : > { %v1916_v23 = vld [vmem:[#allocation3 + $0x108] sm:$0xff]  ;;  %1873 = vst.msk [vmem:[#allocation3 + $0x138] sm:$0xf] %vm1544_vm6, %v1857_v21 }
 0x3bd   : > { %v1942_v24 = vpack.c.bf16 %v1916_v23, %v1915_v22 }
 0x3bf   : > { %10328 = vmatpush3.bf16.msra.mxu0 %v1942_v24  ;;  %v1920_v25 = vld [vmem:[#allocation3 + $0x128] sm:$0xff] }
 0x3c0   : > { %10329 = vmatprep.subr.bf16.mxu0 %v11016_v1  ;;  %v1917_v28 = vld [vmem:[#allocation3 + $0x110] sm:$0x1f]  ;;  %v1945_v29 = vpack.c.bf16 %v1921_v26, %v1920_v25 }
 0x3c1   : > { %v1943_v30 = vpack.c.bf16 %v1917_v28, %v1917_v28 }
 0x3c2   : > { %10338 = vmatpush3.bf16.msra.mxu1 %v1945_v29 }
 0x3c3   : > { %v2215_v31 = vand.u32 %v11482_v61, %v1943_v30  ;;  %10339 = vmatprep.subr.bf16.mxu1 %v11016_v1  ;;  %v1922_v32 = vld [vmem:[#allocation3 + $0x138] sm:$0x1f] }
 0x3c4   : > { %v1946_v33 = vpack.c.bf16 %v1922_v32, %v1922_v32 }
 0x3c5   : > { %10330 = vmatpush3.bf16.msra.mxu0 %v2215_v31 }
 0x3c6   : > { %10345 = vmatprep.subr.mxu0 %v11016_v1  ;;  %v2258_v34 = vand.u32 %v11482_v61, %v1946_v33 }
 0x3c8   : > { %10332 = vmatmul.mubr.msk.bf16.vlgmr.msra.gmra.mrb[20].mxu0 %vm1948_vm11, %v11492_v6  ;;  %10340 = vmatpush3.bf16.msra.mxu1 %v2258_v34 }
 0x3c9   : > { %10347 = vmatprep.mubr.msk.f32.mxu0 %vm11015_vm4, %v11016_v1  ;;  %10350 = vmatprep.subr.mxu1 %v11016_v1 }
 0x3cb   : > { %10342 = vmatmul.mubr.msk.bf16.vlgmr.msra.gmra.mrb[20].mxu1 %vm1948_vm11, %v11492_v6 }
 0x3cc   : > { %10352 = vmatprep.mubr.msk.f32.mxu1 %vm11015_vm4, %v11016_v1 }
 0x453   : > { %v1993_v35 = vpop.f32.mrb[8].mxu0 }
 0x454   : > { %v2300_v37 = vmax.f32 %v1993_v35, 0.0  ;;  %v10273_v38 = vpop.f32.mrb[9].mxu0 }
 0x455   : > { %v1996_v39 = vpop.f32.mrb[10].mxu0 }
 0x456   : > { %v2309_v61 = vcombine.high %v2300_v37, %v2300_v37  ;;  %v2316_v40 = vrot.slane %v2300_v37, %v11264_v27  ;;  %v10274_v41 = vpop.f32.mrb[11].mxu0 }
 0x458   : > { %v2323_v42 = vrot.slane %v2309_v61, %v11264_v27  ;;  %v2324_v43 = vcombine.high %v2316_v40, %v2316_v40  ;;  %v2332_v44 = vrot.slane %v2316_v40, %v11264_v27 }
 0x45a   : > { %v2325_v45 = vcombine.high %v2323_v42, %v2323_v42  ;;  %v2339_v46 = vrot.slane %v2323_v42, %v11264_v27  ;;  %v2346_v6 = vrot.slane %v2324_v43, %v11264_v27  ;;  %v2354_v47 = vcombine.high %v2332_v44, %v2332_v44  ;;  %2366 = vst.msk [vmem:[#allocation4] sm:$0x1] %vm1874_vm8, %v2332_v44  ;;  %v2036_v48 = vpop.f32.mrb[8].mxu1 }
 0x45b   : > { %v2301_v52 = vmax.f32 %v2036_v48, 0.0  ;;  %v10283_v53 = vpop.f32.mrb[9].mxu1 }
 0x45c   : > { %v2353_v49 = vrot.slane %v2325_v45, %v11264_v27  ;;  %v2355_v50 = vcombine.high %v2339_v46, %v2339_v46  ;;  %v2356_v51 = vcombine.high %v2346_v6, %v2346_v6  ;;  %2367 = vst.msk [vmem:[#allocation4 + $0x8] sm:$0x1] %vm1874_vm8, %v2346_v6  ;;  %2368 = vst.msk [vmem:[#allocation4 + $0x10] sm:$0x1] %vm1874_vm8, %v2354_v47  ;;  %v2039_v54 = vpop.f32.mrb[10].mxu1 }
 0x45d   : > { %2370 = vst.msk [vmem:[#allocation4 + $0x20] sm:$0x1] %vm1874_vm8, %v2339_v46  ;;  %v2375_v56 = vcombine.high %v2301_v52, %v2301_v52  ;;  %v2382_v57 = vrot.slane %v2301_v52, %v11264_v27  ;;  %v10284_v58 = vpop.f32.mrb[11].mxu1 }
 0x45e   : > { %v2357_v55 = vcombine.high %v2353_v49, %v2353_v49  ;;  %2369 = vst.msk [vmem:[#allocation4 + $0x18] sm:$0x1] %vm1874_vm8, %v2356_v51  ;;  %2371 = vst.msk [vmem:[#allocation4 + $0x28] sm:$0x1] %vm1874_vm8, %v2353_v49 }
 0x45f   : > { %2372 = vst.msk [vmem:[#allocation4 + $0x30] sm:$0x1] %vm1874_vm8, %v2355_v50  ;;  %v2389_v59 = vrot.slane %v2375_v56, %v11264_v27  ;;  %v2390_v60 = vcombine.high %v2382_v57, %v2382_v57  ;;  %v2398_v62 = vrot.slane %v2382_v57, %v11264_v27 }
 0x460   : > { %2373 = vst.msk [vmem:[#allocation4 + $0x38] sm:$0x1] %vm1874_vm8, %v2357_v55 }
 0x461   : > { %v2391_v63 = vcombine.high %v2389_v59, %v2389_v59  ;;  %v2405_v0 = vrot.slane %v2389_v59, %v11264_v27  ;;  %v2412_v2 = vrot.slane %v2390_v60, %v11264_v27  ;;  %v2420_v3 = vcombine.high %v2398_v62, %v2398_v62  ;;  %2432 = vst.msk [vmem:[#allocation4 + $0x1] sm:$0x1] %vm1874_vm8, %v2398_v62 }
 0x463   : > { %v2419_v36 = vrot.slane %v2391_v63, %v11264_v27  ;;  %v2421_v5 = vcombine.high %v2405_v0, %v2405_v0  ;;  %v2422_v7 = vcombine.high %v2412_v2, %v2412_v2  ;;  %2433 = vst.msk [vmem:[#allocation4 + $0x9] sm:$0x1] %vm1874_vm8, %v2412_v2  ;;  %2434 = vst.msk [vmem:[#allocation4 + $0x11] sm:$0x1] %vm1874_vm8, %v2420_v3 }
 0x464   : > { %2436 = vst.msk [vmem:[#allocation4 + $0x21] sm:$0x1] %vm1874_vm8, %v2405_v0 }
 0x465   : > { %v2423_v8 = vcombine.high %v2419_v36, %v2419_v36  ;;  %2435 = vst.msk [vmem:[#allocation4 + $0x19] sm:$0x1] %vm1874_vm8, %v2422_v7  ;;  %2437 = vst.msk [vmem:[#allocation4 + $0x29] sm:$0x1] %vm1874_vm8, %v2419_v36 }
 0x466   : > { %2438 = vst.msk [vmem:[#allocation4 + $0x31] sm:$0x1] %vm1874_vm8, %v2421_v5 }
 0x467   : > { %2439 = vst.msk [vmem:[#allocation4 + $0x39] sm:$0x1] %vm1874_vm8, %v2423_v8 }
 0x473   : > { %v2079_v9 = vpop.f32.mrb[12].mxu0 }
 0x474   : > { %v2302_v10 = vmax.f32 %v2079_v9, 0.0  ;;  %v10293_v11 = vpop.f32.mrb[13].mxu0 }
 0x475   : > { %v2082_v12 = vpop.f32.mrb[14].mxu0 }
 0x476   : > { %v2441_v13 = vcombine.high %v2302_v10, %v2302_v10  ;;  %v2448_v14 = vrot.slane %v2302_v10, %v11264_v27  ;;  %v10294_v15 = vpop.f32.mrb[15].mxu0 }
 0x478   : > { %v2455_v16 = vrot.slane %v2441_v13, %v11264_v27  ;;  %v2456_v17 = vcombine.high %v2448_v14, %v2448_v14  ;;  %v2464_v18 = vrot.slane %v2448_v14, %v11264_v27 }
 0x47a   : > { %v2457_v4 = vcombine.high %v2455_v16, %v2455_v16  ;;  %v2471_v19 = vrot.slane %v2455_v16, %v11264_v27  ;;  %v2478_v20 = vrot.slane %v2456_v17, %v11264_v27  ;;  %v2486_v21 = vcombine.high %v2464_v18, %v2464_v18  ;;  %2498 = vst.msk [vmem:[#allocation4 + $0x2] sm:$0x1] %vm1874_vm8, %v2464_v18 }
 0x47c   : > { %v2485_v22 = vrot.slane %v2457_v4, %v11264_v27  ;;  %v2487_v23 = vcombine.high %v2471_v19, %v2471_v19  ;;  %v2488_v24 = vcombine.high %v2478_v20, %v2478_v20  ;;  %2499 = vst.msk [vmem:[#allocation4 + $0xa] sm:$0x1] %vm1874_vm8, %v2478_v20  ;;  %2500 = vst.msk [vmem:[#allocation4 + $0x12] sm:$0x1] %vm1874_vm8, %v2486_v21  ;;  %v2122_v25 = vpop.f32.mrb[12].mxu1 }
 0x47d   : > { %2502 = vst.msk [vmem:[#allocation4 + $0x22] sm:$0x1] %vm1874_vm8, %v2471_v19  ;;  %v2303_v28 = vmax.f32 %v2122_v25, 0.0  ;;  %v10303_v29 = vpop.f32.mrb[13].mxu1 }
 0x47e   : > { %v2489_v26 = vcombine.high %v2485_v22, %v2485_v22  ;;  %2501 = vst.msk [vmem:[#allocation4 + $0x1a] sm:$0x1] %vm1874_vm8, %v2488_v24  ;;  %2503 = vst.msk [vmem:[#allocation4 + $0x2a] sm:$0x1] %vm1874_vm8, %v2485_v22  ;;  %v2125_v30 = vpop.f32.mrb[14].mxu1 }
 0x47f   : > { %2504 = vst.msk [vmem:[#allocation4 + $0x32] sm:$0x1] %vm1874_vm8, %v2487_v23  ;;  %v2507_v31 = vcombine.high %v2303_v28, %v2303_v28  ;;  %v2514_v32 = vrot.slane %v2303_v28, %v11264_v27  ;;  %v10304_v33 = vpop.f32.mrb[15].mxu1 }
 0x480   : > { %2505 = vst.msk [vmem:[#allocation4 + $0x3a] sm:$0x1] %vm1874_vm8, %v2489_v26 }
 0x481   : > { %v2521_v34 = vrot.slane %v2507_v31, %v11264_v27  ;;  %v2522_v35 = vcombine.high %v2514_v32, %v2514_v32  ;;  %v2530_v37 = vrot.slane %v2514_v32, %v11264_v27 }
 0x483   : > { %v2165_v38 = vpop.f32.mrb[16].mxu0  ;;  %v2523_v39 = vcombine.high %v2521_v34, %v2521_v34  ;;  %v2537_v61 = vrot.slane %v2521_v34, %v11264_v27  ;;  %v2544_v40 = vrot.slane %v2522_v35, %v11264_v27  ;;  %v2552_v41 = vcombine.high %v2530_v37, %v2530_v37  ;;  %2564 = vst.msk [vmem:[#allocation4 + $0x3] sm:$0x1] %vm1874_vm8, %v2530_v37 }
 0x484   : > { %v10313_v42 = vpop.f32.mrb[17].mxu0  ;;  %v2304_v43 = vmax.f32 %v2165_v38, 0.0 }
 0x485   : > { %v2168_v44 = vpop.f32.mrb[18].mxu0  ;;  %v2551_v45 = vrot.slane %v2523_v39, %v11264_v27  ;;  %v2553_v46 = vcombine.high %v2537_v61, %v2537_v61  ;;  %v2554_v6 = vcombine.high %v2544_v40, %v2544_v40  ;;  %2565 = vst.msk [vmem:[#allocation4 + $0xb] sm:$0x1] %vm1874_vm8, %v2544_v40  ;;  %2566 = vst.msk [vmem:[#allocation4 + $0x13] sm:$0x1] %vm1874_vm8, %v2552_v41 }
 0x486   : > { %2568 = vst.msk [vmem:[#allocation4 + $0x23] sm:$0x1] %vm1874_vm8, %v2537_v61  ;;  %v10314_v47 = vpop.f32.mrb[19].mxu0  ;;  %v2573_v48 = vcombine.high %v2304_v43, %v2304_v43  ;;  %v2580_v49 = vrot.slane %v2304_v43, %v11264_v27 }
 0x487   : > { %v2555_v50 = vcombine.high %v2551_v45, %v2551_v45  ;;  %2567 = vst.msk [vmem:[#allocation4 + $0x1b] sm:$0x1] %vm1874_vm8, %v2554_v6  ;;  %2569 = vst.msk [vmem:[#allocation4 + $0x2b] sm:$0x1] %vm1874_vm8, %v2551_v45 }
 0x488   : > { %2570 = vst.msk [vmem:[#allocation4 + $0x33] sm:$0x1] %vm1874_vm8, %v2553_v46  ;;  %v2587_v51 = vrot.slane %v2573_v48, %v11264_v27  ;;  %v2588_v52 = vcombine.high %v2580_v49, %v2580_v49  ;;  %v2596_v53 = vrot.slane %v2580_v49, %v11264_v27 }
 0x489   : > { %2571 = vst.msk [vmem:[#allocation4 + $0x3b] sm:$0x1] %vm1874_vm8, %v2555_v50 }
 0x48a   : > { %v2589_v54 = vcombine.high %v2587_v51, %v2587_v51  ;;  %v2603_v55 = vrot.slane %v2587_v51, %v11264_v27  ;;  %v2610_v56 = vrot.slane %v2588_v52, %v11264_v27  ;;  %v2618_v57 = vcombine.high %v2596_v53, %v2596_v53  ;;  %2630 = vst.msk [vmem:[#allocation4 + $0x4] sm:$0x1] %vm1874_vm8, %v2596_v53  ;;  %v2208_v58 = vpop.f32.mrb[16].mxu1 }
 0x48b   : > { %v2305_v59 = vmax.f32 %v2208_v58, 0.0  ;;  %v10323_v60 = vpop.f32.mrb[17].mxu1 }
 0x48c   : > { %v2617_v62 = vrot.slane %v2589_v54, %v11264_v27  ;;  %v2619_v63 = vcombine.high %v2603_v55, %v2603_v55  ;;  %v2620_v0 = vcombine.high %v2610_v56, %v2610_v56  ;;  %2631 = vst.msk [vmem:[#allocation4 + $0xc] sm:$0x1] %vm1874_vm8, %v2610_v56  ;;  %2632 = vst.msk [vmem:[#allocation4 + $0x14] sm:$0x1] %vm1874_vm8, %v2618_v57  ;;  %v2211_v2 = vpop.f32.mrb[18].mxu1 }
 0x48d   : > { %2634 = vst.msk [vmem:[#allocation4 + $0x24] sm:$0x1] %vm1874_vm8, %v2603_v55  ;;  %v2639_v3 = vcombine.high %v2305_v59, %v2305_v59  ;;  %v2646_v36 = vrot.slane %v2305_v59, %v11264_v27  ;;  %v10324_v5 = vpop.f32.mrb[19].mxu1 }
 0x48e   : > { %v2621_v7 = vcombine.high %v2617_v62, %v2617_v62  ;;  %2633 = vst.msk [vmem:[#allocation4 + $0x1c] sm:$0x1] %vm1874_vm8, %v2620_v0  ;;  %2635 = vst.msk [vmem:[#allocation4 + $0x2c] sm:$0x1] %vm1874_vm8, %v2617_v62  ;;  %v11790_v0 = vld [vmem:[%s12480_s8] sm:$0xff] }
 0x48f   : > { %2636 = vst.msk [vmem:[#allocation4 + $0x34] sm:$0x1] %vm1874_vm8, %v2619_v63  ;;  %v2653_v8 = vrot.slane %v2639_v3, %v11264_v27  ;;  %v2654_v9 = vcombine.high %v2646_v36, %v2646_v36  ;;  %v2662_v10 = vrot.slane %v2646_v36, %v11264_v27  ;;  %v11738_v63 = vld [vmem:[%s12478_s6] sm:$0xff] }
 0x490   : > { %2637 = vst.msk [vmem:[#allocation4 + $0x3c] sm:$0x1] %vm1874_vm8, %v2621_v7 }
 0x491   : > { %v2655_v11 = vcombine.high %v2653_v8, %v2653_v8  ;;  %v2669_v12 = vrot.slane %v2653_v8, %v11264_v27  ;;  %v2676_v13 = vrot.slane %v2654_v9, %v11264_v27  ;;  %v2684_v14 = vcombine.high %v2662_v10, %v2662_v10  ;;  %2696 = vst.msk [vmem:[#allocation4 + $0x5] sm:$0x1] %vm1874_vm8, %v2662_v10 }
 0x493   : > { %v2683_v15 = vrot.slane %v2655_v11, %v11264_v27  ;;  %v2685_v16 = vcombine.high %v2669_v12, %v2669_v12  ;;  %v2686_v17 = vcombine.high %v2676_v13, %v2676_v13  ;;  %2697 = vst.msk [vmem:[#allocation4 + $0xd] sm:$0x1] %vm1874_vm8, %v2676_v13  ;;  %2698 = vst.msk [vmem:[#allocation4 + $0x15] sm:$0x1] %vm1874_vm8, %v2684_v14 }
 0x494   : > { %2700 = vst.msk [vmem:[#allocation4 + $0x25] sm:$0x1] %vm1874_vm8, %v2669_v12 }
 0x495   : > { %v2687_v18 = vcombine.high %v2683_v15, %v2683_v15  ;;  %2699 = vst.msk [vmem:[#allocation4 + $0x1d] sm:$0x1] %vm1874_vm8, %v2686_v17  ;;  %2701 = vst.msk [vmem:[#allocation4 + $0x2d] sm:$0x1] %vm1874_vm8, %v2683_v15 }
 0x496   : > { %2702 = vst.msk [vmem:[#allocation4 + $0x35] sm:$0x1] %vm1874_vm8, %v2685_v16 }
 0x497   : > { %2703 = vst.msk [vmem:[#allocation4 + $0x3d] sm:$0x1] %vm1874_vm8, %v2687_v18 }
 0x49b   : > { %v2251_v4 = vpop.f32.mrb[20].mxu0 }
 0x49c   : > { %v2306_v19 = vmax.f32 %v2251_v4, 0.0  ;;  %v10333_v20 = vpop.f32.mrb[21].mxu0 }
 0x49d   : > { %v2254_v21 = vpop.f32.mrb[22].mxu0 }
 0x49e   : > { %v2705_v22 = vcombine.high %v2306_v19, %v2306_v19  ;;  %v2712_v23 = vrot.slane %v2306_v19, %v11264_v27  ;;  %v10334_v24 = vpop.f32.mrb[23].mxu0  ;;  %v2294_v25 = vpop.f32.mrb[20].mxu1 }
 0x49f   : > { %v2307_v30 = vmax.f32 %v2294_v25, 0.0  ;;  %v10343_v31 = vpop.f32.mrb[21].mxu1 }
 0x4a0   : > { %v2719_v26 = vrot.slane %v2705_v22, %v11264_v27  ;;  %v2720_v28 = vcombine.high %v2712_v23, %v2712_v23  ;;  %v2728_v29 = vrot.slane %v2712_v23, %v11264_v27  ;;  %v2297_v32 = vpop.f32.mrb[22].mxu1 }
 0x4a1   : > { %v10344_v38 = vpop.f32.mrb[23].mxu1  ;;  %v2771_v39 = vcombine.high %v2307_v30, %v2307_v30  ;;  %v2778_v61 = vrot.slane %v2307_v30, %v11264_v27 }
 0x4a2   : > { %v2721_v33 = vcombine.high %v2719_v26, %v2719_v26  ;;  %v2735_v34 = vrot.slane %v2719_v26, %v11264_v27  ;;  %v2742_v35 = vrot.slane %v2720_v28, %v11264_v27  ;;  %v2750_v37 = vcombine.high %v2728_v29, %v2728_v29  ;;  %2762 = vst.msk [vmem:[#allocation4 + $0x6] sm:$0x1] %vm1874_vm8, %v2728_v29 }
 0x4a3   : > { %v2785_v43 = vrot.slane %v2771_v39, %v11264_v27  ;;  %v2786_v44 = vcombine.high %v2778_v61, %v2778_v61  ;;  %v2794_v45 = vrot.slane %v2778_v61, %v11264_v27 }
 0x4a4   : > { %v2749_v40 = vrot.slane %v2721_v33, %v11264_v27  ;;  %v2751_v41 = vcombine.high %v2735_v34, %v2735_v34  ;;  %v2752_v42 = vcombine.high %v2742_v35, %v2742_v35  ;;  %2763 = vst.msk [vmem:[#allocation4 + $0xe] sm:$0x1] %vm1874_vm8, %v2742_v35  ;;  %2764 = vst.msk [vmem:[#allocation4 + $0x16] sm:$0x1] %vm1874_vm8, %v2750_v37 }
 0x4a5   : > { %2766 = vst.msk [vmem:[#allocation4 + $0x26] sm:$0x1] %vm1874_vm8, %v2735_v34  ;;  %v2787_v6 = vcombine.high %v2785_v43, %v2785_v43  ;;  %v2801_v47 = vrot.slane %v2785_v43, %v11264_v27  ;;  %v2808_v48 = vrot.slane %v2786_v44, %v11264_v27  ;;  %v2816_v49 = vcombine.high %v2794_v45, %v2794_v45  ;;  %v12048_v44 = vld [vmem:[%s12476_s4] sm:$0xff] }
 0x4a6   : > { %v2753_v46 = vcombine.high %v2749_v40, %v2749_v40  ;;  %2765 = vst.msk [vmem:[#allocation4 + $0x1e] sm:$0x1] %vm1874_vm8, %v2752_v42  ;;  %2767 = vst.msk [vmem:[#allocation4 + $0x2e] sm:$0x1] %vm1874_vm8, %v2749_v40  ;;  %v11874_v40 = vld [vmem:[%s12479_s7] sm:$0xff] }
 0x4a7   : > { %2768 = vst.msk [vmem:[#allocation4 + $0x36] sm:$0x1] %vm1874_vm8, %v2751_v41  ;;  %2828 = vst.msk [vmem:[#allocation4 + $0x7] sm:$0x1] %vm1874_vm8, %v2794_v45  ;;  %v2815_v50 = vrot.slane %v2787_v6, %v11264_v27  ;;  %v2817_v51 = vcombine.high %v2801_v47, %v2801_v47  ;;  %v2818_v52 = vcombine.high %v2808_v48, %v2808_v48  ;;  %v11700_v27 = vld [vmem:[%s12477_s5] sm:$0xff] }
 0x4a8   : > { %2769 = vst.msk [vmem:[#allocation4 + $0x3e] sm:$0x1] %vm1874_vm8, %v2753_v46  ;;  %2829 = vst.msk [vmem:[#allocation4 + $0xf] sm:$0x1] %vm1874_vm8, %v2808_v48  ;;  %v12053_v46 = vld [vmem:[%s12476_s4 + $0x8] sm:$0xff] }
 0x4a9   : > { %2830 = vst.msk [vmem:[#allocation4 + $0x17] sm:$0x1] %vm1874_vm8, %v2816_v49  ;;  %2832 = vst.msk [vmem:[#allocation4 + $0x27] sm:$0x1] %vm1874_vm8, %v2801_v47  ;;  %v2819_v53 = vcombine.high %v2815_v50, %v2815_v50  ;;  %v12061_v49 = vld [vmem:[%s12476_s4 + $0x10] sm:$0xff] }
 0x4aa   : > { %2831 = vst.msk [vmem:[#allocation4 + $0x1f] sm:$0x1] %vm1874_vm8, %v2818_v52  ;;  %2833 = vst.msk [vmem:[#allocation4 + $0x2f] sm:$0x1] %vm1874_vm8, %v2815_v50 }
 0x4ab   : > { %2834 = vst.msk [vmem:[#allocation4 + $0x37] sm:$0x1] %vm1874_vm8, %v2817_v51  ;;  %2835 = vst.msk [vmem:[#allocation4 + $0x3f] sm:$0x1] %vm1874_vm8, %v2819_v53  ;;  %v12070_v53 = vld [vmem:[%s12476_s4 + $0x18] sm:$0xff] }
 0x4ae   : > { %v2836_v54 = vld [vmem:[#allocation4] sm:$0xff] }
 0x4af   : > { %10346 = vmatpush3.msra.mxu0 %v2836_v54  ;;  %v2837_v55 = vld [vmem:[#allocation4 + $0x8] sm:$0xff] }
 0x4b0   : > { %10348 = vmatmul.mubr.msk.f32.vlgmr.msra.gmra.mrb[24].mxu0 %vm2848_vm12, %v11700_v27  ;;  %10355 = vmatprep.subr.mxu0 %v11016_v1  ;;  %v2838_v56 = vld [vmem:[#allocation4 + $0x10] sm:$0xff]  ;;  %v2840_v58 = vld [vmem:[#allocation4 + $0x20] sm:$0xff] }
 0x4b1   : > { %10351 = vmatpush3.msra.mxu1 %v2837_v55  ;;  %10356 = vmatpush3.msra.mxu0 %v2838_v56  ;;  %v2839_v57 = vld [vmem:[#allocation4 + $0x18] sm:$0xff]  ;;  %v2841_v59 = vld [vmem:[#allocation4 + $0x28] sm:$0xff] }
 0x4b2   : > { %10353 = vmatmul.mubr.msk.f32.vlgmr.msra.gmra.mrb[24].mxu1 %vm2848_vm12, %v11700_v27  ;;  %10360 = vmatprep.subr.mxu1 %v11016_v1  ;;  %v2842_v60 = vld [vmem:[#allocation4 + $0x30] sm:$0xff]  ;;  %v2843_v62 = vld [vmem:[#allocation4 + $0x38] sm:$0xff] }
 0x4b3   : > { %10357 = vmatprep.mubr.msk.f32.mxu0 %vm11015_vm4, %v11016_v1  ;;  %10361 = vmatpush3.msra.mxu1 %v2839_v57 }
 0x4b4   : > { %10365 = vmatprep.subr.mxu0 %v11016_v1  ;;  %10358 = vmatmul.mubr.msk.f32.vlgmr.msra.gmra.mrb[26].mxu0 %vm2848_vm12, %v11700_v27 }
 0x4b5   : > { %10366 = vmatpush3.msra.mxu0 %v2840_v58  ;;  %10362 = vmatprep.mubr.msk.f32.mxu1 %vm11015_vm4, %v11016_v1 }
 0x4b6   : > { %10370 = vmatprep.subr.mxu1 %v11016_v1  ;;  %10363 = vmatmul.mubr.msk.f32.vlgmr.msra.gmra.mrb[26].mxu1 %vm2848_vm12, %v11700_v27 }
 0x4b7   : > { %10371 = vmatpush3.msra.mxu1 %v2841_v59  ;;  %10367 = vmatprep.mubr.msk.f32.mxu0 %vm11015_vm4, %v11016_v1 }
 0x4b8   : > { %10375 = vmatprep.subr.mxu0 %v11016_v1  ;;  %10368 = vmatmul.mubr.msk.f32.vlgmr.msra.gmra.mrb[28].mxu0 %vm2848_vm12, %v11700_v27 }
 0x4b9   : > { %10376 = vmatpush3.msra.mxu0 %v2842_v60  ;;  %10372 = vmatprep.mubr.msk.f32.mxu1 %vm11015_vm4, %v11016_v1 }
 0x4ba   : > { %10380 = vmatprep.subr.mxu1 %v11016_v1  ;;  %10373 = vmatmul.mubr.msk.f32.vlgmr.msra.gmra.mrb[28].mxu1 %vm2848_vm12, %v11700_v27 }
 0x4bb   : > { %10381 = vmatpush3.msra.mxu1 %v2843_v62  ;;  %10377 = vmatprep.mubr.msk.f32.mxu0 %vm11015_vm4, %v11016_v1 }
 0x4bc   : > { %10385 = vmatprep.subr.mxu0 %v11016_v1  ;;  %10378 = vmatmul.mubr.msk.f32.vlgmr.msra.gmra.mrb[30].mxu0 %vm2848_vm12, %v11700_v27 }
 0x4bd   : > { %10386 = vmatpush3.msra.mxu0 %v2836_v54  ;;  %10382 = vmatprep.mubr.msk.f32.mxu1 %vm11015_vm4, %v11016_v1 }
 0x4be   : > { %10390 = vmatprep.subr.mxu1 %v11016_v1  ;;  %10383 = vmatmul.mubr.msk.f32.vlgmr.msra.gmra.mrb[30].mxu1 %vm2848_vm12, %v11700_v27 }
 0x4bf   : > { %10391 = vmatpush3.msra.mxu1 %v2837_v55  ;;  %10387 = vmatprep.mubr.msk.f32.mxu0 %vm11015_vm4, %v11016_v1 }
 0x4c0   : > { %10395 = vmatprep.subr.mxu0 %v11016_v1  ;;  %10388 = vmatmul.mubr.msk.f32.vlgmr.msra.gmra.mrb[32].mxu0 %vm2848_vm12, %v11738_v63 }
 0x4c1   : > { %10396 = vmatpush3.msra.mxu0 %v2838_v56  ;;  %10392 = vmatprep.mubr.msk.f32.mxu1 %vm11015_vm4, %v11016_v1 }
 0x4c2   : > { %10400 = vmatprep.subr.mxu1 %v11016_v1  ;;  %10393 = vmatmul.mubr.msk.f32.vlgmr.msra.gmra.mrb[32].mxu1 %vm2848_vm12, %v11738_v63 }
 0x4c3   : > { %10401 = vmatpush3.msra.mxu1 %v2839_v57  ;;  %10397 = vmatprep.mubr.msk.f32.mxu0 %vm11015_vm4, %v11016_v1  ;;  %v12084_v57 = vld [vmem:[%s12476_s4 + $0x20] sm:$0xff] }
 0x4c4   : > { %10405 = vmatprep.subr.mxu0 %v11016_v1  ;;  %10398 = vmatmul.mubr.msk.f32.vlgmr.msra.gmra.mrb[34].mxu0 %vm2848_vm12, %v11738_v63 }
 0x4c5   : > { %10406 = vmatpush3.msra.mxu0 %v2840_v58  ;;  %10402 = vmatprep.mubr.msk.f32.mxu1 %vm11015_vm4, %v11016_v1 }
 0x4c6   : > { %10410 = vmatprep.subr.mxu1 %v11016_v1  ;;  %10403 = vmatmul.mubr.msk.f32.vlgmr.msra.gmra.mrb[34].mxu1 %vm2848_vm12, %v11738_v63 }
 0x4c7   : > { %10411 = vmatpush3.msra.mxu1 %v2841_v59  ;;  %10407 = vmatprep.mubr.msk.f32.mxu0 %vm11015_vm4, %v11016_v1 }
 0x4c8   : > { %10415 = vmatprep.subr.mxu0 %v11016_v1  ;;  %10408 = vmatmul.mubr.msk.f32.vlgmr.msra.gmra.mrb[36].mxu0 %vm2848_vm12, %v11738_v63 }
 0x4c9   : > { %10416 = vmatpush3.msra.mxu0 %v2842_v60  ;;  %10412 = vmatprep.mubr.msk.f32.mxu1 %vm11015_vm4, %v11016_v1 }
 0x4ca   : > { %10420 = vmatprep.subr.mxu1 %v11016_v1  ;;  %10413 = vmatmul.mubr.msk.f32.vlgmr.msra.gmra.mrb[36].mxu1 %vm2848_vm12, %v11738_v63 }
 0x4cb   : > { %10421 = vmatpush3.msra.mxu1 %v2843_v62  ;;  %10417 = vmatprep.mubr.msk.f32.mxu0 %vm11015_vm4, %v11016_v1  ;;  %v12098_v62 = vld [vmem:[%s12476_s4 + $0x28] sm:$0xff] }
 0x4cc   : > { %10418 = vmatmul.mubr.msk.f32.vlgmr.msra.gmra.mrb[38].mxu0 %vm2848_vm12, %v11738_v63  ;;  %10422 = vmatprep.mubr.msk.f32.mxu1 %vm11015_vm4, %v11016_v1 }
 0x4cd   : > { %10425 = vmatprep.subr.mxu0 %v11016_v1  ;;  %10427 = vmatprep.mubr.msk.f32.mxu0 %vm11015_vm4, %v11016_v1 }
 0x4ce   : > { %10423 = vmatmul.mubr.msk.f32.vlgmr.msra.gmra.mrb[38].mxu1 %vm2848_vm12, %v11738_v63  ;;  %10430 = vmatprep.subr.mxu1 %v11016_v1 }
 0x4cf   : > { %10432 = vmatprep.mubr.msk.f32.mxu1 %vm11015_vm4, %v11016_v1  ;;  %10426 = vmatpush3.msra.mxu0 %v11790_v0 }
 0x4d0   : > { %10431 = vmatpush3.msra.mxu1 %v11790_v0  ;;  %10435 = vmatprep.subr.mxu0 %v11016_v1 }
 0x4d1   : > { %10440 = vmatprep.subr.mxu1 %v11016_v1 }
 0x583   : > { %v11796_v2 = vpop.f32.mrb[24].mxu0 }
 0x584   : > { %v10349_v3 = vpop.f32.mrb[25].mxu0 }
 0x585   : > { %v11798_v36 = vpop.f32.mrb[24].mxu1 }
 0x586   : > { %v10354_v5 = vpop.f32.mrb[25].mxu1 }
 0x587   : > { %v11800_v7 = vpop.f32.mrb[26].mxu0  ;;  %v12112_v5 = vld [vmem:[%s12476_s4 + $0x30] sm:$0xff] }
 0x588   : > { %v10359_v8 = vpop.f32.mrb[27].mxu0 }
 0x589   : > { %v11802_v9 = vpop.f32.mrb[26].mxu1 }
 0x58a   : > { %v10364_v10 = vpop.f32.mrb[27].mxu1 }
 0x58b   : > { %v11804_v11 = vpop.f32.mrb[28].mxu0  ;;  %v12126_v10 = vld [vmem:[%s12476_s4 + $0x38] sm:$0xff] }
 0x58c   : > { %v10369_v12 = vpop.f32.mrb[29].mxu0 }
 0x58d   : > { %v11806_v13 = vpop.f32.mrb[28].mxu1 }
 0x58e   : > { %v10374_v14 = vpop.f32.mrb[29].mxu1 }
 0x58f   : > { %v11808_v15 = vpop.f32.mrb[30].mxu0 }
 0x590   : > { %v10379_v16 = vpop.f32.mrb[31].mxu0 }
 0x591   : > { %v11810_v17 = vpop.f32.mrb[30].mxu1 }
 0x592   : > { %v10384_v18 = vpop.f32.mrb[31].mxu1 }
 0x593   : > { %v11812_v4 = vpop.f32.mrb[32].mxu0 }
 0x594   : > { %v3975_v19 = vsub.f32 0.0, %v11812_v4  ;;  %v10389_v20 = vpop.f32.mrb[33].mxu0 }
 0x595   : > { %v11815_v21 = vpop.f32.mrb[32].mxu1 }
 0x596   : > { %v3976_v22 = vsub.f32 0.0, %v11815_v21  ;;  %10428 = vmatmul.mubr.msk.f32.vlgmr.msra.gmra.mrb[40].mxu0 %vm2848_vm12, %v3975_v19  ;;  %v10394_v23 = vpop.f32.mrb[33].mxu1 }
 0x597   : > { %v11821_v24 = vpop.f32.mrb[34].mxu0  ;;  %10436 = vmatpush3.msra.mxu0 %v11790_v0  ;;  %10437 = vmatprep.mubr.msk.f32.mxu0 %vm11015_vm4, %v11016_v1 }
 0x598   : > { %v3977_v25 = vsub.f32 0.0, %v11821_v24  ;;  %10433 = vmatmul.mubr.msk.f32.vlgmr.msra.gmra.mrb[40].mxu1 %vm2848_vm12, %v3976_v22  ;;  %v10399_v26 = vpop.f32.mrb[35].mxu0  ;;  %10445 = vmatprep.subr.mxu0 %v11016_v1 }
 0x599   : > { %v11831_v28 = vpop.f32.mrb[34].mxu1  ;;  %10441 = vmatpush3.msra.mxu1 %v11790_v0  ;;  %10442 = vmatprep.mubr.msk.f32.mxu1 %vm11015_vm4, %v11016_v1 }
 0x59a   : > { %v3978_v29 = vsub.f32 0.0, %v11831_v28  ;;  %10438 = vmatmul.mubr.msk.f32.vlgmr.msra.gmra.mrb[42].mxu0 %vm2848_vm12, %v3977_v25  ;;  %v10404_v30 = vpop.f32.mrb[35].mxu1  ;;  %10450 = vmatprep.subr.mxu1 %v11016_v1 }
 0x59b   : > { %v11841_v31 = vpop.f32.mrb[36].mxu0  ;;  %10446 = vmatpush3.msra.mxu0 %v11790_v0  ;;  %10447 = vmatprep.mubr.msk.f32.mxu0 %vm11015_vm4, %v11016_v1 }
 0x59c   : > { %v3979_v32 = vsub.f32 0.0, %v11841_v31  ;;  %10443 = vmatmul.mubr.msk.f32.vlgmr.msra.gmra.mrb[42].mxu1 %vm2848_vm12, %v3978_v29  ;;  %v10409_v33 = vpop.f32.mrb[37].mxu0  ;;  %10455 = vmatprep.subr.mxu0 %v11016_v1 }
 0x59d   : > { %v11851_v34 = vpop.f32.mrb[36].mxu1  ;;  %10451 = vmatpush3.msra.mxu1 %v11790_v0  ;;  %10452 = vmatprep.mubr.msk.f32.mxu1 %vm11015_vm4, %v11016_v1 }
 0x59e   : > { %v3980_v35 = vsub.f32 0.0, %v11851_v34  ;;  %10448 = vmatmul.mubr.msk.f32.vlgmr.msra.gmra.mrb[44].mxu0 %vm2848_vm12, %v3979_v32  ;;  %v10414_v37 = vpop.f32.mrb[37].mxu1  ;;  %10460 = vmatprep.subr.mxu1 %v11016_v1 }
 0x59f   : > { %v11861_v38 = vpop.f32.mrb[38].mxu0  ;;  %10456 = vmatpush3.msra.mxu0 %v11790_v0  ;;  %10457 = vmatprep.mubr.msk.f32.mxu0 %vm11015_vm4, %v11016_v1 }
 0x5a0   : > { %v3981_v39 = vsub.f32 0.0, %v11861_v38  ;;  %10453 = vmatmul.mubr.msk.f32.vlgmr.msra.gmra.mrb[44].mxu1 %vm2848_vm12, %v3980_v35  ;;  %10465 = vmatprep.subr.mxu0 %v11016_v1  ;;  %v10419_v61 = vpop.f32.mrb[39].mxu0 }
 0x5a1   : > { %v11876_v41 = vpop.f32.mrb[38].mxu1  ;;  %10461 = vmatpush3.msra.mxu1 %v11790_v0  ;;  %10462 = vmatprep.mubr.msk.f32.mxu1 %vm11015_vm4, %v11016_v1 }
 0x5a2   : > { %v3982_v42 = vsub.f32 0.0, %v11876_v41  ;;  %10458 = vmatmul.mubr.msk.f32.vlgmr.msra.gmra.mrb[46].mxu0 %vm2848_vm12, %v3981_v39  ;;  %v10424_v43 = vpop.f32.mrb[39].mxu1  ;;  %10470 = vmatprep.subr.mxu1 %v11016_v1 }
 0x5a3   : > { %10466 = vmatpush3.msra.mxu0 %v11874_v40  ;;  %10467 = vmatprep.mubr.msk.f32.mxu0 %vm11015_vm4, %v11016_v1 }
 0x5a4   : > { %10463 = vmatmul.mubr.msk.f32.vlgmr.msra.gmra.mrb[46].mxu1 %vm2848_vm12, %v3982_v42  ;;  %10475 = vmatprep.subr.mxu0 %v11016_v1 }
 0x5a5   : > { %10471 = vmatpush3.msra.mxu1 %v11874_v40  ;;  %10472 = vmatprep.mubr.msk.f32.mxu1 %vm11015_vm4, %v11016_v1 }
 0x5a6   : > { %10468 = vmatmul.mubr.msk.f32.vlgmr.msra.gmra.mrb[40].mxu0 %vm2848_vm12, %v11796_v2  ;;  %10480 = vmatprep.subr.mxu1 %v11016_v1 }
 0x5a7   : > { %10476 = vmatpush3.msra.mxu0 %v11874_v40  ;;  %10477 = vmatprep.mubr.msk.f32.mxu0 %vm11015_vm4, %v11016_v1 }
 0x5a8   : > { %10473 = vmatmul.mubr.msk.f32.vlgmr.msra.gmra.mrb[40].mxu1 %vm2848_vm12, %v11798_v36  ;;  %10485 = vmatprep.subr.mxu0 %v11016_v1 }
 0x5a9   : > { %10481 = vmatpush3.msra.mxu1 %v11874_v40  ;;  %10482 = vmatprep.mubr.msk.f32.mxu1 %vm11015_vm4, %v11016_v1 }
 0x5aa   : > { %10478 = vmatmul.mubr.msk.f32.vlgmr.msra.gmra.mrb[42].mxu0 %vm2848_vm12, %v11800_v7  ;;  %10490 = vmatprep.subr.mxu1 %v11016_v1 }
 0x5ab   : > { %10486 = vmatpush3.msra.mxu0 %v11874_v40  ;;  %10487 = vmatprep.mubr.msk.f32.mxu0 %vm11015_vm4, %v11016_v1 }
 0x5ac   : > { %10483 = vmatmul.mubr.msk.f32.vlgmr.msra.gmra.mrb[42].mxu1 %vm2848_vm12, %v11802_v9  ;;  %10495 = vmatprep.subr.mxu0 %v11016_v1 }
 0x5ad   : > { %10491 = vmatpush3.msra.mxu1 %v11874_v40  ;;  %10492 = vmatprep.mubr.msk.f32.mxu1 %vm11015_vm4, %v11016_v1 }
 0x5ae   : > { %10488 = vmatmul.mubr.msk.f32.vlgmr.msra.gmra.mrb[44].mxu0 %vm2848_vm12, %v11804_v11  ;;  %10500 = vmatprep.subr.mxu1 %v11016_v1 }
 0x5af   : > { %10496 = vmatpush3.msra.mxu0 %v11874_v40  ;;  %10497 = vmatprep.mubr.msk.f32.mxu0 %vm11015_vm4, %v11016_v1 }
 0x5b0   : > { %10493 = vmatmul.mubr.msk.f32.vlgmr.msra.gmra.mrb[44].mxu1 %vm2848_vm12, %v11806_v13  ;;  %10505 = vmatprep.subr.mxu0 %v11016_v1 }
 0x5b1   : > { %10501 = vmatpush3.msra.mxu1 %v11874_v40  ;;  %10502 = vmatprep.mubr.msk.f32.mxu1 %vm11015_vm4, %v11016_v1 }
 0x5b2   : > { %10498 = vmatmul.mubr.msk.f32.vlgmr.msra.gmra.mrb[46].mxu0 %vm2848_vm12, %v11808_v15  ;;  %10510 = vmatprep.subr.mxu1 %v11016_v1 }
 0x5b3   : > { %10506 = vmatpush3.msra.mxu0 %v11874_v40  ;;  %10507 = vmatprep.mubr.msk.f32.mxu0 %vm11015_vm4, %v11016_v1 }
 0x5b4   : > { %10503 = vmatmul.mubr.msk.f32.vlgmr.msra.gmra.mrb[46].mxu1 %vm2848_vm12, %v11810_v17  ;;  %10515 = vmatprep.subr.mxu0 %v11016_v1 }
 0x5b5   : > { %10511 = vmatpush3.msra.mxu1 %v11874_v40  ;;  %10512 = vmatprep.mubr.msk.f32.mxu1 %vm11015_vm4, %v11016_v1 }
 0x5b6   : > { %10508 = vmatmul.mubr.msk.f32.vlgmr.msra.gmra.mrb[48].mxu0 %vm2848_vm12, %v3975_v19  ;;  %10520 = vmatprep.subr.mxu1 %v11016_v1 }
 0x5b7   : > { %10516 = vmatpush3.msra.mxu0 %v11874_v40  ;;  %10517 = vmatprep.mubr.msk.f32.mxu0 %vm11015_vm4, %v11016_v1 }
 0x5b8   : > { %10513 = vmatmul.mubr.msk.f32.vlgmr.msra.gmra.mrb[48].mxu1 %vm2848_vm12, %v3976_v22  ;;  %10525 = vmatprep.subr.mxu0 %v11016_v1 }
 0x5b9   : > { %10521 = vmatpush3.msra.mxu1 %v11874_v40  ;;  %10522 = vmatprep.mubr.msk.f32.mxu1 %vm11015_vm4, %v11016_v1 }
 0x5ba   : > { %10518 = vmatmul.mubr.msk.f32.vlgmr.msra.gmra.mrb[50].mxu0 %vm2848_vm12, %v3977_v25  ;;  %10530 = vmatprep.subr.mxu1 %v11016_v1 }
 0x5bb   : > { %10526 = vmatpush3.msra.mxu0 %v11874_v40  ;;  %10527 = vmatprep.mubr.msk.f32.mxu0 %vm11015_vm4, %v11016_v1 }
 0x5bc   : > { %10523 = vmatmul.mubr.msk.f32.vlgmr.msra.gmra.mrb[50].mxu1 %vm2848_vm12, %v3978_v29  ;;  %10535 = vmatprep.subr.mxu0 %v11016_v1 }
 0x5bd   : > { %10531 = vmatpush3.msra.mxu1 %v11874_v40  ;;  %10532 = vmatprep.mubr.msk.f32.mxu1 %vm11015_vm4, %v11016_v1 }
 0x5be   : > { %10528 = vmatmul.mubr.msk.f32.vlgmr.msra.gmra.mrb[52].mxu0 %vm2848_vm12, %v3979_v32  ;;  %10540 = vmatprep.subr.mxu1 %v11016_v1 }
 0x5bf   : > { %10536 = vmatpush3.msra.mxu0 %v11874_v40  ;;  %10537 = vmatprep.mubr.msk.f32.mxu0 %vm11015_vm4, %v11016_v1 }
 0x5c0   : > { %10533 = vmatmul.mubr.msk.f32.vlgmr.msra.gmra.mrb[52].mxu1 %vm2848_vm12, %v3980_v35  ;;  %10545 = vmatprep.subr.mxu0 %v11016_v1 }
 0x5c1   : > { %10541 = vmatpush3.msra.mxu1 %v11874_v40  ;;  %10542 = vmatprep.mubr.msk.f32.mxu1 %vm11015_vm4, %v11016_v1 }
 0x5c2   : > { %10538 = vmatmul.mubr.msk.f32.vlgmr.msra.gmra.mrb[54].mxu0 %vm2848_vm12, %v3981_v39  ;;  %10550 = vmatprep.subr.mxu1 %v11016_v1 }
 0x5c3   : > { %10546 = vmatpush3.msra.mxu0 %v11790_v0  ;;  %10547 = vmatprep.mubr.msk.f32.mxu0 %vm11015_vm4, %v11016_v1 }
 0x5c4   : > { %10543 = vmatmul.mubr.msk.f32.vlgmr.msra.gmra.mrb[54].mxu1 %vm2848_vm12, %v3982_v42  ;;  %10555 = vmatprep.subr.mxu0 %v11016_v1 }
 0x5c5   : > { %10551 = vmatpush3.msra.mxu1 %v11790_v0  ;;  %10552 = vmatprep.mubr.msk.f32.mxu1 %vm11015_vm4, %v11016_v1 }
 0x5c6   : > { %10548 = vmatmul.mubr.msk.f32.vlgmr.msra.gmra.mrb[56].mxu0 %vm2848_vm12, %v11796_v2  ;;  %10560 = vmatprep.subr.mxu1 %v11016_v1 }
 0x5c7   : > { %10556 = vmatpush3.msra.mxu0 %v11790_v0  ;;  %10557 = vmatprep.mubr.msk.f32.mxu0 %vm11015_vm4, %v11016_v1 }
 0x5c8   : > { %10553 = vmatmul.mubr.msk.f32.vlgmr.msra.gmra.mrb[56].mxu1 %vm2848_vm12, %v11798_v36  ;;  %10565 = vmatprep.subr.mxu0 %v11016_v1 }
 0x5c9   : > { %10561 = vmatpush3.msra.mxu1 %v11790_v0  ;;  %10562 = vmatprep.mubr.msk.f32.mxu1 %vm11015_vm4, %v11016_v1 }
 0x5ca   : > { %10558 = vmatmul.mubr.msk.f32.vlgmr.msra.gmra.mrb[58].mxu0 %vm2848_vm12, %v11800_v7  ;;  %10570 = vmatprep.subr.mxu1 %v11016_v1 }
 0x5cb   : > { %10566 = vmatpush3.msra.mxu0 %v11790_v0  ;;  %10567 = vmatprep.mubr.msk.f32.mxu0 %vm11015_vm4, %v11016_v1 }
 0x5cc   : > { %10563 = vmatmul.mubr.msk.f32.vlgmr.msra.gmra.mrb[58].mxu1 %vm2848_vm12, %v11802_v9  ;;  %10575 = vmatprep.subr.mxu0 %v11016_v1 }
 0x5cd   : > { %10571 = vmatpush3.msra.mxu1 %v11790_v0  ;;  %10572 = vmatprep.mubr.msk.f32.mxu1 %vm11015_vm4, %v11016_v1 }
 0x5ce   : > { %10568 = vmatmul.mubr.msk.f32.vlgmr.msra.gmra.mrb[60].mxu0 %vm2848_vm12, %v11804_v11  ;;  %10580 = vmatprep.subr.mxu1 %v11016_v1 }
 0x5cf   : > { %10576 = vmatpush3.msra.mxu0 %v11790_v0  ;;  %10577 = vmatprep.mubr.msk.f32.mxu0 %vm11015_vm4, %v11016_v1 }
 0x5d0   : > { %10573 = vmatmul.mubr.msk.f32.vlgmr.msra.gmra.mrb[60].mxu1 %vm2848_vm12, %v11806_v13  ;;  %10585 = vmatprep.subr.mxu0 %v11016_v1 }
 0x5d1   : > { %10581 = vmatpush3.msra.mxu1 %v11790_v0  ;;  %10582 = vmatprep.mubr.msk.f32.mxu1 %vm11015_vm4, %v11016_v1 }
 0x5d2   : > { %10578 = vmatmul.mubr.msk.f32.vlgmr.msra.gmra.mrb[62].mxu0 %vm2848_vm12, %v11808_v15  ;;  %10590 = vmatprep.subr.mxu1 %v11016_v1 }
 0x5d3   : > { %10587 = vmatprep.mubr.msk.f32.mxu0 %vm11015_vm4, %v11016_v1 }
 0x5d4   : > { %10583 = vmatmul.mubr.msk.f32.vlgmr.msra.gmra.mrb[62].mxu1 %vm2848_vm12, %v11810_v17 }
 0x5d5   : > { %10592 = vmatprep.mubr.msk.f32.mxu1 %vm11015_vm4, %v11016_v1 }
 0x679   : > { %v4636_v45 = vpop.f32.mrb[40].mxu0 }
 0x67a   : > { %v12056_v6 = vmul.f32 %v12048_v44, %v4636_v45  ;;  %v10469_v47 = vpop.f32.mrb[41].mxu0 }
 0x67b   : > { %v4709_v48 = vpop.f32.mrb[40].mxu1 }
 0x67c   : > { %v12064_v50 = vmul.f32 %v12053_v46, %v4709_v48  ;;  %v10474_v51 = vpop.f32.mrb[41].mxu1  ;;  %10586 = vmatpush3.msra.mxu0 %v12056_v6 }
 0x67d   : > { %v4782_v52 = vpop.f32.mrb[42].mxu0  ;;  %10595 = vmatprep.subr.mxu0 %v11016_v1  ;;  %10588 = vmatmul.mubr.msk.f32.vlgmr.msra.gmra.mrb[64].mxu0 %vm2848_vm12, %v11700_v27 }
 0x67e   : > { %v12076_v54 = vmul.f32 %v12061_v49, %v4782_v52  ;;  %v10479_v55 = vpop.f32.mrb[43].mxu0  ;;  %10591 = vmatpush3.msra.mxu1 %v12064_v50  ;;  %10597 = vmatprep.mubr.msk.f32.mxu0 %vm11015_vm4, %v11016_v1 }
 0x67f   : > { %v4855_v56 = vpop.f32.mrb[42].mxu1  ;;  %10600 = vmatprep.subr.mxu1 %v11016_v1  ;;  %10593 = vmatmul.mubr.msk.f32.vlgmr.msra.gmra.mrb[64].mxu1 %vm2848_vm12, %v11700_v27 }
 0x680   : > { %v12090_v58 = vmul.f32 %v12070_v53, %v4855_v56  ;;  %v10484_v59 = vpop.f32.mrb[43].mxu1  ;;  %10596 = vmatpush3.msra.mxu0 %v12076_v54  ;;  %10602 = vmatprep.mubr.msk.f32.mxu1 %vm11015_vm4, %v11016_v1 }
 0x681   : > { %v4928_v60 = vpop.f32.mrb[44].mxu0  ;;  %10605 = vmatprep.subr.mxu0 %v11016_v1  ;;  %10598 = vmatmul.mubr.msk.f32.vlgmr.msra.gmra.mrb[66].mxu0 %vm2848_vm12, %v11700_v27 }
 0x682   : > { %v12104_v2 = vmul.f32 %v12084_v57, %v4928_v60  ;;  %v10489_v3 = vpop.f32.mrb[45].mxu0  ;;  %10601 = vmatpush3.msra.mxu1 %v12090_v58  ;;  %10607 = vmatprep.mubr.msk.f32.mxu0 %vm11015_vm4, %v11016_v1 }
 0x683   : > { %v5001_v36 = vpop.f32.mrb[44].mxu1  ;;  %10610 = vmatprep.subr.mxu1 %v11016_v1  ;;  %10603 = vmatmul.mubr.msk.f32.vlgmr.msra.gmra.mrb[66].mxu1 %vm2848_vm12, %v11700_v27 }
 0x684   : > { %v12118_v7 = vmul.f32 %v12098_v62, %v5001_v36  ;;  %v10494_v8 = vpop.f32.mrb[45].mxu1  ;;  %10606 = vmatpush3.msra.mxu0 %v12104_v2  ;;  %10612 = vmatprep.mubr.msk.f32.mxu1 %vm11015_vm4, %v11016_v1 }
 0x685   : > { %v5074_v9 = vpop.f32.mrb[46].mxu0  ;;  %10615 = vmatprep.subr.mxu0 %v11016_v1  ;;  %10608 = vmatmul.mubr.msk.f32.vlgmr.msra.gmra.mrb[68].mxu0 %vm2848_vm12, %v11700_v27 }
 0x686   : > { %v12132_v11 = vmul.f32 %v12112_v5, %v5074_v9  ;;  %v10499_v12 = vpop.f32.mrb[47].mxu0  ;;  %10611 = vmatpush3.msra.mxu1 %v12118_v7  ;;  %10617 = vmatprep.mubr.msk.f32.mxu0 %vm11015_vm4, %v11016_v1 }
 0x687   : > { %v5147_v13 = vpop.f32.mrb[46].mxu1  ;;  %10620 = vmatprep.subr.mxu1 %v11016_v1  ;;  %10613 = vmatmul.mubr.msk.f32.vlgmr.msra.gmra.mrb[68].mxu1 %vm2848_vm12, %v11700_v27 }
 0x688   : > { %v12141_v14 = vmul.f32 %v12126_v10, %v5147_v13  ;;  %v10504_v15 = vpop.f32.mrb[47].mxu1  ;;  %10616 = vmatpush3.msra.mxu0 %v12132_v11  ;;  %10622 = vmatprep.mubr.msk.f32.mxu1 %vm11015_vm4, %v11016_v1 }
 0x689   : > { %v5217_v16 = vpop.f32.mrb[48].mxu0  ;;  %10618 = vmatmul.mubr.msk.f32.vlgmr.msra.gmra.mrb[70].mxu0 %vm2848_vm12, %v11700_v27  ;;  %10625 = vmatprep.subr.mxu0 %v11016_v1 }
 0x68a   : > { %v10509_v17 = vpop.f32.mrb[49].mxu0  ;;  %10621 = vmatpush3.msra.mxu1 %v12141_v14  ;;  %10627 = vmatprep.mubr.msk.f32.mxu0 %vm11015_vm4, %v11016_v1 }
 0x68b   : > { %v5287_v18 = vpop.f32.mrb[48].mxu1  ;;  %10623 = vmatmul.mubr.msk.f32.vlgmr.msra.gmra.mrb[70].mxu1 %vm2848_vm12, %v11700_v27  ;;  %10630 = vmatprep.subr.mxu1 %v11016_v1 }
 0x68c   : > { %v10514_v4 = vpop.f32.mrb[49].mxu1  ;;  %10632 = vmatprep.mubr.msk.f32.mxu1 %vm11015_vm4, %v11016_v1 }
 0x68d   : > { %v5357_v19 = vpop.f32.mrb[50].mxu0 }
 0x68e   : > { %v10519_v20 = vpop.f32.mrb[51].mxu0 }
 0x68f   : > { %v5427_v21 = vpop.f32.mrb[50].mxu1 }
 0x690   : > { %v10524_v22 = vpop.f32.mrb[51].mxu1 }
 0x691   : > { %v5497_v23 = vpop.f32.mrb[52].mxu0 }
 0x692   : > { %v10529_v24 = vpop.f32.mrb[53].mxu0 }
 0x693   : > { %v5567_v25 = vpop.f32.mrb[52].mxu1 }
 0x694   : > { %v10534_v26 = vpop.f32.mrb[53].mxu1 }
 0x695   : > { %v5637_v28 = vpop.f32.mrb[54].mxu0 }
 0x696   : > { %v10539_v29 = vpop.f32.mrb[55].mxu0 }
 0x697   : > { %v5707_v30 = vpop.f32.mrb[54].mxu1 }
 0x698   : > { %v10544_v31 = vpop.f32.mrb[55].mxu1 }
 0x699   : > { %v5777_v32 = vpop.f32.mrb[56].mxu0 }
 0x69a   : > { %v6271_v33 = vsub.f32 %v5217_v16, %v5777_v32  ;;  %v10549_v34 = vpop.f32.mrb[57].mxu0 }
 0x69b   : > { %v5847_v35 = vpop.f32.mrb[56].mxu1 }
 0x69c   : > { %v12158_v37 = vmul.f32 %v12048_v44, %v6271_v33  ;;  %v6272_v38 = vsub.f32 %v5287_v18, %v5847_v35  ;;  %v10554_v39 = vpop.f32.mrb[57].mxu1 }
 0x69d   : > { %v5917_v61 = vpop.f32.mrb[58].mxu0 }
 0x69e   : > { %v12161_v41 = vmul.f32 %v12053_v46, %v6272_v38  ;;  %v6273_v42 = vsub.f32 %v5357_v19, %v5917_v61  ;;  %v10559_v43 = vpop.f32.mrb[59].mxu0  ;;  %10626 = vmatpush3.msra.mxu0 %v12158_v37 }
 0x69f   : > { %v5987_v45 = vpop.f32.mrb[58].mxu1  ;;  %10628 = vmatmul.mubr.msk.f32.vlgmr.msra.gmra.mrb[72].mxu0 %vm2848_vm12, %v11738_v63  ;;  %10635 = vmatprep.subr.mxu0 %v11016_v1 }
 0x6a0   : > { %v12168_v47 = vmul.f32 %v12061_v49, %v6273_v42  ;;  %v6274_v44 = vsub.f32 %v5427_v21, %v5987_v45  ;;  %v10564_v48 = vpop.f32.mrb[59].mxu1  ;;  %10631 = vmatpush3.msra.mxu1 %v12161_v41  ;;  %10637 = vmatprep.mubr.msk.f32.mxu0 %vm11015_vm4, %v11016_v1 }
 0x6a1   : > { %v6057_v46 = vpop.f32.mrb[60].mxu0  ;;  %10633 = vmatmul.mubr.msk.f32.vlgmr.msra.gmra.mrb[72].mxu1 %vm2848_vm12, %v11738_v63  ;;  %10640 = vmatprep.subr.mxu1 %v11016_v1 }
 0x6a2   : > { %v12177_v51 = vmul.f32 %v12070_v53, %v6274_v44  ;;  %v6275_v52 = vsub.f32 %v5497_v23, %v6057_v46  ;;  %v10569_v55 = vpop.f32.mrb[61].mxu0  ;;  %10636 = vmatpush3.msra.mxu0 %v12168_v47  ;;  %10642 = vmatprep.mubr.msk.f32.mxu1 %vm11015_vm4, %v11016_v1 }
 0x6a3   : > { %v6127_v49 = vpop.f32.mrb[60].mxu1  ;;  %10638 = vmatmul.mubr.msk.f32.vlgmr.msra.gmra.mrb[74].mxu0 %vm2848_vm12, %v11738_v63  ;;  %10645 = vmatprep.subr.mxu0 %v11016_v1 }
 0x6a4   : > { %v12186_v56 = vmul.f32 %v12084_v57, %v6275_v52  ;;  %v6276_v59 = vsub.f32 %v5567_v25, %v6127_v49  ;;  %v10574_v60 = vpop.f32.mrb[61].mxu1  ;;  %10641 = vmatpush3.msra.mxu1 %v12177_v51  ;;  %10647 = vmatprep.mubr.msk.f32.mxu0 %vm11015_vm4, %v11016_v1 }
 0x6a5   : > { %v6197_v53 = vpop.f32.mrb[62].mxu0  ;;  %10643 = vmatmul.mubr.msk.f32.vlgmr.msra.gmra.mrb[74].mxu1 %vm2848_vm12, %v11738_v63  ;;  %10650 = vmatprep.subr.mxu1 %v11016_v1 }
 0x6a6   : > { %v12195_v3 = vmul.f32 %v12098_v62, %v6276_v59  ;;  %v6277_v36 = vsub.f32 %v5637_v28, %v6197_v53  ;;  %v10579_v8 = vpop.f32.mrb[63].mxu0  ;;  %10646 = vmatpush3.msra.mxu0 %v12186_v56  ;;  %10652 = vmatprep.mubr.msk.f32.mxu1 %vm11015_vm4, %v11016_v1 }
 0x6a7   : > { %v6267_v57 = vpop.f32.mrb[62].mxu1  ;;  %10648 = vmatmul.mubr.msk.f32.vlgmr.msra.gmra.mrb[76].mxu0 %vm2848_vm12, %v11738_v63  ;;  %10655 = vmatprep.subr.mxu0 %v11016_v1 }
 0x6a8   : > { %v12204_v9 = vmul.f32 %v12112_v5, %v6277_v36  ;;  %v6278_v12 = vsub.f32 %v5707_v30, %v6267_v57  ;;  %v10584_v13 = vpop.f32.mrb[63].mxu1  ;;  %10651 = vmatpush3.msra.mxu1 %v12195_v3  ;;  %10657 = vmatprep.mubr.msk.f32.mxu0 %vm11015_vm4, %v11016_v1 }
 0x6a9   : > { %10653 = vmatmul.mubr.msk.f32.vlgmr.msra.gmra.mrb[76].mxu1 %vm2848_vm12, %v11738_v63  ;;  %10660 = vmatprep.subr.mxu1 %v11016_v1 }
 0x6aa   : > { %v12213_v62 = vmul.f32 %v12126_v10, %v6278_v12  ;;  %10656 = vmatpush3.msra.mxu0 %v12204_v9  ;;  %10662 = vmatprep.mubr.msk.f32.mxu1 %vm11015_vm4, %v11016_v1 }
 0x6ab   : > { %10658 = vmatmul.mubr.msk.f32.vlgmr.msra.gmra.mrb[78].mxu0 %vm2848_vm12, %v11738_v63  ;;  %10665 = vmatprep.subr.mxu0 %v11016_v1 }
 0x6ac   : > { %10661 = vmatpush3.msra.mxu1 %v12213_v62  ;;  %10666 = vmatpush3.msra.mxu0 %v12056_v6 }
 0x6ad   : > { %10663 = vmatmul.mubr.msk.f32.vlgmr.msra.gmra.mrb[78].mxu1 %vm2848_vm12, %v11738_v63  ;;  %10670 = vmatprep.subr.mxu1 %v11016_v1 }
 0x6ae   : > { %10667 = vmatprep.mubr.msk.f32.mxu0 %vm11015_vm4, %v11016_v1  ;;  %10671 = vmatpush3.msra.mxu1 %v12064_v50 }
 0x6af   : > { %10675 = vmatprep.subr.mxu0 %v11016_v1  ;;  %10668 = vmatmul.mubr.msk.f32.vlgmr.msra.gmra.mrb[80].mxu0 %vm2848_vm12, %v11738_v63 }
 0x6b0   : > { %10676 = vmatpush3.msra.mxu0 %v12076_v54  ;;  %10672 = vmatprep.mubr.msk.f32.mxu1 %vm11015_vm4, %v11016_v1 }
 0x6b1   : > { %10680 = vmatprep.subr.mxu1 %v11016_v1  ;;  %10673 = vmatmul.mubr.msk.f32.vlgmr.msra.gmra.mrb[80].mxu1 %vm2848_vm12, %v11738_v63 }
 0x6b2   : > { %10681 = vmatpush3.msra.mxu1 %v12090_v58  ;;  %10677 = vmatprep.mubr.msk.f32.mxu0 %vm11015_vm4, %v11016_v1 }
 0x6b3   : > { %10685 = vmatprep.subr.mxu0 %v11016_v1  ;;  %10678 = vmatmul.mubr.msk.f32.vlgmr.msra.gmra.mrb[82].mxu0 %vm2848_vm12, %v11738_v63 }
 0x6b4   : > { %10686 = vmatpush3.msra.mxu0 %v12104_v2  ;;  %10682 = vmatprep.mubr.msk.f32.mxu1 %vm11015_vm4, %v11016_v1 }
 0x6b5   : > { %10690 = vmatprep.subr.mxu1 %v11016_v1  ;;  %10683 = vmatmul.mubr.msk.f32.vlgmr.msra.gmra.mrb[82].mxu1 %vm2848_vm12, %v11738_v63 }
 0x6b6   : > { %10691 = vmatpush3.msra.mxu1 %v12118_v7  ;;  %10687 = vmatprep.mubr.msk.f32.mxu0 %vm11015_vm4, %v11016_v1 }
 0x6b7   : > { %10695 = vmatprep.subr.mxu0 %v11016_v1  ;;  %10688 = vmatmul.mubr.msk.f32.vlgmr.msra.gmra.mrb[84].mxu0 %vm2848_vm12, %v11738_v63 }
 0x6b8   : > { %10696 = vmatpush3.msra.mxu0 %v12132_v11  ;;  %10692 = vmatprep.mubr.msk.f32.mxu1 %vm11015_vm4, %v11016_v1 }
 0x6b9   : > { %10700 = vmatprep.subr.mxu1 %v11016_v1  ;;  %10693 = vmatmul.mubr.msk.f32.vlgmr.msra.gmra.mrb[84].mxu1 %vm2848_vm12, %v11738_v63 }
 0x6ba   : > { %10701 = vmatpush3.msra.mxu1 %v12141_v14  ;;  %10697 = vmatprep.mubr.msk.f32.mxu0 %vm11015_vm4, %v11016_v1 }
 0x6bb   : > { %10705 = vmatprep.subr.mxu0 %v11016_v1  ;;  %10698 = vmatmul.mubr.msk.f32.vlgmr.msra.gmra.mrb[86].mxu0 %vm2848_vm12, %v11738_v63 }
 0x6bc   : > { %10706 = vmatpush3.msra.mxu0 %v12158_v37  ;;  %10702 = vmatprep.mubr.msk.f32.mxu1 %vm11015_vm4, %v11016_v1 }
 0x6bd   : > { %10710 = vmatprep.subr.mxu1 %v11016_v1  ;;  %10703 = vmatmul.mubr.msk.f32.vlgmr.msra.gmra.mrb[86].mxu1 %vm2848_vm12, %v11738_v63 }
 0x6be   : > { %10711 = vmatpush3.msra.mxu1 %v12161_v41  ;;  %10707 = vmatprep.mubr.msk.f32.mxu0 %vm11015_vm4, %v11016_v1 }
 0x6bf   : > { %10715 = vmatprep.subr.mxu0 %v11016_v1  ;;  %10708 = vmatmul.mubr.msk.f32.vlgmr.msra.gmra.mrb[80].mxu0 %vm2848_vm12, %v11700_v27 }
 0x6c0   : > { %10716 = vmatpush3.msra.mxu0 %v12168_v47  ;;  %10712 = vmatprep.mubr.msk.f32.mxu1 %vm11015_vm4, %v11016_v1 }
 0x6c1   : > { %10720 = vmatprep.subr.mxu1 %v11016_v1  ;;  %10713 = vmatmul.mubr.msk.f32.vlgmr.msra.gmra.mrb[80].mxu1 %vm2848_vm12, %v11700_v27 }
 0x6c2   : > { %10721 = vmatpush3.msra.mxu1 %v12177_v51  ;;  %10717 = vmatprep.mubr.msk.f32.mxu0 %vm11015_vm4, %v11016_v1 }
 0x6c3   : > { %10725 = vmatprep.subr.mxu0 %v11016_v1  ;;  %10718 = vmatmul.mubr.msk.f32.vlgmr.msra.gmra.mrb[82].mxu0 %vm2848_vm12, %v11700_v27 }
 0x6c4   : > { %10726 = vmatpush3.msra.mxu0 %v12186_v56  ;;  %10722 = vmatprep.mubr.msk.f32.mxu1 %vm11015_vm4, %v11016_v1 }
 0x6c5   : > { %10730 = vmatprep.subr.mxu1 %v11016_v1  ;;  %10723 = vmatmul.mubr.msk.f32.vlgmr.msra.gmra.mrb[82].mxu1 %vm2848_vm12, %v11700_v27 }
 0x6c6   : > { %10731 = vmatpush3.msra.mxu1 %v12195_v3  ;;  %10727 = vmatprep.mubr.msk.f32.mxu0 %vm11015_vm4, %v11016_v1 }
 0x6c7   : > { %10735 = vmatprep.subr.mxu0 %v11016_v1  ;;  %10728 = vmatmul.mubr.msk.f32.vlgmr.msra.gmra.mrb[84].mxu0 %vm2848_vm12, %v11700_v27 }
 0x6c8   : > { %10736 = vmatpush3.msra.mxu0 %v12204_v9  ;;  %10732 = vmatprep.mubr.msk.f32.mxu1 %vm11015_vm4, %v11016_v1 }
 0x6c9   : > { %10740 = vmatprep.subr.mxu1 %v11016_v1  ;;  %10733 = vmatmul.mubr.msk.f32.vlgmr.msra.gmra.mrb[84].mxu1 %vm2848_vm12, %v11700_v27 }
 0x6ca   : > { %10741 = vmatpush3.msra.mxu1 %v12213_v62  ;;  %10737 = vmatprep.mubr.msk.f32.mxu0 %vm11015_vm4, %v11016_v1 }
 0x6cb   : > { %10738 = vmatmul.mubr.msk.f32.vlgmr.msra.gmra.mrb[86].mxu0 %vm2848_vm12, %v11700_v27  ;;  %10742 = vmatprep.mubr.msk.f32.mxu1 %vm11015_vm4, %v11016_v1 }
 0x6cc   : > { %10745 = vmatprep.subr.mxu0 %v11016_v1  ;;  %10747 = vmatprep.mubr.msk.f32.mxu0 %vm11015_vm4, %v11016_v1 }
 0x6cd   : > { %10743 = vmatmul.mubr.msk.f32.vlgmr.msra.gmra.mrb[86].mxu1 %vm2848_vm12, %v11700_v27  ;;  %10746 = vmatpush3.msra.mxu0 %v11874_v40 }
 0x6ce   : > { %10750 = vmatprep.subr.mxu1 %v11016_v1  ;;  %10752 = vmatprep.mubr.msk.f32.mxu1 %vm11015_vm4, %v11016_v1 }
 0x6cf   : > { %10751 = vmatpush3.msra.mxu1 %v11874_v40  ;;  %10755 = vmatprep.subr.mxu0 %v11016_v1 }
 0x6d0   : > { %10760 = vmatprep.subr.mxu1 %v11016_v1 }
 0x750   : > { %v6369_v63 = vpop.f32.mrb[64].mxu0 }
 0x751   : > { %v10589_v6 = vpop.f32.mrb[65].mxu0 }
 0x752   : > { %v6439_v50 = vpop.f32.mrb[64].mxu1 }
 0x753   : > { %v10594_v54 = vpop.f32.mrb[65].mxu1 }
 0x754   : > { %v6509_v58 = vpop.f32.mrb[66].mxu0 }
 0x755   : > { %v10599_v2 = vpop.f32.mrb[67].mxu0 }
 0x756   : > { %v6579_v27 = vpop.f32.mrb[66].mxu1 }
 0x757   : > { %v10604_v5 = vpop.f32.mrb[67].mxu1 }
 0x758   : > { %v6649_v7 = vpop.f32.mrb[68].mxu0 }
 0x759   : > { %v10609_v10 = vpop.f32.mrb[69].mxu0 }
 0x75a   : > { %v6719_v11 = vpop.f32.mrb[68].mxu1 }
 0x75b   : > { %v10614_v14 = vpop.f32.mrb[69].mxu1 }
 0x75c   : > { %v6789_v15 = vpop.f32.mrb[70].mxu0 }
 0x75d   : > { %v10619_v16 = vpop.f32.mrb[71].mxu0 }
 0x75e   : > { %v6859_v17 = vpop.f32.mrb[70].mxu1 }
 0x75f   : > { %v10624_v18 = vpop.f32.mrb[71].mxu1 }
 0x772   : > { %v6929_v4 = vpop.f32.mrb[72].mxu0 }
 0x773   : > { %v7423_v19 = vsub.f32 %v6369_v63, %v6929_v4  ;;  %v10629_v20 = vpop.f32.mrb[73].mxu0 }
 0x774   : > { %v6999_v21 = vpop.f32.mrb[72].mxu1 }
 0x775   : > { %v7424_v22 = vsub.f32 %v6439_v50, %v6999_v21  ;;  %10748 = vmatmul.mubr.msk.f32.vlgmr.msra.gmra.mrb[88].mxu0 %vm2848_vm12, %v7423_v19  ;;  %v10634_v23 = vpop.f32.mrb[73].mxu1 }
 0x776   : > { %v7069_v24 = vpop.f32.mrb[74].mxu0  ;;  %10756 = vmatpush3.msra.mxu0 %v11874_v40  ;;  %10757 = vmatprep.mubr.msk.f32.mxu0 %vm11015_vm4, %v11016_v1 }
 0x777   : > { %v7425_v25 = vsub.f32 %v6509_v58, %v7069_v24  ;;  %10753 = vmatmul.mubr.msk.f32.vlgmr.msra.gmra.mrb[88].mxu1 %vm2848_vm12, %v7424_v22  ;;  %v10639_v26 = vpop.f32.mrb[75].mxu0  ;;  %10765 = vmatprep.subr.mxu0 %v11016_v1 }
 0x778   : > { %v7139_v28 = vpop.f32.mrb[74].mxu1  ;;  %10761 = vmatpush3.msra.mxu1 %v11874_v40  ;;  %10762 = vmatprep.mubr.msk.f32.mxu1 %vm11015_vm4, %v11016_v1 }
 0x779   : > { %v7426_v29 = vsub.f32 %v6579_v27, %v7139_v28  ;;  %10758 = vmatmul.mubr.msk.f32.vlgmr.msra.gmra.mrb[90].mxu0 %vm2848_vm12, %v7425_v25  ;;  %v10644_v30 = vpop.f32.mrb[75].mxu1  ;;  %10770 = vmatprep.subr.mxu1 %v11016_v1 }
 0x77a   : > { %v7209_v31 = vpop.f32.mrb[76].mxu0  ;;  %10766 = vmatpush3.msra.mxu0 %v11874_v40  ;;  %10767 = vmatprep.mubr.msk.f32.mxu0 %vm11015_vm4, %v11016_v1 }
 0x77b   : > { %v7427_v32 = vsub.f32 %v6649_v7, %v7209_v31  ;;  %10763 = vmatmul.mubr.msk.f32.vlgmr.msra.gmra.mrb[90].mxu1 %vm2848_vm12, %v7426_v29  ;;  %v10649_v33 = vpop.f32.mrb[77].mxu0  ;;  %10775 = vmatprep.subr.mxu0 %v11016_v1 }
 0x77c   : > { %v7279_v34 = vpop.f32.mrb[76].mxu1  ;;  %10771 = vmatpush3.msra.mxu1 %v11874_v40  ;;  %10772 = vmatprep.mubr.msk.f32.mxu1 %vm11015_vm4, %v11016_v1 }
 0x77d   : > { %v7428_v35 = vsub.f32 %v6719_v11, %v7279_v34  ;;  %10768 = vmatmul.mubr.msk.f32.vlgmr.msra.gmra.mrb[92].mxu0 %vm2848_vm12, %v7427_v32  ;;  %v10654_v37 = vpop.f32.mrb[77].mxu1  ;;  %10780 = vmatprep.subr.mxu1 %v11016_v1 }
 0x77e   : > { %v7349_v38 = vpop.f32.mrb[78].mxu0  ;;  %10776 = vmatpush3.msra.mxu0 %v11874_v40  ;;  %10777 = vmatprep.mubr.msk.f32.mxu0 %vm11015_vm4, %v11016_v1 }
 0x77f   : > { %v7429_v39 = vsub.f32 %v6789_v15, %v7349_v38  ;;  %10773 = vmatmul.mubr.msk.f32.vlgmr.msra.gmra.mrb[92].mxu1 %vm2848_vm12, %v7428_v35  ;;  %v10659_v61 = vpop.f32.mrb[79].mxu0  ;;  %10785 = vmatprep.subr.mxu0 %v11016_v1 }
 0x780   : > { %v7419_v41 = vpop.f32.mrb[78].mxu1  ;;  %10781 = vmatpush3.msra.mxu1 %v11874_v40  ;;  %10782 = vmatprep.mubr.msk.f32.mxu1 %vm11015_vm4, %v11016_v1 }
 0x781   : > { %v7430_v42 = vsub.f32 %v6859_v17, %v7419_v41  ;;  %10778 = vmatmul.mubr.msk.f32.vlgmr.msra.gmra.mrb[94].mxu0 %vm2848_vm12, %v7429_v39  ;;  %v10664_v43 = vpop.f32.mrb[79].mxu1  ;;  %10790 = vmatprep.subr.mxu1 %v11016_v1 }
 0x782   : > { %10786 = vmatpush3.msra.mxu0 %v11790_v0  ;;  %10787 = vmatprep.mubr.msk.f32.mxu0 %vm11015_vm4, %v11016_v1 }
 0x783   : > { %10783 = vmatmul.mubr.msk.f32.vlgmr.msra.gmra.mrb[94].mxu1 %vm2848_vm12, %v7430_v42  ;;  %10795 = vmatprep.subr.mxu0 %v11016_v1 }
 0x784   : > { %10791 = vmatpush3.msra.mxu1 %v11790_v0  ;;  %10792 = vmatprep.mubr.msk.f32.mxu1 %vm11015_vm4, %v11016_v1 }
 0x785   : > { %10800 = vmatprep.subr.mxu1 %v11016_v1 }
 0x792   : > { %v8057_v40 = vpop.f32.mrb[80].mxu0 }
 0x793   : > { %v10709_v45 = vpop.f32.mrb[81].mxu0  ;;  %10788 = vmatmul.mubr.msk.f32.vlgmr.msra.gmra.mrb[96].mxu0 %vm2848_vm12, %v8057_v40 }
 0x794   : > { %v8127_v47 = vpop.f32.mrb[80].mxu1  ;;  %10796 = vmatpush3.msra.mxu0 %v11790_v0  ;;  %10797 = vmatprep.mubr.msk.f32.mxu0 %vm11015_vm4, %v11016_v1 }
 0x795   : > { %v10714_v44 = vpop.f32.mrb[81].mxu1  ;;  %10793 = vmatmul.mubr.msk.f32.vlgmr.msra.gmra.mrb[96].mxu1 %vm2848_vm12, %v8127_v47  ;;  %10805 = vmatprep.subr.mxu0 %v11016_v1 }
 0x796   : > { %v8197_v48 = vpop.f32.mrb[82].mxu0  ;;  %10801 = vmatpush3.msra.mxu1 %v11790_v0  ;;  %10802 = vmatprep.mubr.msk.f32.mxu1 %vm11015_vm4, %v11016_v1 }
 0x797   : > { %v10719_v46 = vpop.f32.mrb[83].mxu0  ;;  %10798 = vmatmul.mubr.msk.f32.vlgmr.msra.gmra.mrb[98].mxu0 %vm2848_vm12, %v8197_v48  ;;  %10810 = vmatprep.subr.mxu1 %v11016_v1 }
 0x798   : > { %v8267_v51 = vpop.f32.mrb[82].mxu1  ;;  %10806 = vmatpush3.msra.mxu0 %v11790_v0  ;;  %10807 = vmatprep.mubr.msk.f32.mxu0 %vm11015_vm4, %v11016_v1 }
 0x799   : > { %v10724_v52 = vpop.f32.mrb[83].mxu1  ;;  %10803 = vmatmul.mubr.msk.f32.vlgmr.msra.gmra.mrb[98].mxu1 %vm2848_vm12, %v8267_v51  ;;  %10815 = vmatprep.subr.mxu0 %v11016_v1 }
 0x79a   : > { %v8337_v55 = vpop.f32.mrb[84].mxu0  ;;  %10811 = vmatpush3.msra.mxu1 %v11790_v0  ;;  %10812 = vmatprep.mubr.msk.f32.mxu1 %vm11015_vm4, %v11016_v1 }
 0x79b   : > { %v10729_v49 = vpop.f32.mrb[85].mxu0  ;;  %10808 = vmatmul.mubr.msk.f32.vlgmr.msra.gmra.mrb[100].mxu0 %vm2848_vm12, %v8337_v55  ;;  %10820 = vmatprep.subr.mxu1 %v11016_v1 }
 0x79c   : > { %v8407_v56 = vpop.f32.mrb[84].mxu1  ;;  %10816 = vmatpush3.msra.mxu0 %v11790_v0  ;;  %10817 = vmatprep.mubr.msk.f32.mxu0 %vm11015_vm4, %v11016_v1 }
 0x79d   : > { %v10734_v59 = vpop.f32.mrb[85].mxu1  ;;  %10813 = vmatmul.mubr.msk.f32.vlgmr.msra.gmra.mrb[100].mxu1 %vm2848_vm12, %v8407_v56 }
 0x79e   : > { %v8477_v60 = vpop.f32.mrb[86].mxu0  ;;  %10821 = vmatpush3.msra.mxu1 %v11790_v0  ;;  %10822 = vmatprep.mubr.msk.f32.mxu1 %vm11015_vm4, %v11016_v1 }
 0x79f   : > { %v10739_v53 = vpop.f32.mrb[87].mxu0  ;;  %10818 = vmatmul.mubr.msk.f32.vlgmr.msra.gmra.mrb[102].mxu0 %vm2848_vm12, %v8477_v60 }
 0x7a0   : > { %v8547_v3 = vpop.f32.mrb[86].mxu1 }
 0x7a1   : > { %v10744_v36 = vpop.f32.mrb[87].mxu1  ;;  %10823 = vmatmul.mubr.msk.f32.vlgmr.msra.gmra.mrb[102].mxu1 %vm2848_vm12, %v8547_v3 }
 0x848   : > { %v8620_v8 = vpop.f32.mrb[88].mxu0 }
 0x849   : > { %v10749_v57 = vpop.f32.mrb[89].mxu0 }
 0x84a   : > { %v8693_v9 = vpop.f32.mrb[88].mxu1 }
 0x84b   : > { %v10754_v12 = vpop.f32.mrb[89].mxu1 }
 0x84c   : > { %v8766_v13 = vpop.f32.mrb[90].mxu0 }
 0x84d   : > { %v10759_v62 = vpop.f32.mrb[91].mxu0 }
 0x84e   : > { %v8839_v63 = vpop.f32.mrb[90].mxu1 }
 0x84f   : > { %v10764_v0 = vpop.f32.mrb[91].mxu1 }
 0x850   : > { %v8912_v6 = vpop.f32.mrb[92].mxu0 }
 0x851   : > { %v10769_v50 = vpop.f32.mrb[93].mxu0 }
 0x852   : > { %v8985_v1 = vpop.f32.mrb[92].mxu1 }
 0x853   : > { %v10774_v54 = vpop.f32.mrb[93].mxu1 }
 0x854   : > { %v9058_v58 = vpop.f32.mrb[94].mxu0 }
 0x855   : > { %v10779_v2 = vpop.f32.mrb[95].mxu0 }
 0x856   : > { %v9131_v27 = vpop.f32.mrb[94].mxu1 }
 0x857   : > { %v10784_v5 = vpop.f32.mrb[95].mxu1 }
 0x866   : > { %v9204_v7 = vpop.f32.mrb[96].mxu0 }
 0x867   : > { %v9719_v10 = vsub.f32 %v8620_v8, %v9204_v7  ;;  %v10789_v11 = vpop.f32.mrb[97].mxu0 }
 0x868   : > { %v9277_v14 = vpop.f32.mrb[96].mxu1 }
 0x869   : > { %v9727_v15 = vmul.f32 0.015625, %v9719_v10  ;;  %v9720_v16 = vsub.f32 %v8693_v9, %v9277_v14  ;;  %v10794_v17 = vpop.f32.mrb[97].mxu1 }
 0x86a   : > { %v9350_v18 = vpop.f32.mrb[98].mxu0 }
 0x86b   : > { %9735 = vst.msk [vmem:[%s12402_s27] sm:$0xff] %vm2848_vm12, %v9727_v15  ;;  %v9728_v4 = vmul.f32 0.015625, %v9720_v16  ;;  %v9721_v19 = vsub.f32 %v8766_v13, %v9350_v18  ;;  %v10799_v20 = vpop.f32.mrb[99].mxu0 }
 0x86c   : > { %v9423_v21 = vpop.f32.mrb[98].mxu1 }
 0x86d   : > { %9736 = vst.msk [vmem:[%s12402_s27 + $0x8] sm:$0xff] %vm2848_vm12, %v9728_v4  ;;  %v9729_v22 = vmul.f32 0.015625, %v9721_v19  ;;  %v9722_v23 = vsub.f32 %v8839_v63, %v9423_v21  ;;  %v10804_v24 = vpop.f32.mrb[99].mxu1 }
 0x86e   : > { %v9496_v25 = vpop.f32.mrb[100].mxu0 }
 0x86f   : > { %9737 = vst.msk [vmem:[%s12402_s27 + $0x10] sm:$0xff] %vm2848_vm12, %v9729_v22  ;;  %v9730_v26 = vmul.f32 0.015625, %v9722_v23  ;;  %v9723_v28 = vsub.f32 %v8912_v6, %v9496_v25  ;;  %v10809_v29 = vpop.f32.mrb[101].mxu0 }
 0x870   : > { %v9569_v30 = vpop.f32.mrb[100].mxu1 }
 0x871   : > { %9738 = vst.msk [vmem:[%s12402_s27 + $0x18] sm:$0xff] %vm2848_vm12, %v9730_v26  ;;  %v9731_v31 = vmul.f32 0.015625, %v9723_v28  ;;  %v9724_v32 = vsub.f32 %v8985_v1, %v9569_v30  ;;  %v10814_v33 = vpop.f32.mrb[101].mxu1 }
 0x872   : > { %v9642_v34 = vpop.f32.mrb[102].mxu0 }
 0x873   : > { %9739 = vst.msk [vmem:[%s12402_s27 + $0x20] sm:$0xff] %vm2848_vm12, %v9731_v31  ;;  %v9732_v35 = vmul.f32 0.015625, %v9724_v32  ;;  %v9725_v37 = vsub.f32 %v9058_v58, %v9642_v34  ;;  %v10819_v38 = vpop.f32.mrb[103].mxu0 }
 0x874   : > { %v9715_v39 = vpop.f32.mrb[102].mxu1 }
 0x875   : > { %9740 = vst.msk [vmem:[%s12402_s27 + $0x28] sm:$0xff] %vm2848_vm12, %v9732_v35  ;;  %v9733_v61 = vmul.f32 0.015625, %v9725_v37  ;;  %v9726_v41 = vsub.f32 %v9131_v27, %v9715_v39  ;;  %v10824_v42 = vpop.f32.mrb[103].mxu1 }
 0x877   : > { %9741 = vst.msk [vmem:[%s12402_s27 + $0x30] sm:$0xff] %vm2848_vm12, %v9733_v61  ;;  %v9734_v43 = vmul.f32 0.015625, %v9726_v41 }
 0x879   : > { %9742 = vst.msk [vmem:[%s12402_s27 + $0x38] sm:$0xff] %vm2848_vm12, %v9734_v43 }
 0x87a   : > { %10961 = shalt.err (!%p10958_p3)
}
 0x87b   : > { %s10962_s25 = scalar_lea.hbm %s12421_s17, 1024  ;;  %s10966_s28 = scalar_lea.hbm %s12481_s9, 2048 }
 0x87c   : > { %p10963_p4 = scmp.ne.s32.totalorder %s12421_s17, %s10962_s25  ;;  %p10967_p9 = scmp.lt.u32.totalorder %s12421_s17, %s12481_s9 }
 0x87d   : > { %p10968_p10 = scmp.lt.u32.totalorder %s10966_s28, %s10962_s25  ;;  %p10970_p12 = scmp.lt.u32.totalorder %s10962_s25, %s12421_s17 }
 0x87e   : > { %p10964_p7 = pnand %p10963_p4, %p11113_p5 }
 0x87f   : > { %p10969_p11 = por %p10968_p10, %p10967_p9 }
 0x880   : > { %p10965_p8 = pneg %p10964_p7 }
 0x881   : > { %p10971_p13 = por %p10970_p12, %p10969_p11 }
 0x883   : > { %p10972_p0 = pnand %p10971_p13, %p10965_p8 }
 0x885   : > { %10975 = shalt.err (!%p10972_p0)
}
 0x886   : > { %s11023_s21 = smov 128   ;;  %s11024_s22 = smov 8  }
 0x887   : > { %10897 = dma.vmem_to_hbm [thread:$0]  (%p11113_p5), %s12423_s29, 1024, %s12421_s17, %s12431_s13, %s11023_s21, %s11023_s21, %s11024_s22  }
 0x888 PF: > { %p10903_p1 = scmp.ge.s32.totalorder %s11010_s12, 2  ;;  %s9772_s23 = sand.u32 1, %s10998_s30  }
 0x889   : > { %s9773_s24 = scalar_lea.sflag [#allocation6], %s9772_s23 }
 0x88a   : > { %p10900_p2 = pnand %p10903_p1, %p11117_p6 }
 0x88c   : > { %10993 = dma.done.wait (!%p10900_p2), %s9773_s24, 1024  }
 0x88d   : > { %10995 = vsyncadd (!%p10900_p2), %s9773_s24, 4294966272  ;;  %p19_p3 = scmp.ge.s32.totalorder %s11100_s15, 4   ;;  %s12486_s30 = smov %s11002_s10 }
 0x88e   : > { %s12487_s10 = smov %s11006_s11  ;;  %s12488_s11 = smov %s11111_s18 }
 0x88f   : > { %s12489_s12 = smov %s11100_s15  ;;  %21 = sbr.rel (!%p19_p3) target bundleno = 3 (0x3), region = 93 }
 0x896   :  { %9778 = vsyncpa [#allocation6], 1 }
 0x897   :  { %9780 = vsyncpa [#allocation6 + $0x1], 1 }

</bundles_post_ra>
